<compile_context>
chip_gen: v7x
topology: tpu7x:2x2x1
jax: 0.10.0
libtpu: 0.0.40
codegen_flags: <defaults>
</compile_context>

<pallas_src>
import functools

import numpy as np

import jax
import jax.numpy as jnp
from jax import lax
from jax.experimental import pallas as pl
from jax.experimental.pallas import tpu as pltpu

NEG_SLOPE = 0.01   # PyTorch LeakyReLU default negative_slope
BN_EPS = 1e-5


def _cdiv(a, b):
    return -(-a // b)


# ---------------------------------------------------------------------------
# pltpu.roll direction / lowering probe (runs once per slab shape).
# ---------------------------------------------------------------------------
@functools.lru_cache(maxsize=None)
def _roll_mode(h, l):
    """How does pltpu.roll behave for an [h, l] f32 slab on this chip?

    Returns "jnp"    : pltpu.roll(x, s, ax) == jnp.roll(x, s, ax)
            "neg"    : pltpu.roll(x, s, ax) == jnp.roll(x, -s, ax)
            "concat" : roll unusable at this shape -> slice+concat shifts.
    """
    def kern(x_ref, a_ref, b_ref, c_ref, d_ref):
        v = x_ref[...]
        a_ref[...] = pltpu.roll(v, 1, axis=1)
        b_ref[...] = pltpu.roll(v, -1, axis=1)
        c_ref[...] = pltpu.roll(v, 1, axis=0)
        d_ref[...] = pltpu.roll(v, -1, axis=0)

    x = np.arange(h * l, dtype=np.float32).reshape(h, l)
    try:
        outs = pl.pallas_call(
            kern,
            out_shape=tuple(jax.ShapeDtypeStruct((h, l), jnp.float32)
                            for _ in range(4)),
        )(jnp.asarray(x))
        a, b, c, d = [np.asarray(o) for o in jax.block_until_ready(outs)]
    except Exception:
        return "concat"

    def eq(y, s, ax):
        return np.array_equal(y, np.roll(x, s, axis=ax))

    if eq(a, 1, 1) and eq(b, -1, 1) and eq(c, 1, 0) and eq(d, -1, 0):
        return "jnp"
    if eq(a, -1, 1) and eq(b, 1, 1) and eq(c, -1, 0) and eq(d, 1, 0):
        return "neg"
    return "concat"


def _shift_fns(mode):
    """prev_*/next_* : out[..., i] = a[..., i-1] / a[..., i+1] (wrapped).

    Only reflect-masked boundary positions ever consume the wrapped element,
    so the wrap value itself never affects the result.
    """
    if mode in ("jnp", "neg"):
        s = 1 if mode == "jnp" else -1
        prev_lane = lambda a: pltpu.roll(a, s, axis=1)
        next_lane = lambda a: pltpu.roll(a, -s, axis=1)
        prev_row = lambda a: pltpu.roll(a, s, axis=0)
        next_row = lambda a: pltpu.roll(a, -s, axis=0)
    else:   # slice+concat fallback (known semantics, generic lowering)
        prev_lane = lambda a: jnp.concatenate([a[:, -1:], a[:, :-1]], axis=1)
        next_lane = lambda a: jnp.concatenate([a[:, 1:], a[:, :1]], axis=1)
        prev_row = lambda a: jnp.concatenate([a[-1:, :], a[:-1, :]], axis=0)
        next_row = lambda a: jnp.concatenate([a[1:, :], a[:1, :]], axis=0)
    return prev_lane, next_lane, prev_row, next_row


# ---------------------------------------------------------------------------
# Kernel
# ---------------------------------------------------------------------------
def _respath_kernel(w2_ref, w1_ref, b2_ref, b1_ref, x_ref, out_ref, act_ref,
                    *, C, H, W, Nb, reps, roll_mode):
    """Fused ResPath for one grid step (Nb batch elements packed on lanes).

    w2_ref : SMEM f32[C*C*9]  BN-folded 3x3 weight, flat ((co*C+ci)*3+ky)*3+kx
    w1_ref : SMEM f32[C*C]    BN-folded 1x1 weight, flat co*C+ci
    b2_ref : SMEM f32[C]      BN shift, 3x3 branch
    b1_ref : SMEM f32[C]      BN shift, 1x1 branch
    x_ref  : VMEM [1, C, H, Nb*W]  packed input block (lane = b*W + w)
    out_ref: VMEM [1, C, H, Nb*W]  packed output block
    act_ref: VMEM [C, H, Nb*W]     VMEM-resident f32 activation
    """
    L = Nb * W
    prev_lane, next_lane, prev_row, next_row = _shift_fns(roll_mode)

    # ---- loop-invariant values, hoisted above the stage loop --------------
    w2s = [[[[w2_ref[((co * C + ci) * 3 + ky) * 3 + kx] for kx in range(3)]
             for ky in range(3)] for ci in range(C)] for co in range(C)]
    w1s = [[w1_ref[co * C + ci] for ci in range(C)] for co in range(C)]
    bias2 = [jnp.full((H, L), b2_ref[co], jnp.float32) for co in range(C)]
    bias1 = [jnp.full((H, L), b1_ref[co], jnp.float32) for co in range(C)]

    # Reflect-boundary masks.  Column reflection is applied independently to
    # each packed batch segment of width W (lane % W); this also kills any
    # cross-batch bleed from the lane rolls.
    lane = lax.broadcasted_iota(jnp.int32, (H, L), 1)
    row = lax.broadcasted_iota(jnp.int32, (H, L), 0)
    col_first = (lane % W) == 0
    col_last = (lane % W) == (W - 1)
    row_first = row == 0
    row_last = row == (H - 1)

    # One HBM->VMEM read of x per grid step; everything else stays resident.
    act_ref[...] = x_ref[0].astype(jnp.float32)

    @pl.loop(0, reps)
    def _stage(s):
        acc2 = list(bias2)      # 3x3 branch accumulators (BN shift folded in)
        acc1 = list(bias1)      # 1x1 branch accumulators
        # C is tiny (4), so the convs run as VPU broadcast-scalar FMAs.
        # TODO(synk): for C >= 32 switch this unrolled C*C*9 nest to an MXU
        # contraction (jnp.dot per (ky, kx) tap with f32 accumulation).
        for ci in range(C):
            a = act_ref[ci]                                  # [H, L]

            # 1x1 branch (padding=0): the unshifted activation.
            for co in range(C):
                acc1[co] = acc1[co] + w1s[co][ci] * a

            # 3x3 branch: build each reflect-shifted tap ONCE (XLU rolls +
            # one boundary select) and reuse it for all C output channels.
            p_l = prev_lane(a)
            n_l = next_lane(a)
            cols = (jnp.where(col_first, n_l, p_l),          # kx=0 -> x-1
                    a,                                       # kx=1 -> x
                    jnp.where(col_last, p_l, n_l))           # kx=2 -> x+1
            for kx in range(3):
                cv = cols[kx]
                p_r = prev_row(cv)
                n_r = next_row(cv)
                taps = (jnp.where(row_first, n_r, p_r),      # ky=0 -> y-1
                        cv,                                  # ky=1 -> y
                        jnp.where(row_last, p_r, n_r))       # ky=2 -> y+1
                for ky in range(3):
                    t = taps[ky]
                    for co in range(C):
                        acc2[co] = acc2[co] + w2s[co][ci][ky][kx] * t

        # BN shift already in the accumulator init; Dropout2d is identity in
        # eval; LeakyReLU each branch; sum (matches res_block.forward).
        ys = []
        for co in range(C):
            v2 = acc2[co]
            v2 = jnp.where(v2 > 0, v2, NEG_SLOPE * v2)
            v1 = acc1[co]
            v1 = jnp.where(v1 > 0, v1, NEG_SLOPE * v1)
            ys.append(v2 + v1)

        # Last stage writes straight to the output block (no act->out copy);
        # earlier stages update the resident activation.  All reads of act_ref
        # for this stage happened above, so the in-place update is race-free.
        @pl.when(s == reps - 1)
        def _():
            for co in range(C):
                out_ref[0, co] = ys[co].astype(out_ref.dtype)

        @pl.when(s < reps - 1)
        def _():
            for co in range(C):
                act_ref[co] = ys[co]


# ---------------------------------------------------------------------------
# Wrapper
# ---------------------------------------------------------------------------
def _vmem_limit_bytes(C, H, L, in_dtype, out_dtype):
    blk = C * H * L
    # double-buffered input + output blocks, plus the resident f32 activation
    need = (2 * blk * jnp.dtype(in_dtype).itemsize
            + 2 * blk * jnp.dtype(out_dtype).itemsize
            + blk * 4)
    need = 2 * need + (8 << 20)            # headroom: compiler-internal scratch
    phys = 0
    try:
        info = pltpu.get_tpu_info()
        for name in ("vmem_capacity_bytes", "vmem_size_bytes", "vmem_bytes"):
            val = getattr(info, name, None)
            if val:
                phys = int(val)
                break
    except Exception:
        phys = 0
    if not phys:
        phys = 64 << 20                    # conservative default (v7x per-core)
    cap = (phys * 3) // 4                  # leave 25% of physical VMEM free
    return int(max(16 << 20, min(need, cap)))


def respath_forward(x_nchw, params, stage):
    """ResPath.forward (eval mode): the shared-weight res_block `stage` times."""
    N, C, H, W = x_nchw.shape
    reps = max(int(stage), 1)              # PyTorch: block(x), then stage-1 more

    # Fold the eval-mode BatchNorm scale into the conv weights; only the
    # per-channel shift goes to the kernel.
    w2f = (params["w2"] * params["s2"][:, None, None, None]).astype(jnp.float32)
    w1f = (params["w1"].reshape(C, C) * params["s1"][:, None]).astype(jnp.float32)
    b2 = params["b2"].astype(jnp.float32)
    b1 = params["b1"].astype(jnp.float32)

    # ---- lane packing: Nb batch elements side by side on the lane axis ----
    # Full 128-lane density needs Nb = 128 // W; Nb is additionally capped so
    # the grid keeps >= 2 steps (both v7x TensorCores busy) whenever N > 1.
    Nb = max(1, min(N, 128 // W if W <= 128 else 1))
    if N >= 2:
        Nb = min(Nb, _cdiv(N, 2))
    G = _cdiv(N, Nb)
    Np = G * Nb
    L = Nb * W

    xp = x_nchw
    if Np != N:
        xp = jnp.concatenate([xp, jnp.zeros((Np - N, C, H, W), xp.dtype)], 0)
    # Layout plumbing only: [Np,C,H,W] -> [G,C,H,Nb*W], lane index = b*W + w.
    xp = xp.reshape(G, Nb, C, H, W).transpose(0, 2, 3, 1, 4).reshape(G, C, H, L)

    roll_mode = _roll_mode(H, L)
    kernel = functools.partial(_respath_kernel, C=C, H=H, W=W, Nb=Nb,
                               reps=reps, roll_mode=roll_mode)

    smem = pl.BlockSpec(memory_space=pltpu.MemorySpace.SMEM)
    grid_spec = pltpu.PrefetchScalarGridSpec(
        num_scalar_prefetch=0,
        grid=(G,),
        in_specs=[smem, smem, smem, smem,
                  pl.BlockSpec((1, C, H, L), lambda g: (g, 0, 0, 0))],
        out_specs=pl.BlockSpec((1, C, H, L), lambda g: (g, 0, 0, 0)),
        scratch_shapes=[pltpu.VMEM((C, H, L), jnp.float32)],
    )

    # TODO(synk): add an H-tiled path (per-stage halo exchange or relaunch) for
    # feature maps whose [C, H, Nb*W] f32 residency exceeds the VMEM budget
    # below (matters first on v7x's 64 MiB VMEM).
    vmem_limit = _vmem_limit_bytes(C, H, L, xp.dtype, x_nchw.dtype)

    out = pl.pallas_call(
        kernel,
        grid_spec=grid_spec,
        out_shape=jax.ShapeDtypeStruct((G, C, H, L), x_nchw.dtype),
        compiler_params=pltpu.CompilerParams(
            dimension_semantics=("parallel",),
            vmem_limit_bytes=vmem_limit,
        ),
    )(w2f.reshape(-1), w1f.reshape(-1), b2, b1, xp)

    out = out.reshape(G, C, H, Nb, W).transpose(0, 3, 1, 2, 4)
    return out.reshape(Np, C, H, W)[:N]


# ---------------------------------------------------------------------------
# Parameters & pure-JAX reference
# ---------------------------------------------------------------------------
def make_params(key, channel):
    """Synthetic parameters matching res_block(channel, channel) in eval mode."""
    c = channel
    keys = jax.random.split(key, 10)
    w1 = 0.2 * jax.random.normal(keys[0], (c, c, 1, 1), jnp.float32)
    w2 = 0.2 * jax.random.normal(keys[1], (c, c, 3, 3), jnp.float32)

    def bn_fold(kg, kb, km, kv):
        gamma = 1.0 + 0.1 * jax.random.normal(kg, (c,), jnp.float32)
        beta = 0.1 * jax.random.normal(kb, (c,), jnp.float32)
        running_mean = 0.1 * jax.random.normal(km, (c,), jnp.float32)
        running_var = 1.0 + 0.1 * jax.random.uniform(kv, (c,), jnp.float32)
        scale = gamma / jnp.sqrt(running_var + BN_EPS)
        shift = beta - running_mean * scale
        return scale, shift

    s1, b1 = bn_fold(keys[2], keys[3], keys[4], keys[5])   # BN after 1x1 conv
    s2, b2 = bn_fold(keys[6], keys[7], keys[8], keys[9])   # BN after 3x3 conv
    return {"w1": w1, "w2": w2, "s1": s1, "b1": b1, "s2": s2, "b2": b2}


def _respath_reference(x, params, stage):
    """Pure-JAX reference (eval-mode PyTorch semantics) for verification."""
    C = x.shape[1]
    w1, w2 = params["w1"], params["w2"]
    s1 = params["s1"].reshape(1, C, 1, 1)
    b1 = params["b1"].reshape(1, C, 1, 1)
    s2 = params["s2"].reshape(1, C, 1, 1)
    b2 = params["b2"].reshape(1, C, 1, 1)
    dn = ("NCHW", "OIHW", "NCHW")

    def leaky(v):
        return jnp.where(v > 0, v, NEG_SLOPE * v)

    out = x
    for _ in range(max(int(stage), 1)):
        xp = jnp.pad(out, ((0, 0), (0, 0), (1, 1), (1, 1)), mode="reflect")
        y2 = lax.conv_general_dilated(xp, w2, (1, 1), "VALID",
                                      dimension_numbers=dn)
        y1 = lax.conv_general_dilated(out, w1, (1, 1), "VALID",
                                      dimension_numbers=dn)
        out = leaky(y2 * s2 + b2) + leaky(y1 * s1 + b1)
    return out


if __name__ == "__main__":
    key = jax.random.PRNGKey(0)
    kx, kp = jax.random.split(key)

    N, C, H, W = 2, 4, 16, 16   # NCHW, matching the PyTorch module convention
    stage = 3

    x = jax.random.normal(kx, (N, C, H, W), dtype=jnp.float32)
    params = make_params(kp, C)

    out = jax.block_until_ready(respath_forward(x, params, stage))

    assert out.shape == (N, C, H, W)
    assert bool(jnp.all(jnp.isfinite(out)))

    ref = _respath_reference(x, params, stage)
    max_err = float(jnp.max(jnp.abs(out - ref)))
    assert bool(jnp.allclose(out, ref, rtol=1e-3, atol=1e-3)), max_err

    print("KERNEL_OK")
</pallas_src>

<mosaic_0001>
module attributes {stable_mosaic.version = 11 : i64} {
  func.func @_respath_kernel(%arg0: i32, %arg1: memref<144xf32, #tpu.memory_space<smem>>, %arg2: memref<16xf32, #tpu.memory_space<smem>>, %arg3: memref<4xf32, #tpu.memory_space<smem>>, %arg4: memref<4xf32, #tpu.memory_space<smem>>, %arg5: memref<1x4x16x16xf32, #tpu.memory_space<vmem>>, %arg6: memref<1x4x16x16xf32, #tpu.memory_space<vmem>>, %arg7: memref<4x16x16xf32, #tpu.memory_space<vmem>>) attributes {dimension_semantics = [#tpu.dimension_semantics<parallel>], iteration_bounds = array<i64: 2>, scalar_prefetch = 0 : i64, scratch_operands = 1 : i64, tpu.core_type = #tpu.core_type<tc>, window_params = [{transform_indices = @transform_0, window_bounds = array<i64: 144>}, {transform_indices = @transform_1, window_bounds = array<i64: 16>}, {transform_indices = @transform_2, window_bounds = array<i64: 4>}, {transform_indices = @transform_3, window_bounds = array<i64: 4>}, {transform_indices = @transform_4, window_bounds = array<i64: 1, 4, 16, 16>}, {transform_indices = @transform_5, window_bounds = array<i64: 1, 4, 16, 16>}]} {
    %c0 = arith.constant 0 : index
    %0 = memref.load %arg1[%c0] : memref<144xf32, #tpu.memory_space<smem>>
    %c1 = arith.constant 1 : index
    %1 = memref.load %arg1[%c1] : memref<144xf32, #tpu.memory_space<smem>>
    %c2 = arith.constant 2 : index
    %2 = memref.load %arg1[%c2] : memref<144xf32, #tpu.memory_space<smem>>
    %c3 = arith.constant 3 : index
    %3 = memref.load %arg1[%c3] : memref<144xf32, #tpu.memory_space<smem>>
    %c4 = arith.constant 4 : index
    %4 = memref.load %arg1[%c4] : memref<144xf32, #tpu.memory_space<smem>>
    %c5 = arith.constant 5 : index
    %5 = memref.load %arg1[%c5] : memref<144xf32, #tpu.memory_space<smem>>
    %c6 = arith.constant 6 : index
    %6 = memref.load %arg1[%c6] : memref<144xf32, #tpu.memory_space<smem>>
    %c7 = arith.constant 7 : index
    %7 = memref.load %arg1[%c7] : memref<144xf32, #tpu.memory_space<smem>>
    %c8 = arith.constant 8 : index
    %8 = memref.load %arg1[%c8] : memref<144xf32, #tpu.memory_space<smem>>
    %c9 = arith.constant 9 : index
    %9 = memref.load %arg1[%c9] : memref<144xf32, #tpu.memory_space<smem>>
    %c10 = arith.constant 10 : index
    %10 = memref.load %arg1[%c10] : memref<144xf32, #tpu.memory_space<smem>>
    %c11 = arith.constant 11 : index
    %11 = memref.load %arg1[%c11] : memref<144xf32, #tpu.memory_space<smem>>
    %c12 = arith.constant 12 : index
    %12 = memref.load %arg1[%c12] : memref<144xf32, #tpu.memory_space<smem>>
    %c13 = arith.constant 13 : index
    %13 = memref.load %arg1[%c13] : memref<144xf32, #tpu.memory_space<smem>>
    %c14 = arith.constant 14 : index
    %14 = memref.load %arg1[%c14] : memref<144xf32, #tpu.memory_space<smem>>
    %c15 = arith.constant 15 : index
    %15 = memref.load %arg1[%c15] : memref<144xf32, #tpu.memory_space<smem>>
    %c16 = arith.constant 16 : index
    %16 = memref.load %arg1[%c16] : memref<144xf32, #tpu.memory_space<smem>>
    %c17 = arith.constant 17 : index
    %17 = memref.load %arg1[%c17] : memref<144xf32, #tpu.memory_space<smem>>
    %c18 = arith.constant 18 : index
    %18 = memref.load %arg1[%c18] : memref<144xf32, #tpu.memory_space<smem>>
    %c19 = arith.constant 19 : index
    %19 = memref.load %arg1[%c19] : memref<144xf32, #tpu.memory_space<smem>>
    %c20 = arith.constant 20 : index
    %20 = memref.load %arg1[%c20] : memref<144xf32, #tpu.memory_space<smem>>
    %c21 = arith.constant 21 : index
    %21 = memref.load %arg1[%c21] : memref<144xf32, #tpu.memory_space<smem>>
    %c22 = arith.constant 22 : index
    %22 = memref.load %arg1[%c22] : memref<144xf32, #tpu.memory_space<smem>>
    %c23 = arith.constant 23 : index
    %23 = memref.load %arg1[%c23] : memref<144xf32, #tpu.memory_space<smem>>
    %c24 = arith.constant 24 : index
    %24 = memref.load %arg1[%c24] : memref<144xf32, #tpu.memory_space<smem>>
    %c25 = arith.constant 25 : index
    %25 = memref.load %arg1[%c25] : memref<144xf32, #tpu.memory_space<smem>>
    %c26 = arith.constant 26 : index
    %26 = memref.load %arg1[%c26] : memref<144xf32, #tpu.memory_space<smem>>
    %c27 = arith.constant 27 : index
    %27 = memref.load %arg1[%c27] : memref<144xf32, #tpu.memory_space<smem>>
    %c28 = arith.constant 28 : index
    %28 = memref.load %arg1[%c28] : memref<144xf32, #tpu.memory_space<smem>>
    %c29 = arith.constant 29 : index
    %29 = memref.load %arg1[%c29] : memref<144xf32, #tpu.memory_space<smem>>
    %c30 = arith.constant 30 : index
    %30 = memref.load %arg1[%c30] : memref<144xf32, #tpu.memory_space<smem>>
    %c31 = arith.constant 31 : index
    %31 = memref.load %arg1[%c31] : memref<144xf32, #tpu.memory_space<smem>>
    %c32 = arith.constant 32 : index
    %32 = memref.load %arg1[%c32] : memref<144xf32, #tpu.memory_space<smem>>
    %c33 = arith.constant 33 : index
    %33 = memref.load %arg1[%c33] : memref<144xf32, #tpu.memory_space<smem>>
    %c34 = arith.constant 34 : index
    %34 = memref.load %arg1[%c34] : memref<144xf32, #tpu.memory_space<smem>>
    %c35 = arith.constant 35 : index
    %35 = memref.load %arg1[%c35] : memref<144xf32, #tpu.memory_space<smem>>
    %c36 = arith.constant 36 : index
    %36 = memref.load %arg1[%c36] : memref<144xf32, #tpu.memory_space<smem>>
    %c37 = arith.constant 37 : index
    %37 = memref.load %arg1[%c37] : memref<144xf32, #tpu.memory_space<smem>>
    %c38 = arith.constant 38 : index
    %38 = memref.load %arg1[%c38] : memref<144xf32, #tpu.memory_space<smem>>
    %c39 = arith.constant 39 : index
    %39 = memref.load %arg1[%c39] : memref<144xf32, #tpu.memory_space<smem>>
    %c40 = arith.constant 40 : index
    %40 = memref.load %arg1[%c40] : memref<144xf32, #tpu.memory_space<smem>>
    %c41 = arith.constant 41 : index
    %41 = memref.load %arg1[%c41] : memref<144xf32, #tpu.memory_space<smem>>
    %c42 = arith.constant 42 : index
    %42 = memref.load %arg1[%c42] : memref<144xf32, #tpu.memory_space<smem>>
    %c43 = arith.constant 43 : index
    %43 = memref.load %arg1[%c43] : memref<144xf32, #tpu.memory_space<smem>>
    %c44 = arith.constant 44 : index
    %44 = memref.load %arg1[%c44] : memref<144xf32, #tpu.memory_space<smem>>
    %c45 = arith.constant 45 : index
    %45 = memref.load %arg1[%c45] : memref<144xf32, #tpu.memory_space<smem>>
    %c46 = arith.constant 46 : index
    %46 = memref.load %arg1[%c46] : memref<144xf32, #tpu.memory_space<smem>>
    %c47 = arith.constant 47 : index
    %47 = memref.load %arg1[%c47] : memref<144xf32, #tpu.memory_space<smem>>
    %c48 = arith.constant 48 : index
    %48 = memref.load %arg1[%c48] : memref<144xf32, #tpu.memory_space<smem>>
    %c49 = arith.constant 49 : index
    %49 = memref.load %arg1[%c49] : memref<144xf32, #tpu.memory_space<smem>>
    %c50 = arith.constant 50 : index
    %50 = memref.load %arg1[%c50] : memref<144xf32, #tpu.memory_space<smem>>
    %c51 = arith.constant 51 : index
    %51 = memref.load %arg1[%c51] : memref<144xf32, #tpu.memory_space<smem>>
    %c52 = arith.constant 52 : index
    %52 = memref.load %arg1[%c52] : memref<144xf32, #tpu.memory_space<smem>>
    %c53 = arith.constant 53 : index
    %53 = memref.load %arg1[%c53] : memref<144xf32, #tpu.memory_space<smem>>
    %c54 = arith.constant 54 : index
    %54 = memref.load %arg1[%c54] : memref<144xf32, #tpu.memory_space<smem>>
    %c55 = arith.constant 55 : index
    %55 = memref.load %arg1[%c55] : memref<144xf32, #tpu.memory_space<smem>>
    %c56 = arith.constant 56 : index
    %56 = memref.load %arg1[%c56] : memref<144xf32, #tpu.memory_space<smem>>
    %c57 = arith.constant 57 : index
    %57 = memref.load %arg1[%c57] : memref<144xf32, #tpu.memory_space<smem>>
    %c58 = arith.constant 58 : index
    %58 = memref.load %arg1[%c58] : memref<144xf32, #tpu.memory_space<smem>>
    %c59 = arith.constant 59 : index
    %59 = memref.load %arg1[%c59] : memref<144xf32, #tpu.memory_space<smem>>
    %c60 = arith.constant 60 : index
    %60 = memref.load %arg1[%c60] : memref<144xf32, #tpu.memory_space<smem>>
    %c61 = arith.constant 61 : index
    %61 = memref.load %arg1[%c61] : memref<144xf32, #tpu.memory_space<smem>>
    %c62 = arith.constant 62 : index
    %62 = memref.load %arg1[%c62] : memref<144xf32, #tpu.memory_space<smem>>
    %c63 = arith.constant 63 : index
    %63 = memref.load %arg1[%c63] : memref<144xf32, #tpu.memory_space<smem>>
    %c64 = arith.constant 64 : index
    %64 = memref.load %arg1[%c64] : memref<144xf32, #tpu.memory_space<smem>>
    %c65 = arith.constant 65 : index
    %65 = memref.load %arg1[%c65] : memref<144xf32, #tpu.memory_space<smem>>
    %c66 = arith.constant 66 : index
    %66 = memref.load %arg1[%c66] : memref<144xf32, #tpu.memory_space<smem>>
    %c67 = arith.constant 67 : index
    %67 = memref.load %arg1[%c67] : memref<144xf32, #tpu.memory_space<smem>>
    %c68 = arith.constant 68 : index
    %68 = memref.load %arg1[%c68] : memref<144xf32, #tpu.memory_space<smem>>
    %c69 = arith.constant 69 : index
    %69 = memref.load %arg1[%c69] : memref<144xf32, #tpu.memory_space<smem>>
    %c70 = arith.constant 70 : index
    %70 = memref.load %arg1[%c70] : memref<144xf32, #tpu.memory_space<smem>>
    %c71 = arith.constant 71 : index
    %71 = memref.load %arg1[%c71] : memref<144xf32, #tpu.memory_space<smem>>
    %c72 = arith.constant 72 : index
    %72 = memref.load %arg1[%c72] : memref<144xf32, #tpu.memory_space<smem>>
    %c73 = arith.constant 73 : index
    %73 = memref.load %arg1[%c73] : memref<144xf32, #tpu.memory_space<smem>>
    %c74 = arith.constant 74 : index
    %74 = memref.load %arg1[%c74] : memref<144xf32, #tpu.memory_space<smem>>
    %c75 = arith.constant 75 : index
    %75 = memref.load %arg1[%c75] : memref<144xf32, #tpu.memory_space<smem>>
    %c76 = arith.constant 76 : index
    %76 = memref.load %arg1[%c76] : memref<144xf32, #tpu.memory_space<smem>>
    %c77 = arith.constant 77 : index
    %77 = memref.load %arg1[%c77] : memref<144xf32, #tpu.memory_space<smem>>
    %c78 = arith.constant 78 : index
    %78 = memref.load %arg1[%c78] : memref<144xf32, #tpu.memory_space<smem>>
    %c79 = arith.constant 79 : index
    %79 = memref.load %arg1[%c79] : memref<144xf32, #tpu.memory_space<smem>>
    %c80 = arith.constant 80 : index
    %80 = memref.load %arg1[%c80] : memref<144xf32, #tpu.memory_space<smem>>
    %c81 = arith.constant 81 : index
    %81 = memref.load %arg1[%c81] : memref<144xf32, #tpu.memory_space<smem>>
    %c82 = arith.constant 82 : index
    %82 = memref.load %arg1[%c82] : memref<144xf32, #tpu.memory_space<smem>>
    %c83 = arith.constant 83 : index
    %83 = memref.load %arg1[%c83] : memref<144xf32, #tpu.memory_space<smem>>
    %c84 = arith.constant 84 : index
    %84 = memref.load %arg1[%c84] : memref<144xf32, #tpu.memory_space<smem>>
    %c85 = arith.constant 85 : index
    %85 = memref.load %arg1[%c85] : memref<144xf32, #tpu.memory_space<smem>>
    %c86 = arith.constant 86 : index
    %86 = memref.load %arg1[%c86] : memref<144xf32, #tpu.memory_space<smem>>
    %c87 = arith.constant 87 : index
    %87 = memref.load %arg1[%c87] : memref<144xf32, #tpu.memory_space<smem>>
    %c88 = arith.constant 88 : index
    %88 = memref.load %arg1[%c88] : memref<144xf32, #tpu.memory_space<smem>>
    %c89 = arith.constant 89 : index
    %89 = memref.load %arg1[%c89] : memref<144xf32, #tpu.memory_space<smem>>
    %c90 = arith.constant 90 : index
    %90 = memref.load %arg1[%c90] : memref<144xf32, #tpu.memory_space<smem>>
    %c91 = arith.constant 91 : index
    %91 = memref.load %arg1[%c91] : memref<144xf32, #tpu.memory_space<smem>>
    %c92 = arith.constant 92 : index
    %92 = memref.load %arg1[%c92] : memref<144xf32, #tpu.memory_space<smem>>
    %c93 = arith.constant 93 : index
    %93 = memref.load %arg1[%c93] : memref<144xf32, #tpu.memory_space<smem>>
    %c94 = arith.constant 94 : index
    %94 = memref.load %arg1[%c94] : memref<144xf32, #tpu.memory_space<smem>>
    %c95 = arith.constant 95 : index
    %95 = memref.load %arg1[%c95] : memref<144xf32, #tpu.memory_space<smem>>
    %c96 = arith.constant 96 : index
    %96 = memref.load %arg1[%c96] : memref<144xf32, #tpu.memory_space<smem>>
    %c97 = arith.constant 97 : index
    %97 = memref.load %arg1[%c97] : memref<144xf32, #tpu.memory_space<smem>>
    %c98 = arith.constant 98 : index
    %98 = memref.load %arg1[%c98] : memref<144xf32, #tpu.memory_space<smem>>
    %c99 = arith.constant 99 : index
    %99 = memref.load %arg1[%c99] : memref<144xf32, #tpu.memory_space<smem>>
    %c100 = arith.constant 100 : index
    %100 = memref.load %arg1[%c100] : memref<144xf32, #tpu.memory_space<smem>>
    %c101 = arith.constant 101 : index
    %101 = memref.load %arg1[%c101] : memref<144xf32, #tpu.memory_space<smem>>
    %c102 = arith.constant 102 : index
    %102 = memref.load %arg1[%c102] : memref<144xf32, #tpu.memory_space<smem>>
    %c103 = arith.constant 103 : index
    %103 = memref.load %arg1[%c103] : memref<144xf32, #tpu.memory_space<smem>>
    %c104 = arith.constant 104 : index
    %104 = memref.load %arg1[%c104] : memref<144xf32, #tpu.memory_space<smem>>
    %c105 = arith.constant 105 : index
    %105 = memref.load %arg1[%c105] : memref<144xf32, #tpu.memory_space<smem>>
    %c106 = arith.constant 106 : index
    %106 = memref.load %arg1[%c106] : memref<144xf32, #tpu.memory_space<smem>>
    %c107 = arith.constant 107 : index
    %107 = memref.load %arg1[%c107] : memref<144xf32, #tpu.memory_space<smem>>
    %c108 = arith.constant 108 : index
    %108 = memref.load %arg1[%c108] : memref<144xf32, #tpu.memory_space<smem>>
    %c109 = arith.constant 109 : index
    %109 = memref.load %arg1[%c109] : memref<144xf32, #tpu.memory_space<smem>>
    %c110 = arith.constant 110 : index
    %110 = memref.load %arg1[%c110] : memref<144xf32, #tpu.memory_space<smem>>
    %c111 = arith.constant 111 : index
    %111 = memref.load %arg1[%c111] : memref<144xf32, #tpu.memory_space<smem>>
    %c112 = arith.constant 112 : index
    %112 = memref.load %arg1[%c112] : memref<144xf32, #tpu.memory_space<smem>>
    %c113 = arith.constant 113 : index
    %113 = memref.load %arg1[%c113] : memref<144xf32, #tpu.memory_space<smem>>
    %c114 = arith.constant 114 : index
    %114 = memref.load %arg1[%c114] : memref<144xf32, #tpu.memory_space<smem>>
    %c115 = arith.constant 115 : index
    %115 = memref.load %arg1[%c115] : memref<144xf32, #tpu.memory_space<smem>>
    %c116 = arith.constant 116 : index
    %116 = memref.load %arg1[%c116] : memref<144xf32, #tpu.memory_space<smem>>
    %c117 = arith.constant 117 : index
    %117 = memref.load %arg1[%c117] : memref<144xf32, #tpu.memory_space<smem>>
    %c118 = arith.constant 118 : index
    %118 = memref.load %arg1[%c118] : memref<144xf32, #tpu.memory_space<smem>>
    %c119 = arith.constant 119 : index
    %119 = memref.load %arg1[%c119] : memref<144xf32, #tpu.memory_space<smem>>
    %c120 = arith.constant 120 : index
    %120 = memref.load %arg1[%c120] : memref<144xf32, #tpu.memory_space<smem>>
    %c121 = arith.constant 121 : index
    %121 = memref.load %arg1[%c121] : memref<144xf32, #tpu.memory_space<smem>>
    %c122 = arith.constant 122 : index
    %122 = memref.load %arg1[%c122] : memref<144xf32, #tpu.memory_space<smem>>
    %c123 = arith.constant 123 : index
    %123 = memref.load %arg1[%c123] : memref<144xf32, #tpu.memory_space<smem>>
    %c124 = arith.constant 124 : index
    %124 = memref.load %arg1[%c124] : memref<144xf32, #tpu.memory_space<smem>>
    %c125 = arith.constant 125 : index
    %125 = memref.load %arg1[%c125] : memref<144xf32, #tpu.memory_space<smem>>
    %c126 = arith.constant 126 : index
    %126 = memref.load %arg1[%c126] : memref<144xf32, #tpu.memory_space<smem>>
    %c127 = arith.constant 127 : index
    %127 = memref.load %arg1[%c127] : memref<144xf32, #tpu.memory_space<smem>>
    %c128 = arith.constant 128 : index
    %128 = memref.load %arg1[%c128] : memref<144xf32, #tpu.memory_space<smem>>
    %c129 = arith.constant 129 : index
    %129 = memref.load %arg1[%c129] : memref<144xf32, #tpu.memory_space<smem>>
    %c130 = arith.constant 130 : index
    %130 = memref.load %arg1[%c130] : memref<144xf32, #tpu.memory_space<smem>>
    %c131 = arith.constant 131 : index
    %131 = memref.load %arg1[%c131] : memref<144xf32, #tpu.memory_space<smem>>
    %c132 = arith.constant 132 : index
    %132 = memref.load %arg1[%c132] : memref<144xf32, #tpu.memory_space<smem>>
    %c133 = arith.constant 133 : index
    %133 = memref.load %arg1[%c133] : memref<144xf32, #tpu.memory_space<smem>>
    %c134 = arith.constant 134 : index
    %134 = memref.load %arg1[%c134] : memref<144xf32, #tpu.memory_space<smem>>
    %c135 = arith.constant 135 : index
    %135 = memref.load %arg1[%c135] : memref<144xf32, #tpu.memory_space<smem>>
    %c136 = arith.constant 136 : index
    %136 = memref.load %arg1[%c136] : memref<144xf32, #tpu.memory_space<smem>>
    %c137 = arith.constant 137 : index
    %137 = memref.load %arg1[%c137] : memref<144xf32, #tpu.memory_space<smem>>
    %c138 = arith.constant 138 : index
    %138 = memref.load %arg1[%c138] : memref<144xf32, #tpu.memory_space<smem>>
    %c139 = arith.constant 139 : index
    %139 = memref.load %arg1[%c139] : memref<144xf32, #tpu.memory_space<smem>>
    %c140 = arith.constant 140 : index
    %140 = memref.load %arg1[%c140] : memref<144xf32, #tpu.memory_space<smem>>
    %c141 = arith.constant 141 : index
    %141 = memref.load %arg1[%c141] : memref<144xf32, #tpu.memory_space<smem>>
    %c142 = arith.constant 142 : index
    %142 = memref.load %arg1[%c142] : memref<144xf32, #tpu.memory_space<smem>>
    %c143 = arith.constant 143 : index
    %143 = memref.load %arg1[%c143] : memref<144xf32, #tpu.memory_space<smem>>
    %c0_0 = arith.constant 0 : index
    %144 = memref.load %arg2[%c0_0] : memref<16xf32, #tpu.memory_space<smem>>
    %c1_1 = arith.constant 1 : index
    %145 = memref.load %arg2[%c1_1] : memref<16xf32, #tpu.memory_space<smem>>
    %c2_2 = arith.constant 2 : index
    %146 = memref.load %arg2[%c2_2] : memref<16xf32, #tpu.memory_space<smem>>
    %c3_3 = arith.constant 3 : index
    %147 = memref.load %arg2[%c3_3] : memref<16xf32, #tpu.memory_space<smem>>
    %c4_4 = arith.constant 4 : index
    %148 = memref.load %arg2[%c4_4] : memref<16xf32, #tpu.memory_space<smem>>
    %c5_5 = arith.constant 5 : index
    %149 = memref.load %arg2[%c5_5] : memref<16xf32, #tpu.memory_space<smem>>
    %c6_6 = arith.constant 6 : index
    %150 = memref.load %arg2[%c6_6] : memref<16xf32, #tpu.memory_space<smem>>
    %c7_7 = arith.constant 7 : index
    %151 = memref.load %arg2[%c7_7] : memref<16xf32, #tpu.memory_space<smem>>
    %c8_8 = arith.constant 8 : index
    %152 = memref.load %arg2[%c8_8] : memref<16xf32, #tpu.memory_space<smem>>
    %c9_9 = arith.constant 9 : index
    %153 = memref.load %arg2[%c9_9] : memref<16xf32, #tpu.memory_space<smem>>
    %c10_10 = arith.constant 10 : index
    %154 = memref.load %arg2[%c10_10] : memref<16xf32, #tpu.memory_space<smem>>
    %c11_11 = arith.constant 11 : index
    %155 = memref.load %arg2[%c11_11] : memref<16xf32, #tpu.memory_space<smem>>
    %c12_12 = arith.constant 12 : index
    %156 = memref.load %arg2[%c12_12] : memref<16xf32, #tpu.memory_space<smem>>
    %c13_13 = arith.constant 13 : index
    %157 = memref.load %arg2[%c13_13] : memref<16xf32, #tpu.memory_space<smem>>
    %c14_14 = arith.constant 14 : index
    %158 = memref.load %arg2[%c14_14] : memref<16xf32, #tpu.memory_space<smem>>
    %c15_15 = arith.constant 15 : index
    %159 = memref.load %arg2[%c15_15] : memref<16xf32, #tpu.memory_space<smem>>
    %c0_16 = arith.constant 0 : index
    %160 = memref.load %arg3[%c0_16] : memref<4xf32, #tpu.memory_space<smem>>
    %161 = vector.broadcast %160 : f32 to vector<16x16xf32>
    %c1_17 = arith.constant 1 : index
    %162 = memref.load %arg3[%c1_17] : memref<4xf32, #tpu.memory_space<smem>>
    %163 = vector.broadcast %162 : f32 to vector<16x16xf32>
    %c2_18 = arith.constant 2 : index
    %164 = memref.load %arg3[%c2_18] : memref<4xf32, #tpu.memory_space<smem>>
    %165 = vector.broadcast %164 : f32 to vector<16x16xf32>
    %c3_19 = arith.constant 3 : index
    %166 = memref.load %arg3[%c3_19] : memref<4xf32, #tpu.memory_space<smem>>
    %167 = vector.broadcast %166 : f32 to vector<16x16xf32>
    %c0_20 = arith.constant 0 : index
    %168 = memref.load %arg4[%c0_20] : memref<4xf32, #tpu.memory_space<smem>>
    %169 = vector.broadcast %168 : f32 to vector<16x16xf32>
    %c1_21 = arith.constant 1 : index
    %170 = memref.load %arg4[%c1_21] : memref<4xf32, #tpu.memory_space<smem>>
    %171 = vector.broadcast %170 : f32 to vector<16x16xf32>
    %c2_22 = arith.constant 2 : index
    %172 = memref.load %arg4[%c2_22] : memref<4xf32, #tpu.memory_space<smem>>
    %173 = vector.broadcast %172 : f32 to vector<16x16xf32>
    %c3_23 = arith.constant 3 : index
    %174 = memref.load %arg4[%c3_23] : memref<4xf32, #tpu.memory_space<smem>>
    %175 = vector.broadcast %174 : f32 to vector<16x16xf32>
    %176 = tpu.iota {dimensions = array<i32: 1>} : vector<16x16xi32>
    %177 = tpu.iota {dimensions = array<i32: 0>} : vector<16x16xi32>
    %c16_i32 = arith.constant 16 : i32
    %c0_i32 = arith.constant 0 : i32
    %178 = arith.cmpi eq, %c16_i32, %c0_i32 : i32
    %c1_i32 = arith.constant 1 : i32
    %179 = arith.select %178, %c1_i32, %c16_i32 : i32
    %180 = vector.broadcast %179 : i32 to vector<16x16xi32>
    %181 = arith.remsi %176, %180 : vector<16x16xi32>
    %c0_i32_24 = arith.constant 0 : i32
    %182 = vector.broadcast %c0_i32_24 : i32 to vector<16x16xi32>
    %183 = arith.cmpi ne, %181, %182 : vector<16x16xi32>
    %c0_i32_25 = arith.constant 0 : i32
    %184 = vector.broadcast %c0_i32_25 : i32 to vector<16x16xi32>
    %185 = arith.cmpi slt, %181, %184 : vector<16x16xi32>
    %c0_i32_26 = arith.constant 0 : i32
    %186 = arith.cmpi slt, %179, %c0_i32_26 : i32
    %187 = vector.broadcast %186 : i1 to vector<16x16xi1>
    %188 = vector.broadcast %187 : vector<16x16xi1> to vector<16x16xi1>
    %189 = arith.xori %185, %188 : vector<16x16xi1>
    %190 = arith.andi %189, %183 : vector<16x16xi1>
    %191 = vector.broadcast %179 : i32 to vector<16x16xi32>
    %192 = arith.addi %181, %191 : vector<16x16xi32>
    %193 = arith.select %190, %192, %181 : vector<16x16xi1>, vector<16x16xi32>
    %c0_i32_27 = arith.constant 0 : i32
    %194 = vector.broadcast %c0_i32_27 : i32 to vector<16x16xi32>
    %195 = arith.cmpi eq, %193, %194 : vector<16x16xi32>
    %c16_i32_28 = arith.constant 16 : i32
    %c0_i32_29 = arith.constant 0 : i32
    %196 = arith.cmpi eq, %c16_i32_28, %c0_i32_29 : i32
    %c1_i32_30 = arith.constant 1 : i32
    %197 = arith.select %196, %c1_i32_30, %c16_i32_28 : i32
    %198 = vector.broadcast %197 : i32 to vector<16x16xi32>
    %199 = arith.remsi %176, %198 : vector<16x16xi32>
    %c0_i32_31 = arith.constant 0 : i32
    %200 = vector.broadcast %c0_i32_31 : i32 to vector<16x16xi32>
    %201 = arith.cmpi ne, %199, %200 : vector<16x16xi32>
    %c0_i32_32 = arith.constant 0 : i32
    %202 = vector.broadcast %c0_i32_32 : i32 to vector<16x16xi32>
    %203 = arith.cmpi slt, %199, %202 : vector<16x16xi32>
    %c0_i32_33 = arith.constant 0 : i32
    %204 = arith.cmpi slt, %197, %c0_i32_33 : i32
    %205 = vector.broadcast %204 : i1 to vector<16x16xi1>
    %206 = vector.broadcast %205 : vector<16x16xi1> to vector<16x16xi1>
    %207 = arith.xori %203, %206 : vector<16x16xi1>
    %208 = arith.andi %207, %201 : vector<16x16xi1>
    %209 = vector.broadcast %197 : i32 to vector<16x16xi32>
    %210 = arith.addi %199, %209 : vector<16x16xi32>
    %211 = arith.select %208, %210, %199 : vector<16x16xi1>, vector<16x16xi32>
    %c15_i32 = arith.constant 15 : i32
    %212 = vector.broadcast %c15_i32 : i32 to vector<16x16xi32>
    %213 = arith.cmpi eq, %211, %212 : vector<16x16xi32>
    %c0_i32_34 = arith.constant 0 : i32
    %214 = vector.broadcast %c0_i32_34 : i32 to vector<16x16xi32>
    %215 = arith.cmpi eq, %177, %214 : vector<16x16xi32>
    %c15_i32_35 = arith.constant 15 : i32
    %216 = vector.broadcast %c15_i32_35 : i32 to vector<16x16xi32>
    %217 = arith.cmpi eq, %177, %216 : vector<16x16xi32>
    %c0_36 = arith.constant 0 : index
    %c0_37 = arith.constant 0 : index
    %c0_38 = arith.constant 0 : index
    %c0_39 = arith.constant 0 : index
    %218 = vector.load %arg5[%c0_36, %c0_37, %c0_38, %c0_39] : memref<1x4x16x16xf32, #tpu.memory_space<vmem>>, vector<1x4x16x16xf32>
    %219 = vector.shape_cast %218 : vector<1x4x16x16xf32> to vector<4x16x16xf32>
    %c0_40 = arith.constant 0 : index
    %c0_41 = arith.constant 0 : index
    %c0_42 = arith.constant 0 : index
    %220 = vector.load %arg7[%c0_40, %c0_41, %c0_42] : memref<4x16x16xf32, #tpu.memory_space<vmem>>, vector<4x16x16xf32>
    tpu.vector_store %arg7[%c0_40, %c0_41, %c0_42], %219 {strides = array<i32>} : memref<4x16x16xf32, #tpu.memory_space<vmem>>, vector<4x16x16xf32>,
    %c0_i32_43 = arith.constant 0 : i32
    %c3_i32 = arith.constant 3 : i32
    %221 = arith.addi %c0_i32_43, %c3_i32 : i32
    %c1_i32_44 = arith.constant 1 : i32
    scf.for %arg8 = %c0_i32_43 to %221 step %c1_i32_44  : i32 {
      %c1_i32_46 = arith.constant 1 : i32
      %222 = arith.muli %arg8, %c1_i32_46 : i32
      %c0_i32_47 = arith.constant 0 : i32
      %223 = arith.addi %c0_i32_47, %222 : i32
      %c0_48 = arith.constant 0 : index
      %c0_49 = arith.constant 0 : index
      %c0_50 = arith.constant 0 : index
      %224 = vector.load %arg7[%c0_48, %c0_49, %c0_50] : memref<4x16x16xf32, #tpu.memory_space<vmem>>, vector<1x16x16xf32>
      %225 = vector.shape_cast %224 : vector<1x16x16xf32> to vector<16x16xf32>
      %226 = vector.broadcast %144 : f32 to vector<16x16xf32>
      %227 = arith.mulf %226, %225 : vector<16x16xf32>
      %228 = arith.addf %169, %227 : vector<16x16xf32>
      %229 = vector.broadcast %148 : f32 to vector<16x16xf32>
      %230 = arith.mulf %229, %225 : vector<16x16xf32>
      %231 = arith.addf %171, %230 : vector<16x16xf32>
      %232 = vector.broadcast %152 : f32 to vector<16x16xf32>
      %233 = arith.mulf %232, %225 : vector<16x16xf32>
      %234 = arith.addf %173, %233 : vector<16x16xf32>
      %235 = vector.broadcast %156 : f32 to vector<16x16xf32>
      %236 = arith.mulf %235, %225 : vector<16x16xf32>
      %237 = arith.addf %175, %236 : vector<16x16xf32>
      %238 = vector.extract_strided_slice %225 {offsets = [0, 15], sizes = [16, 1], strides = [1, 1]} : vector<16x16xf32> to vector<16x1xf32>
      %239 = vector.extract_strided_slice %225 {offsets = [0, 0], sizes = [16, 15], strides = [1, 1]} : vector<16x16xf32> to vector<16x15xf32>
      %240 = tpu.concatenate %238, %239 in 1 : vector<16x1xf32>, vector<16x15xf32> -> vector<16x16xf32>
      %241 = vector.extract_strided_slice %225 {offsets = [0, 1], sizes = [16, 15], strides = [1, 1]} : vector<16x16xf32> to vector<16x15xf32>
      %242 = vector.extract_strided_slice %225 {offsets = [0, 0], sizes = [16, 1], strides = [1, 1]} : vector<16x16xf32> to vector<16x1xf32>
      %243 = tpu.concatenate %241, %242 in 1 : vector<16x15xf32>, vector<16x1xf32> -> vector<16x16xf32>
      %244 = arith.select %195, %243, %240 : vector<16x16xi1>, vector<16x16xf32>
      %245 = arith.select %213, %240, %243 : vector<16x16xi1>, vector<16x16xf32>
      %246 = vector.extract_strided_slice %244 {offsets = [15, 0], sizes = [1, 16], strides = [1, 1]} : vector<16x16xf32> to vector<1x16xf32>
      %247 = vector.extract_strided_slice %244 {offsets = [0, 0], sizes = [15, 16], strides = [1, 1]} : vector<16x16xf32> to vector<15x16xf32>
      %248 = tpu.concatenate %246, %247 in 0 : vector<1x16xf32>, vector<15x16xf32> -> vector<16x16xf32>
      %249 = vector.extract_strided_slice %244 {offsets = [1, 0], sizes = [15, 16], strides = [1, 1]} : vector<16x16xf32> to vector<15x16xf32>
      %250 = vector.extract_strided_slice %244 {offsets = [0, 0], sizes = [1, 16], strides = [1, 1]} : vector<16x16xf32> to vector<1x16xf32>
      %251 = tpu.concatenate %249, %250 in 0 : vector<15x16xf32>, vector<1x16xf32> -> vector<16x16xf32>
      %252 = arith.select %215, %251, %248 : vector<16x16xi1>, vector<16x16xf32>
      %253 = arith.select %217, %248, %251 : vector<16x16xi1>, vector<16x16xf32>
      %254 = vector.broadcast %0 : f32 to vector<16x16xf32>
      %255 = arith.mulf %254, %252 : vector<16x16xf32>
      %256 = arith.addf %161, %255 : vector<16x16xf32>
      %257 = vector.broadcast %36 : f32 to vector<16x16xf32>
      %258 = arith.mulf %257, %252 : vector<16x16xf32>
      %259 = arith.addf %163, %258 : vector<16x16xf32>
      %260 = vector.broadcast %72 : f32 to vector<16x16xf32>
      %261 = arith.mulf %260, %252 : vector<16x16xf32>
      %262 = arith.addf %165, %261 : vector<16x16xf32>
      %263 = vector.broadcast %108 : f32 to vector<16x16xf32>
      %264 = arith.mulf %263, %252 : vector<16x16xf32>
      %265 = arith.addf %167, %264 : vector<16x16xf32>
      %266 = vector.broadcast %3 : f32 to vector<16x16xf32>
      %267 = arith.mulf %266, %244 : vector<16x16xf32>
      %268 = arith.addf %256, %267 : vector<16x16xf32>
      %269 = vector.broadcast %39 : f32 to vector<16x16xf32>
      %270 = arith.mulf %269, %244 : vector<16x16xf32>
      %271 = arith.addf %259, %270 : vector<16x16xf32>
      %272 = vector.broadcast %75 : f32 to vector<16x16xf32>
      %273 = arith.mulf %272, %244 : vector<16x16xf32>
      %274 = arith.addf %262, %273 : vector<16x16xf32>
      %275 = vector.broadcast %111 : f32 to vector<16x16xf32>
      %276 = arith.mulf %275, %244 : vector<16x16xf32>
      %277 = arith.addf %265, %276 : vector<16x16xf32>
      %278 = vector.broadcast %6 : f32 to vector<16x16xf32>
      %279 = arith.mulf %278, %253 : vector<16x16xf32>
      %280 = arith.addf %268, %279 : vector<16x16xf32>
      %281 = vector.broadcast %42 : f32 to vector<16x16xf32>
      %282 = arith.mulf %281, %253 : vector<16x16xf32>
      %283 = arith.addf %271, %282 : vector<16x16xf32>
      %284 = vector.broadcast %78 : f32 to vector<16x16xf32>
      %285 = arith.mulf %284, %253 : vector<16x16xf32>
      %286 = arith.addf %274, %285 : vector<16x16xf32>
      %287 = vector.broadcast %114 : f32 to vector<16x16xf32>
      %288 = arith.mulf %287, %253 : vector<16x16xf32>
      %289 = arith.addf %277, %288 : vector<16x16xf32>
      %290 = vector.extract_strided_slice %225 {offsets = [15, 0], sizes = [1, 16], strides = [1, 1]} : vector<16x16xf32> to vector<1x16xf32>
      %291 = vector.extract_strided_slice %225 {offsets = [0, 0], sizes = [15, 16], strides = [1, 1]} : vector<16x16xf32> to vector<15x16xf32>
      %292 = tpu.concatenate %290, %291 in 0 : vector<1x16xf32>, vector<15x16xf32> -> vector<16x16xf32>
      %293 = vector.extract_strided_slice %225 {offsets = [1, 0], sizes = [15, 16], strides = [1, 1]} : vector<16x16xf32> to vector<15x16xf32>
      %294 = vector.extract_strided_slice %225 {offsets = [0, 0], sizes = [1, 16], strides = [1, 1]} : vector<16x16xf32> to vector<1x16xf32>
      %295 = tpu.concatenate %293, %294 in 0 : vector<15x16xf32>, vector<1x16xf32> -> vector<16x16xf32>
      %296 = arith.select %215, %295, %292 : vector<16x16xi1>, vector<16x16xf32>
      %297 = arith.select %217, %292, %295 : vector<16x16xi1>, vector<16x16xf32>
      %298 = vector.broadcast %1 : f32 to vector<16x16xf32>
      %299 = arith.mulf %298, %296 : vector<16x16xf32>
      %300 = arith.addf %280, %299 : vector<16x16xf32>
      %301 = vector.broadcast %37 : f32 to vector<16x16xf32>
      %302 = arith.mulf %301, %296 : vector<16x16xf32>
      %303 = arith.addf %283, %302 : vector<16x16xf32>
      %304 = vector.broadcast %73 : f32 to vector<16x16xf32>
      %305 = arith.mulf %304, %296 : vector<16x16xf32>
      %306 = arith.addf %286, %305 : vector<16x16xf32>
      %307 = vector.broadcast %109 : f32 to vector<16x16xf32>
      %308 = arith.mulf %307, %296 : vector<16x16xf32>
      %309 = arith.addf %289, %308 : vector<16x16xf32>
      %310 = vector.broadcast %4 : f32 to vector<16x16xf32>
      %311 = arith.mulf %310, %225 : vector<16x16xf32>
      %312 = arith.addf %300, %311 : vector<16x16xf32>
      %313 = vector.broadcast %40 : f32 to vector<16x16xf32>
      %314 = arith.mulf %313, %225 : vector<16x16xf32>
      %315 = arith.addf %303, %314 : vector<16x16xf32>
      %316 = vector.broadcast %76 : f32 to vector<16x16xf32>
      %317 = arith.mulf %316, %225 : vector<16x16xf32>
      %318 = arith.addf %306, %317 : vector<16x16xf32>
      %319 = vector.broadcast %112 : f32 to vector<16x16xf32>
      %320 = arith.mulf %319, %225 : vector<16x16xf32>
      %321 = arith.addf %309, %320 : vector<16x16xf32>
      %322 = vector.broadcast %7 : f32 to vector<16x16xf32>
      %323 = arith.mulf %322, %297 : vector<16x16xf32>
      %324 = arith.addf %312, %323 : vector<16x16xf32>
      %325 = vector.broadcast %43 : f32 to vector<16x16xf32>
      %326 = arith.mulf %325, %297 : vector<16x16xf32>
      %327 = arith.addf %315, %326 : vector<16x16xf32>
      %328 = vector.broadcast %79 : f32 to vector<16x16xf32>
      %329 = arith.mulf %328, %297 : vector<16x16xf32>
      %330 = arith.addf %318, %329 : vector<16x16xf32>
      %331 = vector.broadcast %115 : f32 to vector<16x16xf32>
      %332 = arith.mulf %331, %297 : vector<16x16xf32>
      %333 = arith.addf %321, %332 : vector<16x16xf32>
      %334 = vector.extract_strided_slice %245 {offsets = [15, 0], sizes = [1, 16], strides = [1, 1]} : vector<16x16xf32> to vector<1x16xf32>
      %335 = vector.extract_strided_slice %245 {offsets = [0, 0], sizes = [15, 16], strides = [1, 1]} : vector<16x16xf32> to vector<15x16xf32>
      %336 = tpu.concatenate %334, %335 in 0 : vector<1x16xf32>, vector<15x16xf32> -> vector<16x16xf32>
      %337 = vector.extract_strided_slice %245 {offsets = [1, 0], sizes = [15, 16], strides = [1, 1]} : vector<16x16xf32> to vector<15x16xf32>
      %338 = vector.extract_strided_slice %245 {offsets = [0, 0], sizes = [1, 16], strides = [1, 1]} : vector<16x16xf32> to vector<1x16xf32>
      %339 = tpu.concatenate %337, %338 in 0 : vector<15x16xf32>, vector<1x16xf32> -> vector<16x16xf32>
      %340 = arith.select %215, %339, %336 : vector<16x16xi1>, vector<16x16xf32>
      %341 = arith.select %217, %336, %339 : vector<16x16xi1>, vector<16x16xf32>
      %342 = vector.broadcast %2 : f32 to vector<16x16xf32>
      %343 = arith.mulf %342, %340 : vector<16x16xf32>
      %344 = arith.addf %324, %343 : vector<16x16xf32>
      %345 = vector.broadcast %38 : f32 to vector<16x16xf32>
      %346 = arith.mulf %345, %340 : vector<16x16xf32>
      %347 = arith.addf %327, %346 : vector<16x16xf32>
      %348 = vector.broadcast %74 : f32 to vector<16x16xf32>
      %349 = arith.mulf %348, %340 : vector<16x16xf32>
      %350 = arith.addf %330, %349 : vector<16x16xf32>
      %351 = vector.broadcast %110 : f32 to vector<16x16xf32>
      %352 = arith.mulf %351, %340 : vector<16x16xf32>
      %353 = arith.addf %333, %352 : vector<16x16xf32>
      %354 = vector.broadcast %5 : f32 to vector<16x16xf32>
      %355 = arith.mulf %354, %245 : vector<16x16xf32>
      %356 = arith.addf %344, %355 : vector<16x16xf32>
      %357 = vector.broadcast %41 : f32 to vector<16x16xf32>
      %358 = arith.mulf %357, %245 : vector<16x16xf32>
      %359 = arith.addf %347, %358 : vector<16x16xf32>
      %360 = vector.broadcast %77 : f32 to vector<16x16xf32>
      %361 = arith.mulf %360, %245 : vector<16x16xf32>
      %362 = arith.addf %350, %361 : vector<16x16xf32>
      %363 = vector.broadcast %113 : f32 to vector<16x16xf32>
      %364 = arith.mulf %363, %245 : vector<16x16xf32>
      %365 = arith.addf %353, %364 : vector<16x16xf32>
      %366 = vector.broadcast %8 : f32 to vector<16x16xf32>
      %367 = arith.mulf %366, %341 : vector<16x16xf32>
      %368 = arith.addf %356, %367 : vector<16x16xf32>
      %369 = vector.broadcast %44 : f32 to vector<16x16xf32>
      %370 = arith.mulf %369, %341 : vector<16x16xf32>
      %371 = arith.addf %359, %370 : vector<16x16xf32>
      %372 = vector.broadcast %80 : f32 to vector<16x16xf32>
      %373 = arith.mulf %372, %341 : vector<16x16xf32>
      %374 = arith.addf %362, %373 : vector<16x16xf32>
      %375 = vector.broadcast %116 : f32 to vector<16x16xf32>
      %376 = arith.mulf %375, %341 : vector<16x16xf32>
      %377 = arith.addf %365, %376 : vector<16x16xf32>
      %c1_51 = arith.constant 1 : index
      %c0_52 = arith.constant 0 : index
      %c0_53 = arith.constant 0 : index
      %378 = vector.load %arg7[%c1_51, %c0_52, %c0_53] : memref<4x16x16xf32, #tpu.memory_space<vmem>>, vector<1x16x16xf32>
      %379 = vector.shape_cast %378 : vector<1x16x16xf32> to vector<16x16xf32>
      %380 = vector.broadcast %145 : f32 to vector<16x16xf32>
      %381 = arith.mulf %380, %379 : vector<16x16xf32>
      %382 = arith.addf %228, %381 : vector<16x16xf32>
      %383 = vector.broadcast %149 : f32 to vector<16x16xf32>
      %384 = arith.mulf %383, %379 : vector<16x16xf32>
      %385 = arith.addf %231, %384 : vector<16x16xf32>
      %386 = vector.broadcast %153 : f32 to vector<16x16xf32>
      %387 = arith.mulf %386, %379 : vector<16x16xf32>
      %388 = arith.addf %234, %387 : vector<16x16xf32>
      %389 = vector.broadcast %157 : f32 to vector<16x16xf32>
      %390 = arith.mulf %389, %379 : vector<16x16xf32>
      %391 = arith.addf %237, %390 : vector<16x16xf32>
      %392 = vector.extract_strided_slice %379 {offsets = [0, 15], sizes = [16, 1], strides = [1, 1]} : vector<16x16xf32> to vector<16x1xf32>
      %393 = vector.extract_strided_slice %379 {offsets = [0, 0], sizes = [16, 15], strides = [1, 1]} : vector<16x16xf32> to vector<16x15xf32>
      %394 = tpu.concatenate %392, %393 in 1 : vector<16x1xf32>, vector<16x15xf32> -> vector<16x16xf32>
      %395 = vector.extract_strided_slice %379 {offsets = [0, 1], sizes = [16, 15], strides = [1, 1]} : vector<16x16xf32> to vector<16x15xf32>
      %396 = vector.extract_strided_slice %379 {offsets = [0, 0], sizes = [16, 1], strides = [1, 1]} : vector<16x16xf32> to vector<16x1xf32>
      %397 = tpu.concatenate %395, %396 in 1 : vector<16x15xf32>, vector<16x1xf32> -> vector<16x16xf32>
      %398 = arith.select %195, %397, %394 : vector<16x16xi1>, vector<16x16xf32>
      %399 = arith.select %213, %394, %397 : vector<16x16xi1>, vector<16x16xf32>
      %400 = vector.extract_strided_slice %398 {offsets = [15, 0], sizes = [1, 16], strides = [1, 1]} : vector<16x16xf32> to vector<1x16xf32>
      %401 = vector.extract_strided_slice %398 {offsets = [0, 0], sizes = [15, 16], strides = [1, 1]} : vector<16x16xf32> to vector<15x16xf32>
      %402 = tpu.concatenate %400, %401 in 0 : vector<1x16xf32>, vector<15x16xf32> -> vector<16x16xf32>
      %403 = vector.extract_strided_slice %398 {offsets = [1, 0], sizes = [15, 16], strides = [1, 1]} : vector<16x16xf32> to vector<15x16xf32>
      %404 = vector.extract_strided_slice %398 {offsets = [0, 0], sizes = [1, 16], strides = [1, 1]} : vector<16x16xf32> to vector<1x16xf32>
      %405 = tpu.concatenate %403, %404 in 0 : vector<15x16xf32>, vector<1x16xf32> -> vector<16x16xf32>
      %406 = arith.select %215, %405, %402 : vector<16x16xi1>, vector<16x16xf32>
      %407 = arith.select %217, %402, %405 : vector<16x16xi1>, vector<16x16xf32>
      %408 = vector.broadcast %9 : f32 to vector<16x16xf32>
      %409 = arith.mulf %408, %406 : vector<16x16xf32>
      %410 = arith.addf %368, %409 : vector<16x16xf32>
      %411 = vector.broadcast %45 : f32 to vector<16x16xf32>
      %412 = arith.mulf %411, %406 : vector<16x16xf32>
      %413 = arith.addf %371, %412 : vector<16x16xf32>
      %414 = vector.broadcast %81 : f32 to vector<16x16xf32>
      %415 = arith.mulf %414, %406 : vector<16x16xf32>
      %416 = arith.addf %374, %415 : vector<16x16xf32>
      %417 = vector.broadcast %117 : f32 to vector<16x16xf32>
      %418 = arith.mulf %417, %406 : vector<16x16xf32>
      %419 = arith.addf %377, %418 : vector<16x16xf32>
      %420 = vector.broadcast %12 : f32 to vector<16x16xf32>
      %421 = arith.mulf %420, %398 : vector<16x16xf32>
      %422 = arith.addf %410, %421 : vector<16x16xf32>
      %423 = vector.broadcast %48 : f32 to vector<16x16xf32>
      %424 = arith.mulf %423, %398 : vector<16x16xf32>
      %425 = arith.addf %413, %424 : vector<16x16xf32>
      %426 = vector.broadcast %84 : f32 to vector<16x16xf32>
      %427 = arith.mulf %426, %398 : vector<16x16xf32>
      %428 = arith.addf %416, %427 : vector<16x16xf32>
      %429 = vector.broadcast %120 : f32 to vector<16x16xf32>
      %430 = arith.mulf %429, %398 : vector<16x16xf32>
      %431 = arith.addf %419, %430 : vector<16x16xf32>
      %432 = vector.broadcast %15 : f32 to vector<16x16xf32>
      %433 = arith.mulf %432, %407 : vector<16x16xf32>
      %434 = arith.addf %422, %433 : vector<16x16xf32>
      %435 = vector.broadcast %51 : f32 to vector<16x16xf32>
      %436 = arith.mulf %435, %407 : vector<16x16xf32>
      %437 = arith.addf %425, %436 : vector<16x16xf32>
      %438 = vector.broadcast %87 : f32 to vector<16x16xf32>
      %439 = arith.mulf %438, %407 : vector<16x16xf32>
      %440 = arith.addf %428, %439 : vector<16x16xf32>
      %441 = vector.broadcast %123 : f32 to vector<16x16xf32>
      %442 = arith.mulf %441, %407 : vector<16x16xf32>
      %443 = arith.addf %431, %442 : vector<16x16xf32>
      %444 = vector.extract_strided_slice %379 {offsets = [15, 0], sizes = [1, 16], strides = [1, 1]} : vector<16x16xf32> to vector<1x16xf32>
      %445 = vector.extract_strided_slice %379 {offsets = [0, 0], sizes = [15, 16], strides = [1, 1]} : vector<16x16xf32> to vector<15x16xf32>
      %446 = tpu.concatenate %444, %445 in 0 : vector<1x16xf32>, vector<15x16xf32> -> vector<16x16xf32>
      %447 = vector.extract_strided_slice %379 {offsets = [1, 0], sizes = [15, 16], strides = [1, 1]} : vector<16x16xf32> to vector<15x16xf32>
      %448 = vector.extract_strided_slice %379 {offsets = [0, 0], sizes = [1, 16], strides = [1, 1]} : vector<16x16xf32> to vector<1x16xf32>
      %449 = tpu.concatenate %447, %448 in 0 : vector<15x16xf32>, vector<1x16xf32> -> vector<16x16xf32>
      %450 = arith.select %215, %449, %446 : vector<16x16xi1>, vector<16x16xf32>
      %451 = arith.select %217, %446, %449 : vector<16x16xi1>, vector<16x16xf32>
      %452 = vector.broadcast %10 : f32 to vector<16x16xf32>
      %453 = arith.mulf %452, %450 : vector<16x16xf32>
      %454 = arith.addf %434, %453 : vector<16x16xf32>
      %455 = vector.broadcast %46 : f32 to vector<16x16xf32>
      %456 = arith.mulf %455, %450 : vector<16x16xf32>
      %457 = arith.addf %437, %456 : vector<16x16xf32>
      %458 = vector.broadcast %82 : f32 to vector<16x16xf32>
      %459 = arith.mulf %458, %450 : vector<16x16xf32>
      %460 = arith.addf %440, %459 : vector<16x16xf32>
      %461 = vector.broadcast %118 : f32 to vector<16x16xf32>
      %462 = arith.mulf %461, %450 : vector<16x16xf32>
      %463 = arith.addf %443, %462 : vector<16x16xf32>
      %464 = vector.broadcast %13 : f32 to vector<16x16xf32>
      %465 = arith.mulf %464, %379 : vector<16x16xf32>
      %466 = arith.addf %454, %465 : vector<16x16xf32>
      %467 = vector.broadcast %49 : f32 to vector<16x16xf32>
      %468 = arith.mulf %467, %379 : vector<16x16xf32>
      %469 = arith.addf %457, %468 : vector<16x16xf32>
      %470 = vector.broadcast %85 : f32 to vector<16x16xf32>
      %471 = arith.mulf %470, %379 : vector<16x16xf32>
      %472 = arith.addf %460, %471 : vector<16x16xf32>
      %473 = vector.broadcast %121 : f32 to vector<16x16xf32>
      %474 = arith.mulf %473, %379 : vector<16x16xf32>
      %475 = arith.addf %463, %474 : vector<16x16xf32>
      %476 = vector.broadcast %16 : f32 to vector<16x16xf32>
      %477 = arith.mulf %476, %451 : vector<16x16xf32>
      %478 = arith.addf %466, %477 : vector<16x16xf32>
      %479 = vector.broadcast %52 : f32 to vector<16x16xf32>
      %480 = arith.mulf %479, %451 : vector<16x16xf32>
      %481 = arith.addf %469, %480 : vector<16x16xf32>
      %482 = vector.broadcast %88 : f32 to vector<16x16xf32>
      %483 = arith.mulf %482, %451 : vector<16x16xf32>
      %484 = arith.addf %472, %483 : vector<16x16xf32>
      %485 = vector.broadcast %124 : f32 to vector<16x16xf32>
      %486 = arith.mulf %485, %451 : vector<16x16xf32>
      %487 = arith.addf %475, %486 : vector<16x16xf32>
      %488 = vector.extract_strided_slice %399 {offsets = [15, 0], sizes = [1, 16], strides = [1, 1]} : vector<16x16xf32> to vector<1x16xf32>
      %489 = vector.extract_strided_slice %399 {offsets = [0, 0], sizes = [15, 16], strides = [1, 1]} : vector<16x16xf32> to vector<15x16xf32>
      %490 = tpu.concatenate %488, %489 in 0 : vector<1x16xf32>, vector<15x16xf32> -> vector<16x16xf32>
      %491 = vector.extract_strided_slice %399 {offsets = [1, 0], sizes = [15, 16], strides = [1, 1]} : vector<16x16xf32> to vector<15x16xf32>
      %492 = vector.extract_strided_slice %399 {offsets = [0, 0], sizes = [1, 16], strides = [1, 1]} : vector<16x16xf32> to vector<1x16xf32>
      %493 = tpu.concatenate %491, %492 in 0 : vector<15x16xf32>, vector<1x16xf32> -> vector<16x16xf32>
      %494 = arith.select %215, %493, %490 : vector<16x16xi1>, vector<16x16xf32>
      %495 = arith.select %217, %490, %493 : vector<16x16xi1>, vector<16x16xf32>
      %496 = vector.broadcast %11 : f32 to vector<16x16xf32>
      %497 = arith.mulf %496, %494 : vector<16x16xf32>
      %498 = arith.addf %478, %497 : vector<16x16xf32>
      %499 = vector.broadcast %47 : f32 to vector<16x16xf32>
      %500 = arith.mulf %499, %494 : vector<16x16xf32>
      %501 = arith.addf %481, %500 : vector<16x16xf32>
      %502 = vector.broadcast %83 : f32 to vector<16x16xf32>
      %503 = arith.mulf %502, %494 : vector<16x16xf32>
      %504 = arith.addf %484, %503 : vector<16x16xf32>
      %505 = vector.broadcast %119 : f32 to vector<16x16xf32>
      %506 = arith.mulf %505, %494 : vector<16x16xf32>
      %507 = arith.addf %487, %506 : vector<16x16xf32>
      %508 = vector.broadcast %14 : f32 to vector<16x16xf32>
      %509 = arith.mulf %508, %399 : vector<16x16xf32>
      %510 = arith.addf %498, %509 : vector<16x16xf32>
      %511 = vector.broadcast %50 : f32 to vector<16x16xf32>
      %512 = arith.mulf %511, %399 : vector<16x16xf32>
      %513 = arith.addf %501, %512 : vector<16x16xf32>
      %514 = vector.broadcast %86 : f32 to vector<16x16xf32>
      %515 = arith.mulf %514, %399 : vector<16x16xf32>
      %516 = arith.addf %504, %515 : vector<16x16xf32>
      %517 = vector.broadcast %122 : f32 to vector<16x16xf32>
      %518 = arith.mulf %517, %399 : vector<16x16xf32>
      %519 = arith.addf %507, %518 : vector<16x16xf32>
      %520 = vector.broadcast %17 : f32 to vector<16x16xf32>
      %521 = arith.mulf %520, %495 : vector<16x16xf32>
      %522 = arith.addf %510, %521 : vector<16x16xf32>
      %523 = vector.broadcast %53 : f32 to vector<16x16xf32>
      %524 = arith.mulf %523, %495 : vector<16x16xf32>
      %525 = arith.addf %513, %524 : vector<16x16xf32>
      %526 = vector.broadcast %89 : f32 to vector<16x16xf32>
      %527 = arith.mulf %526, %495 : vector<16x16xf32>
      %528 = arith.addf %516, %527 : vector<16x16xf32>
      %529 = vector.broadcast %125 : f32 to vector<16x16xf32>
      %530 = arith.mulf %529, %495 : vector<16x16xf32>
      %531 = arith.addf %519, %530 : vector<16x16xf32>
      %c2_54 = arith.constant 2 : index
      %c0_55 = arith.constant 0 : index
      %c0_56 = arith.constant 0 : index
      %532 = vector.load %arg7[%c2_54, %c0_55, %c0_56] : memref<4x16x16xf32, #tpu.memory_space<vmem>>, vector<1x16x16xf32>
      %533 = vector.shape_cast %532 : vector<1x16x16xf32> to vector<16x16xf32>
      %534 = vector.broadcast %146 : f32 to vector<16x16xf32>
      %535 = arith.mulf %534, %533 : vector<16x16xf32>
      %536 = arith.addf %382, %535 : vector<16x16xf32>
      %537 = vector.broadcast %150 : f32 to vector<16x16xf32>
      %538 = arith.mulf %537, %533 : vector<16x16xf32>
      %539 = arith.addf %385, %538 : vector<16x16xf32>
      %540 = vector.broadcast %154 : f32 to vector<16x16xf32>
      %541 = arith.mulf %540, %533 : vector<16x16xf32>
      %542 = arith.addf %388, %541 : vector<16x16xf32>
      %543 = vector.broadcast %158 : f32 to vector<16x16xf32>
      %544 = arith.mulf %543, %533 : vector<16x16xf32>
      %545 = arith.addf %391, %544 : vector<16x16xf32>
      %546 = vector.extract_strided_slice %533 {offsets = [0, 15], sizes = [16, 1], strides = [1, 1]} : vector<16x16xf32> to vector<16x1xf32>
      %547 = vector.extract_strided_slice %533 {offsets = [0, 0], sizes = [16, 15], strides = [1, 1]} : vector<16x16xf32> to vector<16x15xf32>
      %548 = tpu.concatenate %546, %547 in 1 : vector<16x1xf32>, vector<16x15xf32> -> vector<16x16xf32>
      %549 = vector.extract_strided_slice %533 {offsets = [0, 1], sizes = [16, 15], strides = [1, 1]} : vector<16x16xf32> to vector<16x15xf32>
      %550 = vector.extract_strided_slice %533 {offsets = [0, 0], sizes = [16, 1], strides = [1, 1]} : vector<16x16xf32> to vector<16x1xf32>
      %551 = tpu.concatenate %549, %550 in 1 : vector<16x15xf32>, vector<16x1xf32> -> vector<16x16xf32>
      %552 = arith.select %195, %551, %548 : vector<16x16xi1>, vector<16x16xf32>
      %553 = arith.select %213, %548, %551 : vector<16x16xi1>, vector<16x16xf32>
      %554 = vector.extract_strided_slice %552 {offsets = [15, 0], sizes = [1, 16], strides = [1, 1]} : vector<16x16xf32> to vector<1x16xf32>
      %555 = vector.extract_strided_slice %552 {offsets = [0, 0], sizes = [15, 16], strides = [1, 1]} : vector<16x16xf32> to vector<15x16xf32>
      %556 = tpu.concatenate %554, %555 in 0 : vector<1x16xf32>, vector<15x16xf32> -> vector<16x16xf32>
      %557 = vector.extract_strided_slice %552 {offsets = [1, 0], sizes = [15, 16], strides = [1, 1]} : vector<16x16xf32> to vector<15x16xf32>
      %558 = vector.extract_strided_slice %552 {offsets = [0, 0], sizes = [1, 16], strides = [1, 1]} : vector<16x16xf32> to vector<1x16xf32>
      %559 = tpu.concatenate %557, %558 in 0 : vector<15x16xf32>, vector<1x16xf32> -> vector<16x16xf32>
      %560 = arith.select %215, %559, %556 : vector<16x16xi1>, vector<16x16xf32>
      %561 = arith.select %217, %556, %559 : vector<16x16xi1>, vector<16x16xf32>
      %562 = vector.broadcast %18 : f32 to vector<16x16xf32>
      %563 = arith.mulf %562, %560 : vector<16x16xf32>
      %564 = arith.addf %522, %563 : vector<16x16xf32>
      %565 = vector.broadcast %54 : f32 to vector<16x16xf32>
      %566 = arith.mulf %565, %560 : vector<16x16xf32>
      %567 = arith.addf %525, %566 : vector<16x16xf32>
      %568 = vector.broadcast %90 : f32 to vector<16x16xf32>
      %569 = arith.mulf %568, %560 : vector<16x16xf32>
      %570 = arith.addf %528, %569 : vector<16x16xf32>
      %571 = vector.broadcast %126 : f32 to vector<16x16xf32>
      %572 = arith.mulf %571, %560 : vector<16x16xf32>
      %573 = arith.addf %531, %572 : vector<16x16xf32>
      %574 = vector.broadcast %21 : f32 to vector<16x16xf32>
      %575 = arith.mulf %574, %552 : vector<16x16xf32>
      %576 = arith.addf %564, %575 : vector<16x16xf32>
      %577 = vector.broadcast %57 : f32 to vector<16x16xf32>
      %578 = arith.mulf %577, %552 : vector<16x16xf32>
      %579 = arith.addf %567, %578 : vector<16x16xf32>
      %580 = vector.broadcast %93 : f32 to vector<16x16xf32>
      %581 = arith.mulf %580, %552 : vector<16x16xf32>
      %582 = arith.addf %570, %581 : vector<16x16xf32>
      %583 = vector.broadcast %129 : f32 to vector<16x16xf32>
      %584 = arith.mulf %583, %552 : vector<16x16xf32>
      %585 = arith.addf %573, %584 : vector<16x16xf32>
      %586 = vector.broadcast %24 : f32 to vector<16x16xf32>
      %587 = arith.mulf %586, %561 : vector<16x16xf32>
      %588 = arith.addf %576, %587 : vector<16x16xf32>
      %589 = vector.broadcast %60 : f32 to vector<16x16xf32>
      %590 = arith.mulf %589, %561 : vector<16x16xf32>
      %591 = arith.addf %579, %590 : vector<16x16xf32>
      %592 = vector.broadcast %96 : f32 to vector<16x16xf32>
      %593 = arith.mulf %592, %561 : vector<16x16xf32>
      %594 = arith.addf %582, %593 : vector<16x16xf32>
      %595 = vector.broadcast %132 : f32 to vector<16x16xf32>
      %596 = arith.mulf %595, %561 : vector<16x16xf32>
      %597 = arith.addf %585, %596 : vector<16x16xf32>
      %598 = vector.extract_strided_slice %533 {offsets = [15, 0], sizes = [1, 16], strides = [1, 1]} : vector<16x16xf32> to vector<1x16xf32>
      %599 = vector.extract_strided_slice %533 {offsets = [0, 0], sizes = [15, 16], strides = [1, 1]} : vector<16x16xf32> to vector<15x16xf32>
      %600 = tpu.concatenate %598, %599 in 0 : vector<1x16xf32>, vector<15x16xf32> -> vector<16x16xf32>
      %601 = vector.extract_strided_slice %533 {offsets = [1, 0], sizes = [15, 16], strides = [1, 1]} : vector<16x16xf32> to vector<15x16xf32>
      %602 = vector.extract_strided_slice %533 {offsets = [0, 0], sizes = [1, 16], strides = [1, 1]} : vector<16x16xf32> to vector<1x16xf32>
      %603 = tpu.concatenate %601, %602 in 0 : vector<15x16xf32>, vector<1x16xf32> -> vector<16x16xf32>
      %604 = arith.select %215, %603, %600 : vector<16x16xi1>, vector<16x16xf32>
      %605 = arith.select %217, %600, %603 : vector<16x16xi1>, vector<16x16xf32>
      %606 = vector.broadcast %19 : f32 to vector<16x16xf32>
      %607 = arith.mulf %606, %604 : vector<16x16xf32>
      %608 = arith.addf %588, %607 : vector<16x16xf32>
      %609 = vector.broadcast %55 : f32 to vector<16x16xf32>
      %610 = arith.mulf %609, %604 : vector<16x16xf32>
      %611 = arith.addf %591, %610 : vector<16x16xf32>
      %612 = vector.broadcast %91 : f32 to vector<16x16xf32>
      %613 = arith.mulf %612, %604 : vector<16x16xf32>
      %614 = arith.addf %594, %613 : vector<16x16xf32>
      %615 = vector.broadcast %127 : f32 to vector<16x16xf32>
      %616 = arith.mulf %615, %604 : vector<16x16xf32>
      %617 = arith.addf %597, %616 : vector<16x16xf32>
      %618 = vector.broadcast %22 : f32 to vector<16x16xf32>
      %619 = arith.mulf %618, %533 : vector<16x16xf32>
      %620 = arith.addf %608, %619 : vector<16x16xf32>
      %621 = vector.broadcast %58 : f32 to vector<16x16xf32>
      %622 = arith.mulf %621, %533 : vector<16x16xf32>
      %623 = arith.addf %611, %622 : vector<16x16xf32>
      %624 = vector.broadcast %94 : f32 to vector<16x16xf32>
      %625 = arith.mulf %624, %533 : vector<16x16xf32>
      %626 = arith.addf %614, %625 : vector<16x16xf32>
      %627 = vector.broadcast %130 : f32 to vector<16x16xf32>
      %628 = arith.mulf %627, %533 : vector<16x16xf32>
      %629 = arith.addf %617, %628 : vector<16x16xf32>
      %630 = vector.broadcast %25 : f32 to vector<16x16xf32>
      %631 = arith.mulf %630, %605 : vector<16x16xf32>
      %632 = arith.addf %620, %631 : vector<16x16xf32>
      %633 = vector.broadcast %61 : f32 to vector<16x16xf32>
      %634 = arith.mulf %633, %605 : vector<16x16xf32>
      %635 = arith.addf %623, %634 : vector<16x16xf32>
      %636 = vector.broadcast %97 : f32 to vector<16x16xf32>
      %637 = arith.mulf %636, %605 : vector<16x16xf32>
      %638 = arith.addf %626, %637 : vector<16x16xf32>
      %639 = vector.broadcast %133 : f32 to vector<16x16xf32>
      %640 = arith.mulf %639, %605 : vector<16x16xf32>
      %641 = arith.addf %629, %640 : vector<16x16xf32>
      %642 = vector.extract_strided_slice %553 {offsets = [15, 0], sizes = [1, 16], strides = [1, 1]} : vector<16x16xf32> to vector<1x16xf32>
      %643 = vector.extract_strided_slice %553 {offsets = [0, 0], sizes = [15, 16], strides = [1, 1]} : vector<16x16xf32> to vector<15x16xf32>
      %644 = tpu.concatenate %642, %643 in 0 : vector<1x16xf32>, vector<15x16xf32> -> vector<16x16xf32>
      %645 = vector.extract_strided_slice %553 {offsets = [1, 0], sizes = [15, 16], strides = [1, 1]} : vector<16x16xf32> to vector<15x16xf32>
      %646 = vector.extract_strided_slice %553 {offsets = [0, 0], sizes = [1, 16], strides = [1, 1]} : vector<16x16xf32> to vector<1x16xf32>
      %647 = tpu.concatenate %645, %646 in 0 : vector<15x16xf32>, vector<1x16xf32> -> vector<16x16xf32>
      %648 = arith.select %215, %647, %644 : vector<16x16xi1>, vector<16x16xf32>
      %649 = arith.select %217, %644, %647 : vector<16x16xi1>, vector<16x16xf32>
      %650 = vector.broadcast %20 : f32 to vector<16x16xf32>
      %651 = arith.mulf %650, %648 : vector<16x16xf32>
      %652 = arith.addf %632, %651 : vector<16x16xf32>
      %653 = vector.broadcast %56 : f32 to vector<16x16xf32>
      %654 = arith.mulf %653, %648 : vector<16x16xf32>
      %655 = arith.addf %635, %654 : vector<16x16xf32>
      %656 = vector.broadcast %92 : f32 to vector<16x16xf32>
      %657 = arith.mulf %656, %648 : vector<16x16xf32>
      %658 = arith.addf %638, %657 : vector<16x16xf32>
      %659 = vector.broadcast %128 : f32 to vector<16x16xf32>
      %660 = arith.mulf %659, %648 : vector<16x16xf32>
      %661 = arith.addf %641, %660 : vector<16x16xf32>
      %662 = vector.broadcast %23 : f32 to vector<16x16xf32>
      %663 = arith.mulf %662, %553 : vector<16x16xf32>
      %664 = arith.addf %652, %663 : vector<16x16xf32>
      %665 = vector.broadcast %59 : f32 to vector<16x16xf32>
      %666 = arith.mulf %665, %553 : vector<16x16xf32>
      %667 = arith.addf %655, %666 : vector<16x16xf32>
      %668 = vector.broadcast %95 : f32 to vector<16x16xf32>
      %669 = arith.mulf %668, %553 : vector<16x16xf32>
      %670 = arith.addf %658, %669 : vector<16x16xf32>
      %671 = vector.broadcast %131 : f32 to vector<16x16xf32>
      %672 = arith.mulf %671, %553 : vector<16x16xf32>
      %673 = arith.addf %661, %672 : vector<16x16xf32>
      %674 = vector.broadcast %26 : f32 to vector<16x16xf32>
      %675 = arith.mulf %674, %649 : vector<16x16xf32>
      %676 = arith.addf %664, %675 : vector<16x16xf32>
      %677 = vector.broadcast %62 : f32 to vector<16x16xf32>
      %678 = arith.mulf %677, %649 : vector<16x16xf32>
      %679 = arith.addf %667, %678 : vector<16x16xf32>
      %680 = vector.broadcast %98 : f32 to vector<16x16xf32>
      %681 = arith.mulf %680, %649 : vector<16x16xf32>
      %682 = arith.addf %670, %681 : vector<16x16xf32>
      %683 = vector.broadcast %134 : f32 to vector<16x16xf32>
      %684 = arith.mulf %683, %649 : vector<16x16xf32>
      %685 = arith.addf %673, %684 : vector<16x16xf32>
      %c3_57 = arith.constant 3 : index
      %c0_58 = arith.constant 0 : index
      %c0_59 = arith.constant 0 : index
      %686 = vector.load %arg7[%c3_57, %c0_58, %c0_59] : memref<4x16x16xf32, #tpu.memory_space<vmem>>, vector<1x16x16xf32>
      %687 = vector.shape_cast %686 : vector<1x16x16xf32> to vector<16x16xf32>
      %688 = vector.broadcast %147 : f32 to vector<16x16xf32>
      %689 = arith.mulf %688, %687 : vector<16x16xf32>
      %690 = arith.addf %536, %689 : vector<16x16xf32>
      %691 = vector.broadcast %151 : f32 to vector<16x16xf32>
      %692 = arith.mulf %691, %687 : vector<16x16xf32>
      %693 = arith.addf %539, %692 : vector<16x16xf32>
      %694 = vector.broadcast %155 : f32 to vector<16x16xf32>
      %695 = arith.mulf %694, %687 : vector<16x16xf32>
      %696 = arith.addf %542, %695 : vector<16x16xf32>
      %697 = vector.broadcast %159 : f32 to vector<16x16xf32>
      %698 = arith.mulf %697, %687 : vector<16x16xf32>
      %699 = arith.addf %545, %698 : vector<16x16xf32>
      %700 = vector.extract_strided_slice %687 {offsets = [0, 15], sizes = [16, 1], strides = [1, 1]} : vector<16x16xf32> to vector<16x1xf32>
      %701 = vector.extract_strided_slice %687 {offsets = [0, 0], sizes = [16, 15], strides = [1, 1]} : vector<16x16xf32> to vector<16x15xf32>
      %702 = tpu.concatenate %700, %701 in 1 : vector<16x1xf32>, vector<16x15xf32> -> vector<16x16xf32>
      %703 = vector.extract_strided_slice %687 {offsets = [0, 1], sizes = [16, 15], strides = [1, 1]} : vector<16x16xf32> to vector<16x15xf32>
      %704 = vector.extract_strided_slice %687 {offsets = [0, 0], sizes = [16, 1], strides = [1, 1]} : vector<16x16xf32> to vector<16x1xf32>
      %705 = tpu.concatenate %703, %704 in 1 : vector<16x15xf32>, vector<16x1xf32> -> vector<16x16xf32>
      %706 = arith.select %195, %705, %702 : vector<16x16xi1>, vector<16x16xf32>
      %707 = arith.select %213, %702, %705 : vector<16x16xi1>, vector<16x16xf32>
      %708 = vector.extract_strided_slice %706 {offsets = [15, 0], sizes = [1, 16], strides = [1, 1]} : vector<16x16xf32> to vector<1x16xf32>
      %709 = vector.extract_strided_slice %706 {offsets = [0, 0], sizes = [15, 16], strides = [1, 1]} : vector<16x16xf32> to vector<15x16xf32>
      %710 = tpu.concatenate %708, %709 in 0 : vector<1x16xf32>, vector<15x16xf32> -> vector<16x16xf32>
      %711 = vector.extract_strided_slice %706 {offsets = [1, 0], sizes = [15, 16], strides = [1, 1]} : vector<16x16xf32> to vector<15x16xf32>
      %712 = vector.extract_strided_slice %706 {offsets = [0, 0], sizes = [1, 16], strides = [1, 1]} : vector<16x16xf32> to vector<1x16xf32>
      %713 = tpu.concatenate %711, %712 in 0 : vector<15x16xf32>, vector<1x16xf32> -> vector<16x16xf32>
      %714 = arith.select %215, %713, %710 : vector<16x16xi1>, vector<16x16xf32>
      %715 = arith.select %217, %710, %713 : vector<16x16xi1>, vector<16x16xf32>
      %716 = vector.broadcast %27 : f32 to vector<16x16xf32>
      %717 = arith.mulf %716, %714 : vector<16x16xf32>
      %718 = arith.addf %676, %717 : vector<16x16xf32>
      %719 = vector.broadcast %63 : f32 to vector<16x16xf32>
      %720 = arith.mulf %719, %714 : vector<16x16xf32>
      %721 = arith.addf %679, %720 : vector<16x16xf32>
      %722 = vector.broadcast %99 : f32 to vector<16x16xf32>
      %723 = arith.mulf %722, %714 : vector<16x16xf32>
      %724 = arith.addf %682, %723 : vector<16x16xf32>
      %725 = vector.broadcast %135 : f32 to vector<16x16xf32>
      %726 = arith.mulf %725, %714 : vector<16x16xf32>
      %727 = arith.addf %685, %726 : vector<16x16xf32>
      %728 = vector.broadcast %30 : f32 to vector<16x16xf32>
      %729 = arith.mulf %728, %706 : vector<16x16xf32>
      %730 = arith.addf %718, %729 : vector<16x16xf32>
      %731 = vector.broadcast %66 : f32 to vector<16x16xf32>
      %732 = arith.mulf %731, %706 : vector<16x16xf32>
      %733 = arith.addf %721, %732 : vector<16x16xf32>
      %734 = vector.broadcast %102 : f32 to vector<16x16xf32>
      %735 = arith.mulf %734, %706 : vector<16x16xf32>
      %736 = arith.addf %724, %735 : vector<16x16xf32>
      %737 = vector.broadcast %138 : f32 to vector<16x16xf32>
      %738 = arith.mulf %737, %706 : vector<16x16xf32>
      %739 = arith.addf %727, %738 : vector<16x16xf32>
      %740 = vector.broadcast %33 : f32 to vector<16x16xf32>
      %741 = arith.mulf %740, %715 : vector<16x16xf32>
      %742 = arith.addf %730, %741 : vector<16x16xf32>
      %743 = vector.broadcast %69 : f32 to vector<16x16xf32>
      %744 = arith.mulf %743, %715 : vector<16x16xf32>
      %745 = arith.addf %733, %744 : vector<16x16xf32>
      %746 = vector.broadcast %105 : f32 to vector<16x16xf32>
      %747 = arith.mulf %746, %715 : vector<16x16xf32>
      %748 = arith.addf %736, %747 : vector<16x16xf32>
      %749 = vector.broadcast %141 : f32 to vector<16x16xf32>
      %750 = arith.mulf %749, %715 : vector<16x16xf32>
      %751 = arith.addf %739, %750 : vector<16x16xf32>
      %752 = vector.extract_strided_slice %687 {offsets = [15, 0], sizes = [1, 16], strides = [1, 1]} : vector<16x16xf32> to vector<1x16xf32>
      %753 = vector.extract_strided_slice %687 {offsets = [0, 0], sizes = [15, 16], strides = [1, 1]} : vector<16x16xf32> to vector<15x16xf32>
      %754 = tpu.concatenate %752, %753 in 0 : vector<1x16xf32>, vector<15x16xf32> -> vector<16x16xf32>
      %755 = vector.extract_strided_slice %687 {offsets = [1, 0], sizes = [15, 16], strides = [1, 1]} : vector<16x16xf32> to vector<15x16xf32>
      %756 = vector.extract_strided_slice %687 {offsets = [0, 0], sizes = [1, 16], strides = [1, 1]} : vector<16x16xf32> to vector<1x16xf32>
      %757 = tpu.concatenate %755, %756 in 0 : vector<15x16xf32>, vector<1x16xf32> -> vector<16x16xf32>
      %758 = arith.select %215, %757, %754 : vector<16x16xi1>, vector<16x16xf32>
      %759 = arith.select %217, %754, %757 : vector<16x16xi1>, vector<16x16xf32>
      %760 = vector.broadcast %28 : f32 to vector<16x16xf32>
      %761 = arith.mulf %760, %758 : vector<16x16xf32>
      %762 = arith.addf %742, %761 : vector<16x16xf32>
      %763 = vector.broadcast %64 : f32 to vector<16x16xf32>
      %764 = arith.mulf %763, %758 : vector<16x16xf32>
      %765 = arith.addf %745, %764 : vector<16x16xf32>
      %766 = vector.broadcast %100 : f32 to vector<16x16xf32>
      %767 = arith.mulf %766, %758 : vector<16x16xf32>
      %768 = arith.addf %748, %767 : vector<16x16xf32>
      %769 = vector.broadcast %136 : f32 to vector<16x16xf32>
      %770 = arith.mulf %769, %758 : vector<16x16xf32>
      %771 = arith.addf %751, %770 : vector<16x16xf32>
      %772 = vector.broadcast %31 : f32 to vector<16x16xf32>
      %773 = arith.mulf %772, %687 : vector<16x16xf32>
      %774 = arith.addf %762, %773 : vector<16x16xf32>
      %775 = vector.broadcast %67 : f32 to vector<16x16xf32>
      %776 = arith.mulf %775, %687 : vector<16x16xf32>
      %777 = arith.addf %765, %776 : vector<16x16xf32>
      %778 = vector.broadcast %103 : f32 to vector<16x16xf32>
      %779 = arith.mulf %778, %687 : vector<16x16xf32>
      %780 = arith.addf %768, %779 : vector<16x16xf32>
      %781 = vector.broadcast %139 : f32 to vector<16x16xf32>
      %782 = arith.mulf %781, %687 : vector<16x16xf32>
      %783 = arith.addf %771, %782 : vector<16x16xf32>
      %784 = vector.broadcast %34 : f32 to vector<16x16xf32>
      %785 = arith.mulf %784, %759 : vector<16x16xf32>
      %786 = arith.addf %774, %785 : vector<16x16xf32>
      %787 = vector.broadcast %70 : f32 to vector<16x16xf32>
      %788 = arith.mulf %787, %759 : vector<16x16xf32>
      %789 = arith.addf %777, %788 : vector<16x16xf32>
      %790 = vector.broadcast %106 : f32 to vector<16x16xf32>
      %791 = arith.mulf %790, %759 : vector<16x16xf32>
      %792 = arith.addf %780, %791 : vector<16x16xf32>
      %793 = vector.broadcast %142 : f32 to vector<16x16xf32>
      %794 = arith.mulf %793, %759 : vector<16x16xf32>
      %795 = arith.addf %783, %794 : vector<16x16xf32>
      %796 = vector.extract_strided_slice %707 {offsets = [15, 0], sizes = [1, 16], strides = [1, 1]} : vector<16x16xf32> to vector<1x16xf32>
      %797 = vector.extract_strided_slice %707 {offsets = [0, 0], sizes = [15, 16], strides = [1, 1]} : vector<16x16xf32> to vector<15x16xf32>
      %798 = tpu.concatenate %796, %797 in 0 : vector<1x16xf32>, vector<15x16xf32> -> vector<16x16xf32>
      %799 = vector.extract_strided_slice %707 {offsets = [1, 0], sizes = [15, 16], strides = [1, 1]} : vector<16x16xf32> to vector<15x16xf32>
      %800 = vector.extract_strided_slice %707 {offsets = [0, 0], sizes = [1, 16], strides = [1, 1]} : vector<16x16xf32> to vector<1x16xf32>
      %801 = tpu.concatenate %799, %800 in 0 : vector<15x16xf32>, vector<1x16xf32> -> vector<16x16xf32>
      %802 = arith.select %215, %801, %798 : vector<16x16xi1>, vector<16x16xf32>
      %803 = arith.select %217, %798, %801 : vector<16x16xi1>, vector<16x16xf32>
      %804 = vector.broadcast %29 : f32 to vector<16x16xf32>
      %805 = arith.mulf %804, %802 : vector<16x16xf32>
      %806 = arith.addf %786, %805 : vector<16x16xf32>
      %807 = vector.broadcast %65 : f32 to vector<16x16xf32>
      %808 = arith.mulf %807, %802 : vector<16x16xf32>
      %809 = arith.addf %789, %808 : vector<16x16xf32>
      %810 = vector.broadcast %101 : f32 to vector<16x16xf32>
      %811 = arith.mulf %810, %802 : vector<16x16xf32>
      %812 = arith.addf %792, %811 : vector<16x16xf32>
      %813 = vector.broadcast %137 : f32 to vector<16x16xf32>
      %814 = arith.mulf %813, %802 : vector<16x16xf32>
      %815 = arith.addf %795, %814 : vector<16x16xf32>
      %816 = vector.broadcast %32 : f32 to vector<16x16xf32>
      %817 = arith.mulf %816, %707 : vector<16x16xf32>
      %818 = arith.addf %806, %817 : vector<16x16xf32>
      %819 = vector.broadcast %68 : f32 to vector<16x16xf32>
      %820 = arith.mulf %819, %707 : vector<16x16xf32>
      %821 = arith.addf %809, %820 : vector<16x16xf32>
      %822 = vector.broadcast %104 : f32 to vector<16x16xf32>
      %823 = arith.mulf %822, %707 : vector<16x16xf32>
      %824 = arith.addf %812, %823 : vector<16x16xf32>
      %825 = vector.broadcast %140 : f32 to vector<16x16xf32>
      %826 = arith.mulf %825, %707 : vector<16x16xf32>
      %827 = arith.addf %815, %826 : vector<16x16xf32>
      %828 = vector.broadcast %35 : f32 to vector<16x16xf32>
      %829 = arith.mulf %828, %803 : vector<16x16xf32>
      %830 = arith.addf %818, %829 : vector<16x16xf32>
      %831 = vector.broadcast %71 : f32 to vector<16x16xf32>
      %832 = arith.mulf %831, %803 : vector<16x16xf32>
      %833 = arith.addf %821, %832 : vector<16x16xf32>
      %834 = vector.broadcast %107 : f32 to vector<16x16xf32>
      %835 = arith.mulf %834, %803 : vector<16x16xf32>
      %836 = arith.addf %824, %835 : vector<16x16xf32>
      %837 = vector.broadcast %143 : f32 to vector<16x16xf32>
      %838 = arith.mulf %837, %803 : vector<16x16xf32>
      %839 = arith.addf %827, %838 : vector<16x16xf32>
      %cst = arith.constant 0.000000e+00 : f32
      %840 = vector.broadcast %cst : f32 to vector<16x16xf32>
      %841 = arith.cmpf ogt, %830, %840 : vector<16x16xf32>
      %cst_60 = arith.constant 0.00999999977 : f32
      %842 = vector.broadcast %cst_60 : f32 to vector<16x16xf32>
      %843 = arith.mulf %842, %830 : vector<16x16xf32>
      %844 = arith.select %841, %830, %843 : vector<16x16xi1>, vector<16x16xf32>
      %cst_61 = arith.constant 0.000000e+00 : f32
      %845 = vector.broadcast %cst_61 : f32 to vector<16x16xf32>
      %846 = arith.cmpf ogt, %690, %845 : vector<16x16xf32>
      %cst_62 = arith.constant 0.00999999977 : f32
      %847 = vector.broadcast %cst_62 : f32 to vector<16x16xf32>
      %848 = arith.mulf %847, %690 : vector<16x16xf32>
      %849 = arith.select %846, %690, %848 : vector<16x16xi1>, vector<16x16xf32>
      %850 = arith.addf %844, %849 : vector<16x16xf32>
      %cst_63 = arith.constant 0.000000e+00 : f32
      %851 = vector.broadcast %cst_63 : f32 to vector<16x16xf32>
      %852 = arith.cmpf ogt, %833, %851 : vector<16x16xf32>
      %cst_64 = arith.constant 0.00999999977 : f32
      %853 = vector.broadcast %cst_64 : f32 to vector<16x16xf32>
      %854 = arith.mulf %853, %833 : vector<16x16xf32>
      %855 = arith.select %852, %833, %854 : vector<16x16xi1>, vector<16x16xf32>
      %cst_65 = arith.constant 0.000000e+00 : f32
      %856 = vector.broadcast %cst_65 : f32 to vector<16x16xf32>
      %857 = arith.cmpf ogt, %693, %856 : vector<16x16xf32>
      %cst_66 = arith.constant 0.00999999977 : f32
      %858 = vector.broadcast %cst_66 : f32 to vector<16x16xf32>
      %859 = arith.mulf %858, %693 : vector<16x16xf32>
      %860 = arith.select %857, %693, %859 : vector<16x16xi1>, vector<16x16xf32>
      %861 = arith.addf %855, %860 : vector<16x16xf32>
      %cst_67 = arith.constant 0.000000e+00 : f32
      %862 = vector.broadcast %cst_67 : f32 to vector<16x16xf32>
      %863 = arith.cmpf ogt, %836, %862 : vector<16x16xf32>
      %cst_68 = arith.constant 0.00999999977 : f32
      %864 = vector.broadcast %cst_68 : f32 to vector<16x16xf32>
      %865 = arith.mulf %864, %836 : vector<16x16xf32>
      %866 = arith.select %863, %836, %865 : vector<16x16xi1>, vector<16x16xf32>
      %cst_69 = arith.constant 0.000000e+00 : f32
      %867 = vector.broadcast %cst_69 : f32 to vector<16x16xf32>
      %868 = arith.cmpf ogt, %696, %867 : vector<16x16xf32>
      %cst_70 = arith.constant 0.00999999977 : f32
      %869 = vector.broadcast %cst_70 : f32 to vector<16x16xf32>
      %870 = arith.mulf %869, %696 : vector<16x16xf32>
      %871 = arith.select %868, %696, %870 : vector<16x16xi1>, vector<16x16xf32>
      %872 = arith.addf %866, %871 : vector<16x16xf32>
      %cst_71 = arith.constant 0.000000e+00 : f32
      %873 = vector.broadcast %cst_71 : f32 to vector<16x16xf32>
      %874 = arith.cmpf ogt, %839, %873 : vector<16x16xf32>
      %cst_72 = arith.constant 0.00999999977 : f32
      %875 = vector.broadcast %cst_72 : f32 to vector<16x16xf32>
      %876 = arith.mulf %875, %839 : vector<16x16xf32>
      %877 = arith.select %874, %839, %876 : vector<16x16xi1>, vector<16x16xf32>
      %cst_73 = arith.constant 0.000000e+00 : f32
      %878 = vector.broadcast %cst_73 : f32 to vector<16x16xf32>
      %879 = arith.cmpf ogt, %699, %878 : vector<16x16xf32>
      %cst_74 = arith.constant 0.00999999977 : f32
      %880 = vector.broadcast %cst_74 : f32 to vector<16x16xf32>
      %881 = arith.mulf %880, %699 : vector<16x16xf32>
      %882 = arith.select %879, %699, %881 : vector<16x16xi1>, vector<16x16xf32>
      %883 = arith.addf %877, %882 : vector<16x16xf32>
      %c2_i32 = arith.constant 2 : i32
      %884 = arith.cmpi eq, %223, %c2_i32 : i32
      %885 = arith.extui %884 : i1 to i32
      %c0_i32_75 = arith.constant 0 : i32
      %886 = arith.cmpi ne, %885, %c0_i32_75 : i32
      scf.if %886 {
        %c0_78 = arith.constant 0 : index
        %c0_79 = arith.constant 0 : index
        %c0_80 = arith.constant 0 : index
        %c0_81 = arith.constant 0 : index
        %890 = vector.load %arg6[%c0_78, %c0_79, %c0_80, %c0_81] : memref<1x4x16x16xf32, #tpu.memory_space<vmem>>, vector<1x1x16x16xf32>
        %891 = vector.shape_cast %890 : vector<1x1x16x16xf32> to vector<16x16xf32>
        %892 = vector.shape_cast %850 : vector<16x16xf32> to vector<1x1x16x16xf32>
        tpu.vector_store %arg6[%c0_78, %c0_79, %c0_80, %c0_81], %892 {strides = array<i32>} : memref<1x4x16x16xf32, #tpu.memory_space<vmem>>, vector<1x1x16x16xf32>,
        %c0_82 = arith.constant 0 : index
        %c1_83 = arith.constant 1 : index
        %c0_84 = arith.constant 0 : index
        %c0_85 = arith.constant 0 : index
        %893 = vector.load %arg6[%c0_82, %c1_83, %c0_84, %c0_85] : memref<1x4x16x16xf32, #tpu.memory_space<vmem>>, vector<1x1x16x16xf32>
        %894 = vector.shape_cast %893 : vector<1x1x16x16xf32> to vector<16x16xf32>
        %895 = vector.shape_cast %861 : vector<16x16xf32> to vector<1x1x16x16xf32>
        tpu.vector_store %arg6[%c0_82, %c1_83, %c0_84, %c0_85], %895 {strides = array<i32>} : memref<1x4x16x16xf32, #tpu.memory_space<vmem>>, vector<1x1x16x16xf32>,
        %c0_86 = arith.constant 0 : index
        %c2_87 = arith.constant 2 : index
        %c0_88 = arith.constant 0 : index
        %c0_89 = arith.constant 0 : index
        %896 = vector.load %arg6[%c0_86, %c2_87, %c0_88, %c0_89] : memref<1x4x16x16xf32, #tpu.memory_space<vmem>>, vector<1x1x16x16xf32>
        %897 = vector.shape_cast %896 : vector<1x1x16x16xf32> to vector<16x16xf32>
        %898 = vector.shape_cast %872 : vector<16x16xf32> to vector<1x1x16x16xf32>
        tpu.vector_store %arg6[%c0_86, %c2_87, %c0_88, %c0_89], %898 {strides = array<i32>} : memref<1x4x16x16xf32, #tpu.memory_space<vmem>>, vector<1x1x16x16xf32>,
        %c0_90 = arith.constant 0 : index
        %c3_91 = arith.constant 3 : index
        %c0_92 = arith.constant 0 : index
        %c0_93 = arith.constant 0 : index
        %899 = vector.load %arg6[%c0_90, %c3_91, %c0_92, %c0_93] : memref<1x4x16x16xf32, #tpu.memory_space<vmem>>, vector<1x1x16x16xf32>
        %900 = vector.shape_cast %899 : vector<1x1x16x16xf32> to vector<16x16xf32>
        %901 = vector.shape_cast %883 : vector<16x16xf32> to vector<1x1x16x16xf32>
        tpu.vector_store %arg6[%c0_90, %c3_91, %c0_92, %c0_93], %901 {strides = array<i32>} : memref<1x4x16x16xf32, #tpu.memory_space<vmem>>, vector<1x1x16x16xf32>,
      } else {
      }
      %c2_i32_76 = arith.constant 2 : i32
      %887 = arith.cmpi slt, %223, %c2_i32_76 : i32
      %888 = arith.extui %887 : i1 to i32
      %c0_i32_77 = arith.constant 0 : i32
      %889 = arith.cmpi ne, %888, %c0_i32_77 : i32
      scf.if %889 {
        %c0_78 = arith.constant 0 : index
        %c0_79 = arith.constant 0 : index
        %c0_80 = arith.constant 0 : index
        %890 = vector.load %arg7[%c0_78, %c0_79, %c0_80] : memref<4x16x16xf32, #tpu.memory_space<vmem>>, vector<1x16x16xf32>
        %891 = vector.shape_cast %890 : vector<1x16x16xf32> to vector<16x16xf32>
        %892 = vector.shape_cast %850 : vector<16x16xf32> to vector<1x16x16xf32>
        tpu.vector_store %arg7[%c0_78, %c0_79, %c0_80], %892 {strides = array<i32>} : memref<4x16x16xf32, #tpu.memory_space<vmem>>, vector<1x16x16xf32>,
        %c1_81 = arith.constant 1 : index
        %c0_82 = arith.constant 0 : index
        %c0_83 = arith.constant 0 : index
        %893 = vector.load %arg7[%c1_81, %c0_82, %c0_83] : memref<4x16x16xf32, #tpu.memory_space<vmem>>, vector<1x16x16xf32>
        %894 = vector.shape_cast %893 : vector<1x16x16xf32> to vector<16x16xf32>
        %895 = vector.shape_cast %861 : vector<16x16xf32> to vector<1x16x16xf32>
        tpu.vector_store %arg7[%c1_81, %c0_82, %c0_83], %895 {strides = array<i32>} : memref<4x16x16xf32, #tpu.memory_space<vmem>>, vector<1x16x16xf32>,
        %c2_84 = arith.constant 2 : index
        %c0_85 = arith.constant 0 : index
        %c0_86 = arith.constant 0 : index
        %896 = vector.load %arg7[%c2_84, %c0_85, %c0_86] : memref<4x16x16xf32, #tpu.memory_space<vmem>>, vector<1x16x16xf32>
        %897 = vector.shape_cast %896 : vector<1x16x16xf32> to vector<16x16xf32>
        %898 = vector.shape_cast %872 : vector<16x16xf32> to vector<1x16x16xf32>
        tpu.vector_store %arg7[%c2_84, %c0_85, %c0_86], %898 {strides = array<i32>} : memref<4x16x16xf32, #tpu.memory_space<vmem>>, vector<1x16x16xf32>,
        %c3_87 = arith.constant 3 : index
        %c0_88 = arith.constant 0 : index
        %c0_89 = arith.constant 0 : index
        %899 = vector.load %arg7[%c3_87, %c0_88, %c0_89] : memref<4x16x16xf32, #tpu.memory_space<vmem>>, vector<1x16x16xf32>
        %900 = vector.shape_cast %899 : vector<1x16x16xf32> to vector<16x16xf32>
        %901 = vector.shape_cast %883 : vector<16x16xf32> to vector<1x16x16xf32>
        tpu.vector_store %arg7[%c3_87, %c0_88, %c0_89], %901 {strides = array<i32>} : memref<4x16x16xf32, #tpu.memory_space<vmem>>, vector<1x16x16xf32>,
      } else {
      }
    }
    %c3_i32_45 = arith.constant 3 : i32
    return
  }
  func.func @transform_0(%arg0: i32) -> i32 {
    %c0_i32 = arith.constant 0 : i32
    %c0_i32_0 = arith.constant 0 : i32
    return %c0_i32 : i32
  }
  func.func @transform_1(%arg0: i32) -> i32 {
    %c0_i32 = arith.constant 0 : i32
    %c0_i32_0 = arith.constant 0 : i32
    return %c0_i32 : i32
  }
  func.func @transform_2(%arg0: i32) -> i32 {
    %c0_i32 = arith.constant 0 : i32
    %c0_i32_0 = arith.constant 0 : i32
    return %c0_i32 : i32
  }
  func.func @transform_3(%arg0: i32) -> i32 {
    %c0_i32 = arith.constant 0 : i32
    %c0_i32_0 = arith.constant 0 : i32
    return %c0_i32 : i32
  }
  func.func @transform_4(%arg0: i32) -> (i32, i32, i32, i32) {
    %c0_i32 = arith.constant 0 : i32
    %c0_i32_0 = arith.constant 0 : i32
    %c0_i32_1 = arith.constant 0 : i32
    %c0_i32_2 = arith.constant 0 : i32
    return %arg0, %c0_i32, %c0_i32_0, %c0_i32_1 : i32, i32, i32, i32
  }
  func.func @transform_5(%arg0: i32) -> (i32, i32, i32, i32) {
    %c0_i32 = arith.constant 0 : i32
    %c0_i32_0 = arith.constant 0 : i32
    %c0_i32_1 = arith.constant 0 : i32
    %c0_i32_2 = arith.constant 0 : i32
    return %arg0, %c0_i32, %c0_i32_0, %c0_i32_1 : i32, i32, i32, i32
  }
}

</mosaic_0001>

<bundles_post_ra>
// kernel: tpu_custom_call.1
= control target key start
LH: loop header
LB: loop body
LE: loop exit
PB: predicated region body
PF: predicated region fallthrough
CT: control target
= control target key end

     0   :  { %s4618_s0 = inlined_call_operand.hbm [shape: f32[144], index: 0, kind: input, shape index: {}]   ;;  %s4619_s1 = inlined_call_operand.vmem [shape: f32[16], index: 1, kind: input, shape index: {}]   ;;  %s4620_s2 = inlined_call_operand.vmem [shape: f32[4], index: 2, kind: input, shape index: {}]   ;;  %s4621_s3 = inlined_call_operand.vmem [shape: f32[4], index: 3, kind: input, shape index: {}]   ;;  %s4622_s4 = inlined_call_operand.hbm [shape: f32[2,4,16,16], index: 4, kind: input, shape index: {}]   ;;  %s4623_s5 = inlined_call_operand.hbm [shape: f32[2,4,16,16], index: 5, kind: output, shape index: {}]  }
   0x1   :  { %4840 = sst [smem:[#allocation266_spill]] %s4618_s0 }
   0x2   :  { %4841 = sst [smem:[#allocation267_spill]] %s4619_s1 }
   0x3   :  { %4842 = sst [smem:[#allocation268_spill]] %s4620_s2 }
   0x4   :  { %4843 = sst [smem:[#allocation269_spill]] %s4621_s3 }
   0x5   :  { %4844 = sst [smem:[#allocation270_spill]] %s4622_s4 }
   0x6   :  { %4845 = sst [smem:[#allocation271_spill]] %s4623_s5 }
   0x7   :  { %10 = vsyncpa [#allocation6], 0 }
   0x8   :  { %11 = vsyncpa [#allocation7], 0 }
   0x9   :  { %12 = vsyncpa [#allocation10], 0 }
   0xa   :  { %13 = vsyncpa [#allocation4], 0 }
   0xb   :  { %15 = vsyncpa [#allocation4 + $0x1], 0 }
   0xc   :  { %16 = vsyncpa [#allocation5], 0 }
   0xd   :  { %18 = vsyncpa [#allocation5 + $0x1], 0  ;;  %s2438_s18 = smov 0   ;;  %s2440_s19 = smov 0  }
   0xe   :  { %s2442_s20 = smov 0   ;;  %s2444_s21 = smov 0  }
   0xf LB: > { %4846 = sst [smem:[#allocation19_spill]] %s2376_s18  ;;  %s2459_s22 = sadd.s32 4294967295, %s2388_s21   ;;  %s2388_s21 = sphi %s2444_s21, %s5708_s21   ;;  %s2384_s20 = sphi %s2442_s20, %s5711_s20   ;;  %s2380_s19 = sphi %s2440_s19, %s5710_s19   ;;  %s2376_s18 = sphi %s2438_s18, %s5709_s18  }
  0x10   : > { %4847 = sst [smem:[#allocation20_spill]] %s2380_s19  ;;  %s1916_s23 = sadd.s32 4294967294, %s2388_s21  }
  0x11   : > { %4848 = sst [smem:[#allocation21_spill]] %s2384_s20  ;;  %p128_p0 = scmp.ne.s32.totalorder %s2380_s19, %s2376_s18 }
  0x12   : > { %4849 = sst [smem:[#allocation22_spill]] %s2388_s21  ;;  %p4624_p1 = scmp.eq.s32.totalorder %s2459_s22, 0 }
  0x13   : > { %4850 = sst [smem:[#allocation23_spill]] %s2459_s22  ;;  %p158_p3 = scmp.eq.s32.totalorder %s1916_s23, 1 }
  0x14   : > { %p2468_p4 = por %p4624_p1, %p128_p0  ;;  %p1917_p5 = scmp.ge.s32.totalorder %s2388_s21, 1 }
  0x15   : > { %p2473_p6 = por %p158_p3, %p128_p0  ;;  %p165_p7 = scmp.lt.s32.totalorder %s2388_s21, 3 }
  0x16   : > { %s4851_s24 = scalar_select %p2468_p4, 1, 0 }
  0x17   : > { %s4852_s25 = scalar_select %p2473_p6, 1, 0 }
  0x18   : > { %s4854_s2 = sld [smem:[#allocation268_spill]]  ;;  %p2481_p8 = pnand %p1917_p5, %p165_p7 }
  0x19   : > { %4853 = sst [smem:[#allocation24_spill]] %s4852_s25  ;;  %s4856_s1 = sld [smem:[#allocation267_spill]] }
  0x1a   : > { %p2132_p10 = pneg %p2481_p8  ;;  %s4858_s3 = sld [smem:[#allocation269_spill]] }
  0x1c   : > { %p2493_p11 = pnand %p2132_p10, %p4624_p1 }
  0x1e   : > { %s198_s28 = sshll.u32 %s4854_s2, 4  ;;  %p2220_p13 = pneg %p2493_p11  ;;  %s199_s28 = int_to_ptr.vmem [resolvable:$true] %s198_s28 }
  0x1f   : > { %s187_s7 = sshll.u32 %s4856_s1, 4  ;;  %s2218_s12 = scalar_lea.vmem %s199_s28, 16  ;;  %s2497_s7 = int_to_ptr.vmem [resolvable:$true] %s187_s7 }
  0x20   : > { %s209_s11 = sshll.u32 %s4858_s3, 4  ;;  %p2219_p12 = scmp.ne.s32.totalorder %s199_s28, %s2218_s12  ;;  %s2502_s11 = int_to_ptr.vmem [resolvable:$true] %s209_s11 }
  0x21   : > { %p2226_p5 = scmp.lt.s32.totalorder %s199_s28, %s199_s28  ;;  %p2227_p7 = scmp.lt.s32.totalorder %s2218_s12, %s2218_s12 }
  0x22   : > { %p2221_p0 = pnand %p2220_p13, %p2219_p12 }
  0x23   : > { %p2228_p10 = por %p2227_p7, %p2226_p5 }
  0x24   : > { %p2222_p3 = pneg %p2221_p0 }
  0x26   : > { %p2229_p9 = pnand %p2228_p10, %p2222_p3 }
  0x28   : > { %2232 = shalt.err (!%p2229_p9)
}
  0x29   : > { %s2394_s13 = smov [#allocation9]   ;;  %s4859_s0 = sld [smem:[#allocation266_spill]] }
  0x2a   : > { %2141 = dma.vmem_to_smem (!%p2493_p11), %s199_s28, 16, %s2394_s13, [#allocation10]  }
  0x2f   : > { %s2233_s16 = scalar_lea.hbm %s4859_s0, 32 }
  0x30   : > { %p2234_p1 = scmp.ne.s32.totalorder %s4859_s0, %s2233_s16  ;;  %p2240_p9 = scmp.lt.u32.totalorder %s2233_s16, %s4859_s0 }
  0x32   : > { %p2236_p12 = pnand %p2234_p1, %p2220_p13 }
  0x34   : > { %p2237_p0 = pneg %p2236_p12 }
  0x36   : > { %p2242_p3 = pnand %p2240_p9, %p2237_p0 }
  0x38   : > { %2245 = shalt.err (!%p2242_p3)
}
  0x39   : > { %s2395_s30 = smov [#allocation3]   ;;  %s2246_s9 = scalar_lea.vmem %s2497_s7, 16 }
  0x3a   : > { %2135 = dma.hbm_to_smem (!%p2493_p11), %s4859_s0, 32, %s2395_s30, [#allocation6]  }
  0x3b   : > { %p2247_p1 = scmp.ne.s32.totalorder %s2497_s7, %s2246_s9  ;;  %p2254_p10 = scmp.lt.s32.totalorder %s2497_s7, %s2497_s7 }
  0x3c   : > { %p2255_p12 = scmp.lt.s32.totalorder %s2246_s9, %s2246_s9 }
  0x3d   : > { %p2249_p5 = pnand %p2247_p1, %p2220_p13 }
  0x3e   : > { %p2256_p0 = por %p2255_p12, %p2254_p10 }
  0x3f   : > { %p2250_p7 = pneg %p2249_p5 }
  0x41   : > { %p2257_p9 = pnand %p2256_p0, %p2250_p7 }
  0x43   : > { %2260 = shalt.err (!%p2257_p9)
}
  0x44   : > { %s2396_s10 = smov [#allocation8]   ;;  %s2261_s12 = scalar_lea.vmem %s2502_s11, 16 }
  0x45   : > { %2138 = dma.vmem_to_smem (!%p2493_p11), %s2497_s7, 16, %s2396_s10, [#allocation7]  }
  0x46   : > { %p2262_p3 = scmp.ne.s32.totalorder %s2502_s11, %s2261_s12  ;;  %p2269_p2 = scmp.lt.s32.totalorder %s2502_s11, %s2502_s11 }
  0x47   : > { %p2270_p10 = scmp.lt.s32.totalorder %s2261_s12, %s2261_s12 }
  0x48   : > { %p2264_p1 = pnand %p2262_p3, %p2220_p13 }
  0x49   : > { %p2271_p7 = por %p2270_p10, %p2269_p2 }
  0x4a   : > { %p2265_p5 = pneg %p2264_p1 }
  0x4c   : > { %p2272_p12 = pnand %p2271_p7, %p2265_p5 }
  0x4e   : > { %2275 = shalt.err (!%p2272_p12)
}
  0x4f   : > { %s2397_s13 = smov [#allocation11]   ;;  %s2549_s7 = sadd.s32 1, %s2388_s21  }
  0x50   : > { %2144 = dma.vmem_to_smem (!%p2493_p11), %s2502_s11, 16, %s2397_s13, [#allocation10]  }
  0x51   : > { %4860 = sst [smem:[#allocation25_spill]] %s2549_s7  ;;  %s112_s14 = ssub.s32 %s2388_s21, %s2549_s7 }
  0x52   : > { %p113_p2 = scmp.eq.s32.totalorder %s112_s14, 0  ;;  %s115_s15 = sadd.s32 1, %s2384_s20 }
  0x53   : > { %p122_p13 = scmp.ne.s32.totalorder %s2384_s20, %s2380_s19  ;;  %p123_p0 = scmp.eq.s32.totalorder %s2388_s21, 0 }
  0x54   : > { %s2558_s8 = scalar_select %p113_p2, %s2384_s20, %s115_s15  }
  0x55   : > { %p124_p9 = por %p123_p0, %p122_p13  ;;  %p4862_p3 = scmp.eq.s32.totalorder %s2459_s22, 1 }
  0x56   : > { %4861 = sst [smem:[#allocation26_spill]] %s2558_s8  ;;  %p2157_p5 = scmp.lt.s32.totalorder %s2388_s21, 2 }
  0x57   : > { %p2562_p1 = por %p4862_p3, %p122_p13  ;;  %s220_s17 = sand.u32 1, %s2384_s20  }
  0x58   : > { %s1923_s23 = sshll.u32 %s220_s17, 6  ;;  %s2110_s11 = sshll.u32 %s2388_s21, 10 }
  0x59   : > { %s4863_s16 = scalar_select %p2562_p1, 1, 0 }
  0x5a   : > { %s4865_s4 = sld [smem:[#allocation270_spill]]  ;;  %s224_s28 = scalar_lea.vmem [#allocation12], %s1923_s23 }
  0x5b   : > { %4864 = sst [smem:[#allocation27_spill]] %s4863_s16  ;;  %s231_s6 = sshll.u32 %s224_s28, 4  ;;  %s2574_s6 = int_to_ptr.vmem [resolvable:$true] %s231_s6 }
  0x5c   : > { %p2576_p11 = pnand %p2157_p5, %p124_p9  ;;  %s2580_s10 = scalar_lea.sflag [#allocation4], %s220_s17 }
  0x5e   : > { %p2278_p7 = pneg %p2576_p11 }
  0x60   : > { %s2572_s30 = scalar_lea.hbm %s4865_s4, %s2110_s11  ;;  %s2281_s15 = scalar_lea.hbm %s4865_s4, 2048 }
  0x61   : > { %s2276_s12 = scalar_lea.hbm %s2572_s30, 1024  ;;  %p2282_p13 = scmp.lt.u32.totalorder %s2572_s30, %s4865_s4 }
  0x62   : > { %p2277_p10 = scmp.ne.s32.totalorder %s2572_s30, %s2276_s12  ;;  %p2283_p0 = scmp.lt.u32.totalorder %s2281_s15, %s2276_s12 }
  0x63   : > { %p2285_p3 = scmp.lt.u32.totalorder %s2276_s12, %s2572_s30 }
  0x64   : > { %p2279_p12 = pnand %p2278_p7, %p2277_p10  ;;  %p2284_p9 = por %p2283_p0, %p2282_p13 }
  0x66   : > { %p2280_p2 = pneg %p2279_p12  ;;  %p2286_p5 = por %p2285_p3, %p2284_p9 }
  0x68   : > { %p2287_p6 = pnand %p2286_p5, %p2280_p2 }
  0x6a   : > { %2290 = shalt.err (!%p2287_p6)
}
  0x6b   : > { %s2291_s17 = scalar_lea.vmem %s2574_s6, 1024  ;;  %s2398_s26 = smov [#allocation12]  }
  0x6c   : > { %p2292_p10 = scmp.ne.s32.totalorder %s2574_s6, %s2291_s17  ;;  %s2296_s27 = sshll.u32 %s2398_s26, 4  ;;  %s2297_s27 = int_to_ptr.vmem [resolvable:$false] %s2296_s27 }
  0x6d   : > { %s2298_s28 = scalar_lea.vmem %s2297_s27, 2048  ;;  %p2299_p4 = scmp.lt.s32.totalorder %s2574_s6, %s2297_s27 }
  0x6e   : > { %p2294_p12 = pnand %p2292_p10, %p2278_p7  ;;  %p2300_p13 = scmp.lt.s32.totalorder %s2298_s28, %s2291_s17 }
  0x70   : > { %p2295_p1 = pneg %p2294_p12  ;;  %p2301_p0 = por %p2300_p13, %p2299_p4 }
  0x72   : > { %p2302_p9 = pnand %p2301_p0, %p2295_p1 }
  0x74   : > { %2305 = shalt.err (!%p2302_p9)
}
  0x75   : > { %s2399_s12 = smov 128   ;;  %s2400_s13 = smov 8  }
  0x76   : > { %2148 = dma.hbm_to_vmem [thread:$0]  (!%p2576_p11), %s2572_s30, 1024, %s2574_s6, %s2580_s10, %s2399_s12, %s2399_s12, %s2400_s13  }
  0x77   : > { %243 = sbr.rel (%p2481_p8) target bundleno = 739 (0x2e3), region = 40 }
  0x7e   : > { %p4867_p6 = scmp.eq.s32.totalorder %s2459_s22, 0 }
  0x80   : > { %2355 = dma.done.wait (%p4867_p6), [#allocation6], 32   ;;  %p4868_p7 = pmov %p4867_p6 }
  0x81   : > { %p4869_p4 = pmov %p4867_p6 }
  0x82   : > { %2357 = vsyncadd (%p4868_p7), [#allocation6], 4294967264 }
  0x83   : > { %2359 = dma.done.wait (%p4869_p4), [#allocation7], 16   ;;  %p4870_p1 = pmov %p4869_p4 }
  0x85   : > { %2361 = vsyncadd (%p4870_p1), [#allocation7], 4294967280  ;;  %p4871_p2 = pmov %p4870_p1 }
  0x86   : > { %p4872_p11 = pmov %p4870_p1 }
  0x87   : > { %2363 = dma.done.wait (%p4871_p2), [#allocation10], 32  }
  0x88   : > { %2365 = vsyncadd (%p4872_p11), [#allocation10], 4294967264  ;;  %s2623_s29 = sand.u32 1, %s2380_s19   ;;  %p4874_p8 = scmp.ne.s32.totalorder %s4851_s24, 0 }
  0x89   : > { %4873 = sst [smem:[#allocation28_spill]] %s2623_s29  ;;  %s4627_s30 = sshll.u32 %s2623_s29, 6 }
  0x8a   : > { %s262_s6 = scalar_lea.sflag [#allocation4], %s2623_s29  ;;  %s2629_s9 = scalar_lea.vmem [#allocation12], %s4627_s30 }
  0x8b   : > { %2367 = dma.done.wait (%p4874_p8), %s262_s6, 1024  }
  0x8c   : > { %2369 = vsyncadd (%p4874_p8), %s262_s6, 4294966272 }
  0x8d   : > { %270 = sfence }
  0x8e   : > { %s2635_s10 = sld [smem:[#allocation3]]  ;;  %v469_v0 = vlaneseq  ;;  %v492_v1 = vld [vmem:[%s2629_s9] sm:$0xff]  ;;  %vm500_vm0 = vcmask 130048   ;;  %v493_v2 = vld [vmem:[%s2629_s9 + $0x8] sm:$0xff]  ;;  %s2639_s14 = sld [smem:[#allocation3 + $0x1]]  ;;  %v494_v3 = vld [vmem:[%s2629_s9 + $0x10] sm:$0xff] }
  0x8f   : > { %s2641_s15 = sld [smem:[#allocation3 + $0x2]]  ;;  %501 = vst.msk [vmem:[#allocation2] sm:$0xff] %vm500_vm0, %v492_v1  ;;  %502 = vst.msk [vmem:[#allocation2 + $0x8] sm:$0xff] %vm500_vm0, %v493_v2  ;;  %v495_v4 = vld [vmem:[%s2629_s9 + $0x18] sm:$0xff]  ;;  %s2647_s24 = sld [smem:[#allocation3 + $0x3]]  ;;  %v496_v7 = vld [vmem:[%s2629_s9 + $0x20] sm:$0xff] }
  0x90   : > { %s2649_s23 = sld [smem:[#allocation3 + $0x4]]  ;;  %v470_v5 = vand.u32 127, %v469_v0  ;;  %v2651_v6 = vshrl.u32 %v469_v0, 7  ;;  %503 = vst.msk [vmem:[#allocation2 + $0x10] sm:$0xff] %vm500_vm0, %v494_v3  ;;  %504 = vst.msk [vmem:[#allocation2 + $0x18] sm:$0xff] %vm500_vm0, %v495_v4  ;;  %s2655_s11 = sld [smem:[#allocation3 + $0x5]] }
  0x91   : > { %s2657_s17 = sld [smem:[#allocation3 + $0x6]]  ;;  %v497_v8 = vld [vmem:[%s2629_s9 + $0x28] sm:$0xff]  ;;  %s2661_s26 = sld [smem:[#allocation3 + $0x7]]  ;;  %505 = vst.msk [vmem:[#allocation2 + $0x20] sm:$0xff] %vm500_vm0, %v496_v7  ;;  %v498_v11 = vld [vmem:[%s2629_s9 + $0x30] sm:$0xff]  ;;  %v4889_v12 = vmov 0 }
  0x92   : > { %s2663_s27 = sld [smem:[#allocation3 + $0x8]]  ;;  %v2666_v9 = vadd.s32 8, %v2651_v6  ;;  %v478_v10 = vand.u32 15, %v470_v5  ;;  %506 = vst.msk [vmem:[#allocation2 + $0x28] sm:$0xff] %vm500_vm0, %v497_v8  ;;  %s2670_s28 = sld [smem:[#allocation3 + $0x9]]  ;;  %vm488_vm1 = vcmp.eq.s32.totalorder %v2651_v6, 0 }
  0x93   : > { %s2672_s12 = sld [smem:[#allocation3 + $0xa]]  ;;  %s2676_s13 = sld [smem:[#allocation3 + $0xb]]  ;;  %v4892_v13 = vmov 0  ;;  %507 = vst.msk [vmem:[#allocation2 + $0x30] sm:$0xff] %vm500_vm0, %v498_v11  ;;  %v499_v14 = vld [vmem:[%s2629_s9 + $0x38] sm:$0xff] }
  0x94   : > { %4875 = sst [smem:[#allocation29_spill]] %s2635_s10  ;;  %4884 = vst [vmem:[#allocation38_spill] sm:$0xff] %v2666_v9  ;;  %s2678_s6 = sld [smem:[#allocation3 + $0xc]]  ;;  %vm2680_vm2 = vcmp.eq.s32.totalorder %v478_v10, 0  ;;  %vm2684_vm3 = vcmp.eq.s32.totalorder %v478_v10, 15  ;;  %vm491_vm4 = vcmp.eq.s32.totalorder %v2666_v9, 15 }
  0x95   : > { %4876 = sst [smem:[#allocation30_spill]] %s2639_s14  ;;  %v4890_v12 = vsel %vm2680_vm2, 4294967295, %v4889_v12  ;;  %v4893_v13 = vsel %vm2684_vm3, 4294967295, %v4892_v13  ;;  %s2689_s30 = sld [smem:[#allocation3 + $0xd]]  ;;  %508 = vst.msk [vmem:[#allocation2 + $0x38] sm:$0xff] %vm500_vm0, %v499_v14 }
  0x96   : > { %4877 = sst [smem:[#allocation31_spill]] %s2641_s15  ;;  %4891 = vst [vmem:[#allocation43_spill] sm:$0xff] %v4890_v12  ;;  %4894 = vst [vmem:[#allocation44_spill] sm:$0xff] %v4893_v13  ;;  %s2691_s0 = sld [smem:[#allocation3 + $0xe]] }
  0x97   : > { %4878 = sst [smem:[#allocation32_spill]] %s2647_s24  ;;  %s2695_s1 = sld [smem:[#allocation3 + $0xf]] }
  0x98   : > { %4879 = sst [smem:[#allocation33_spill]] %s2649_s23  ;;  %s2697_s2 = sld [smem:[#allocation3 + $0x10]] }
  0x99   : > { %4880 = sst [smem:[#allocation34_spill]] %s2655_s11  ;;  %s2700_s3 = sld [smem:[#allocation3 + $0x11]] }
  0x9a   : > { %4881 = sst [smem:[#allocation35_spill]] %s2657_s17  ;;  %s2702_s4 = sld [smem:[#allocation3 + $0x12]] }
  0x9b   : > { %4882 = sst [smem:[#allocation36_spill]] %s2661_s26  ;;  %s2704_s8 = sld [smem:[#allocation3 + $0x13]] }
  0x9c   : > { %4883 = sst [smem:[#allocation37_spill]] %s2663_s27  ;;  %s2706_s20 = sld [smem:[#allocation3 + $0x14]] }
  0x9d   : > { %4885 = sst [smem:[#allocation39_spill]] %s2670_s28  ;;  %s2708_s19 = sld [smem:[#allocation3 + $0x15]] }
  0x9e   : > { %4886 = sst [smem:[#allocation40_spill]] %s2672_s12  ;;  %s2710_s7 = sld [smem:[#allocation3 + $0x16]] }
  0x9f   : > { %4887 = sst [smem:[#allocation41_spill]] %s2676_s13  ;;  %s2712_s21 = sld [smem:[#allocation3 + $0x17]] }
  0xa0   : > { %4888 = sst [smem:[#allocation42_spill]] %s2678_s6  ;;  %s2714_s9 = sld [smem:[#allocation3 + $0x18]] }
  0xa1   : > { %4895 = sst [smem:[#allocation45_spill]] %s2689_s30  ;;  %s2716_s25 = sld [smem:[#allocation3 + $0x19]] }
  0xa2   : > { %4896 = sst [smem:[#allocation46_spill]] %s2691_s0  ;;  %s2718_s18 = sld [smem:[#allocation3 + $0x1a]] }
  0xa3   : > { %4897 = sst [smem:[#allocation47_spill]] %s2695_s1  ;;  %s2720_s5 = sld [smem:[#allocation3 + $0x1b]] }
  0xa4   : > { %4898 = sst [smem:[#allocation48_spill]] %s2697_s2  ;;  %s2722_s16 = sld [smem:[#allocation3 + $0x1c]] }
  0xa5   : > { %4899 = sst [smem:[#allocation49_spill]] %s2700_s3  ;;  %s2724_s22 = sld [smem:[#allocation3 + $0x1d]] }
  0xa6   : > { %4900 = sst [smem:[#allocation50_spill]] %s2702_s4  ;;  %s2730_s4 = sld [smem:[#allocation3 + $0x20]] }
  0xa7   : > { %4901 = sst [smem:[#allocation51_spill]] %s2704_s8  ;;  %s2726_s8 = sld [smem:[#allocation3 + $0x1e]] }
  0xa8   : > { %4902 = sst [smem:[#allocation52_spill]] %s2706_s20  ;;  %s2728_s20 = sld [smem:[#allocation3 + $0x1f]] }
  0xa9   : > { %4903 = sst [smem:[#allocation53_spill]] %s2708_s19  ;;  %s2762_s3 = sld [smem:[#allocation3 + $0x30]] }
  0xaa   : > { %4904 = sst [smem:[#allocation54_spill]] %s2710_s7  ;;  %s2732_s7 = sld [smem:[#allocation3 + $0x21]] }
  0xab   : > { %4905 = sst [smem:[#allocation55_spill]] %s2712_s21  ;;  %s2734_s21 = sld [smem:[#allocation3 + $0x22]] }
  0xac   : > { %4906 = sst [smem:[#allocation56_spill]] %s2714_s9  ;;  %s2736_s9 = sld [smem:[#allocation3 + $0x23]] }
  0xad   : > { %4907 = sst [smem:[#allocation57_spill]] %s2716_s25  ;;  %s2738_s25 = sld [smem:[#allocation3 + $0x24]] }
  0xae   : > { %4908 = sst [smem:[#allocation58_spill]] %s2718_s18  ;;  %s2740_s18 = sld [smem:[#allocation3 + $0x25]] }
  0xaf   : > { %4909 = sst [smem:[#allocation59_spill]] %s2720_s5  ;;  %s2742_s5 = sld [smem:[#allocation3 + $0x26]] }
  0xb0   : > { %4910 = sst [smem:[#allocation60_spill]] %s2722_s16  ;;  %s2744_s16 = sld [smem:[#allocation3 + $0x27]] }
  0xb1   : > { %4911 = sst [smem:[#allocation61_spill]] %s2724_s22  ;;  %s2746_s22 = sld [smem:[#allocation3 + $0x28]] }
  0xb2   : > { %4912 = sst [smem:[#allocation62_spill]] %s2726_s8  ;;  %s2748_s8 = sld [smem:[#allocation3 + $0x29]] }
  0xb3   : > { %4913 = sst [smem:[#allocation63_spill]] %s2728_s20  ;;  %s2750_s20 = sld [smem:[#allocation3 + $0x2a]] }
  0xb4   : > { %4914 = sst [smem:[#allocation64_spill]] %s2730_s4  ;;  %s2752_s4 = sld [smem:[#allocation3 + $0x2b]] }
  0xb5   : > { %4915 = sst [smem:[#allocation65_spill]] %s2732_s7  ;;  %s2754_s7 = sld [smem:[#allocation3 + $0x2c]] }
  0xb6   : > { %4916 = sst [smem:[#allocation66_spill]] %s2734_s21  ;;  %s2756_s21 = sld [smem:[#allocation3 + $0x2d]] }
  0xb7   : > { %4917 = sst [smem:[#allocation67_spill]] %s2736_s9  ;;  %s2758_s9 = sld [smem:[#allocation3 + $0x2e]] }
  0xb8   : > { %4918 = sst [smem:[#allocation68_spill]] %s2738_s25  ;;  %s2760_s19 = sld [smem:[#allocation3 + $0x2f]] }
  0xb9   : > { %4919 = sst [smem:[#allocation69_spill]] %s2740_s18  ;;  %s2764_s13 = sld [smem:[#allocation3 + $0x31]] }
  0xba   : > { %4920 = sst [smem:[#allocation70_spill]] %s2742_s5  ;;  %s2766_s2 = sld [smem:[#allocation3 + $0x32]] }
  0xbb   : > { %4921 = sst [smem:[#allocation71_spill]] %s2744_s16  ;;  %s2768_s30 = sld [smem:[#allocation3 + $0x33]] }
  0xbc   : > { %4922 = sst [smem:[#allocation72_spill]] %s2746_s22  ;;  %s2770_s1 = sld [smem:[#allocation3 + $0x34]] }
  0xbd   : > { %4923 = sst [smem:[#allocation73_spill]] %s2748_s8  ;;  %s2772_s12 = sld [smem:[#allocation3 + $0x35]] }
  0xbe   : > { %4924 = sst [smem:[#allocation74_spill]] %s2750_s20  ;;  %s2774_s28 = sld [smem:[#allocation3 + $0x36]] }
  0xbf   : > { %4925 = sst [smem:[#allocation75_spill]] %s2752_s4  ;;  %s2776_s0 = sld [smem:[#allocation3 + $0x37]] }
  0xc0   : > { %4926 = sst [smem:[#allocation76_spill]] %s2754_s7  ;;  %s2832_s6 = sld [smem:[#allocation3 + $0x53]] }
  0xc1   : > { %4927 = sst [smem:[#allocation77_spill]] %s2756_s21  ;;  %s2778_s21 = sld [smem:[#allocation3 + $0x38]] }
  0xc2   : > { %4928 = sst [smem:[#allocation78_spill]] %s2758_s9  ;;  %s2780_s9 = sld [smem:[#allocation3 + $0x39]] }
  0xc3   : > { %4929 = sst [smem:[#allocation79_spill]] %s2760_s19  ;;  %s2782_s19 = sld [smem:[#allocation3 + $0x3a]] }
  0xc4   : > { %4930 = sst [smem:[#allocation80_spill]] %s2762_s3  ;;  %s2784_s3 = sld [smem:[#allocation3 + $0x3b]] }
  0xc5   : > { %4931 = sst [smem:[#allocation81_spill]] %s2764_s13  ;;  %s2786_s13 = sld [smem:[#allocation3 + $0x3c]] }
  0xc6   : > { %4932 = sst [smem:[#allocation82_spill]] %s2766_s2  ;;  %s2788_s2 = sld [smem:[#allocation3 + $0x3d]] }
  0xc7   : > { %4933 = sst [smem:[#allocation83_spill]] %s2768_s30  ;;  %s2790_s30 = sld [smem:[#allocation3 + $0x3e]] }
  0xc8   : > { %4934 = sst [smem:[#allocation84_spill]] %s2770_s1  ;;  %s2792_s1 = sld [smem:[#allocation3 + $0x3f]] }
  0xc9   : > { %4935 = sst [smem:[#allocation85_spill]] %s2772_s12  ;;  %s2794_s12 = sld [smem:[#allocation3 + $0x40]] }
  0xca   : > { %4936 = sst [smem:[#allocation86_spill]] %s2774_s28  ;;  %s2796_s28 = sld [smem:[#allocation3 + $0x41]] }
  0xcb   : > { %4937 = sst [smem:[#allocation87_spill]] %s2776_s0  ;;  %s2798_s0 = sld [smem:[#allocation3 + $0x42]] }
  0xcc   : > { %4938 = sst [smem:[#allocation88_spill]] %s2778_s21  ;;  %s2800_s21 = sld [smem:[#allocation3 + $0x43]] }
  0xcd   : > { %4939 = sst [smem:[#allocation89_spill]] %s2780_s9  ;;  %s2802_s9 = sld [smem:[#allocation3 + $0x44]] }
  0xce   : > { %4940 = sst [smem:[#allocation90_spill]] %s2782_s19  ;;  %s2804_s19 = sld [smem:[#allocation3 + $0x45]] }
  0xcf   : > { %4941 = sst [smem:[#allocation91_spill]] %s2784_s3  ;;  %s2806_s3 = sld [smem:[#allocation3 + $0x46]] }
  0xd0   : > { %4942 = sst [smem:[#allocation92_spill]] %s2786_s13  ;;  %s2808_s13 = sld [smem:[#allocation3 + $0x47]] }
  0xd1   : > { %4943 = sst [smem:[#allocation93_spill]] %s2788_s2  ;;  %s2810_s2 = sld [smem:[#allocation3 + $0x48]] }
  0xd2   : > { %4944 = sst [smem:[#allocation94_spill]] %s2790_s30  ;;  %s2812_s30 = sld [smem:[#allocation3 + $0x49]] }
  0xd3   : > { %4945 = sst [smem:[#allocation95_spill]] %s2792_s1  ;;  %s2814_s1 = sld [smem:[#allocation3 + $0x4a]] }
  0xd4   : > { %4946 = sst [smem:[#allocation96_spill]] %s2794_s12  ;;  %s2816_s12 = sld [smem:[#allocation3 + $0x4b]] }
  0xd5   : > { %4947 = sst [smem:[#allocation97_spill]] %s2796_s28  ;;  %s2818_s28 = sld [smem:[#allocation3 + $0x4c]] }
  0xd6   : > { %4948 = sst [smem:[#allocation98_spill]] %s2798_s0  ;;  %s2820_s0 = sld [smem:[#allocation3 + $0x4d]] }
  0xd7   : > { %4949 = sst [smem:[#allocation99_spill]] %s2800_s21  ;;  %s2822_s21 = sld [smem:[#allocation3 + $0x4e]] }
  0xd8   : > { %4950 = sst [smem:[#allocation100_spill]] %s2802_s9  ;;  %s2824_s9 = sld [smem:[#allocation3 + $0x4f]] }
  0xd9   : > { %4951 = sst [smem:[#allocation101_spill]] %s2804_s19  ;;  %s2826_s19 = sld [smem:[#allocation3 + $0x50]] }
  0xda   : > { %4952 = sst [smem:[#allocation102_spill]] %s2806_s3  ;;  %s2828_s3 = sld [smem:[#allocation3 + $0x51]] }
  0xdb   : > { %4953 = sst [smem:[#allocation103_spill]] %s2808_s13  ;;  %s2830_s13 = sld [smem:[#allocation3 + $0x52]] }
  0xdc   : > { %4954 = sst [smem:[#allocation104_spill]] %s2810_s2  ;;  %s2834_s7 = sld [smem:[#allocation3 + $0x54]] }
  0xdd   : > { %4955 = sst [smem:[#allocation105_spill]] %s2812_s30  ;;  %s2836_s27 = sld [smem:[#allocation3 + $0x55]] }
  0xde   : > { %4956 = sst [smem:[#allocation106_spill]] %s2814_s1  ;;  %s2838_s1 = sld [smem:[#allocation3 + $0x56]] }
  0xdf   : > { %4957 = sst [smem:[#allocation107_spill]] %s2816_s12  ;;  %s2840_s5 = sld [smem:[#allocation3 + $0x57]] }
  0xe0   : > { %4958 = sst [smem:[#allocation108_spill]] %s2818_s28  ;;  %s2842_s15 = sld [smem:[#allocation3 + $0x58]] }
  0xe1   : > { %4959 = sst [smem:[#allocation109_spill]] %s2820_s0  ;;  %s2844_s4 = sld [smem:[#allocation3 + $0x59]] }
  0xe2   : > { %4960 = sst [smem:[#allocation110_spill]] %s2822_s21  ;;  %s2904_s26 = sld [smem:[#allocation3 + $0x77]] }
  0xe3   : > { %4961 = sst [smem:[#allocation111_spill]] %s2824_s9  ;;  %s2846_s9 = sld [smem:[#allocation3 + $0x5a]] }
  0xe4   : > { %4962 = sst [smem:[#allocation112_spill]] %s2826_s19  ;;  %s2848_s19 = sld [smem:[#allocation3 + $0x5b]] }
  0xe5   : > { %4963 = sst [smem:[#allocation113_spill]] %s2828_s3  ;;  %s2850_s3 = sld [smem:[#allocation3 + $0x5c]] }
  0xe6   : > { %4964 = sst [smem:[#allocation114_spill]] %s2830_s13  ;;  %s2852_s13 = sld [smem:[#allocation3 + $0x5d]] }
  0xe7   : > { %4965 = sst [smem:[#allocation115_spill]] %s2832_s6  ;;  %s2854_s6 = sld [smem:[#allocation3 + $0x5e]] }
  0xe8   : > { %4966 = sst [smem:[#allocation116_spill]] %s2834_s7  ;;  %s2856_s7 = sld [smem:[#allocation3 + $0x5f]] }
  0xe9   : > { %4967 = sst [smem:[#allocation117_spill]] %s2836_s27  ;;  %s2858_s27 = sld [smem:[#allocation3 + $0x60]] }
  0xea   : > { %4968 = sst [smem:[#allocation118_spill]] %s2838_s1  ;;  %s2860_s1 = sld [smem:[#allocation3 + $0x61]] }
  0xeb   : > { %4969 = sst [smem:[#allocation119_spill]] %s2840_s5  ;;  %s2862_s5 = sld [smem:[#allocation3 + $0x62]] }
  0xec   : > { %4970 = sst [smem:[#allocation120_spill]] %s2842_s15  ;;  %s2864_s15 = sld [smem:[#allocation3 + $0x63]] }
  0xed   : > { %4971 = sst [smem:[#allocation121_spill]] %s2844_s4  ;;  %s2866_s4 = sld [smem:[#allocation3 + $0x64]] }
  0xee   : > { %4972 = sst [smem:[#allocation122_spill]] %s2846_s9  ;;  %s2868_s9 = sld [smem:[#allocation3 + $0x65]] }
  0xef   : > { %4973 = sst [smem:[#allocation123_spill]] %s2848_s19  ;;  %s2870_s19 = sld [smem:[#allocation3 + $0x66]] }
  0xf0   : > { %4974 = sst [smem:[#allocation124_spill]] %s2850_s3  ;;  %s2872_s3 = sld [smem:[#allocation3 + $0x67]] }
  0xf1   : > { %4975 = sst [smem:[#allocation125_spill]] %s2852_s13  ;;  %s2874_s13 = sld [smem:[#allocation3 + $0x68]] }
  0xf2   : > { %4976 = sst [smem:[#allocation126_spill]] %s2854_s6  ;;  %s2876_s6 = sld [smem:[#allocation3 + $0x69]] }
  0xf3   : > { %4977 = sst [smem:[#allocation127_spill]] %s2856_s7  ;;  %s2878_s7 = sld [smem:[#allocation3 + $0x6a]] }
  0xf4   : > { %4978 = sst [smem:[#allocation128_spill]] %s2858_s27  ;;  %s2880_s27 = sld [smem:[#allocation3 + $0x6b]] }
  0xf5   : > { %4979 = sst [smem:[#allocation129_spill]] %s2860_s1  ;;  %s2882_s1 = sld [smem:[#allocation3 + $0x6c]] }
  0xf6   : > { %4980 = sst [smem:[#allocation130_spill]] %s2862_s5  ;;  %s2884_s5 = sld [smem:[#allocation3 + $0x6d]] }
  0xf7   : > { %4981 = sst [smem:[#allocation131_spill]] %s2864_s15  ;;  %s2886_s15 = sld [smem:[#allocation3 + $0x6e]] }
  0xf8   : > { %4982 = sst [smem:[#allocation132_spill]] %s2866_s4  ;;  %s2888_s4 = sld [smem:[#allocation3 + $0x6f]] }
  0xf9   : > { %4983 = sst [smem:[#allocation133_spill]] %s2868_s9  ;;  %s2890_s9 = sld [smem:[#allocation3 + $0x70]] }
  0xfa   : > { %4984 = sst [smem:[#allocation134_spill]] %s2870_s19  ;;  %s2892_s19 = sld [smem:[#allocation3 + $0x71]] }
  0xfb   : > { %4985 = sst [smem:[#allocation135_spill]] %s2872_s3  ;;  %s2894_s3 = sld [smem:[#allocation3 + $0x72]] }
  0xfc   : > { %4986 = sst [smem:[#allocation136_spill]] %s2874_s13  ;;  %s2896_s13 = sld [smem:[#allocation3 + $0x73]] }
  0xfd   : > { %4987 = sst [smem:[#allocation137_spill]] %s2876_s6  ;;  %s2898_s6 = sld [smem:[#allocation3 + $0x74]] }
  0xfe   : > { %4988 = sst [smem:[#allocation138_spill]] %s2878_s7  ;;  %s2900_s7 = sld [smem:[#allocation3 + $0x75]] }
  0xff   : > { %4989 = sst [smem:[#allocation139_spill]] %s2880_s27  ;;  %s2902_s27 = sld [smem:[#allocation3 + $0x76]] }
 0x100   : > { %4990 = sst [smem:[#allocation140_spill]] %s2882_s1  ;;  %s2910_s30 = sld [smem:[#allocation3 + $0x7a]] }
 0x101   : > { %4991 = sst [smem:[#allocation141_spill]] %s2884_s5  ;;  %s2906_s5 = sld [smem:[#allocation3 + $0x78]] }
 0x102   : > { %4992 = sst [smem:[#allocation142_spill]] %s2886_s15  ;;  %s2908_s15 = sld [smem:[#allocation3 + $0x79]] }
 0x103   : > { %4993 = sst [smem:[#allocation143_spill]] %s2888_s4  ;;  %s2912_s18 = sld [smem:[#allocation3 + $0x7b]] }
 0x104   : > { %4994 = sst [smem:[#allocation144_spill]] %s2890_s9  ;;  %s2914_s9 = sld [smem:[#allocation3 + $0x7c]] }
 0x105   : > { %4995 = sst [smem:[#allocation145_spill]] %s2892_s19  ;;  %s2916_s14 = sld [smem:[#allocation3 + $0x7d]] }
 0x106   : > { %4996 = sst [smem:[#allocation146_spill]] %s2894_s3 }
 0x107   : > { %4997 = sst [smem:[#allocation147_spill]] %s2896_s13  ;;  %s2918_s13 = sld [smem:[#allocation3 + $0x7e]] }
 0x108   : > { %4998 = sst [smem:[#allocation148_spill]] %s2898_s6  ;;  %s2920_s6 = sld [smem:[#allocation3 + $0x7f]] }
 0x109   : > { %4999 = sst [smem:[#allocation149_spill]] %s2900_s7  ;;  %s2922_s7 = sld [smem:[#allocation3 + $0x80]] }
 0x10a   : > { %5000 = sst [smem:[#allocation150_spill]] %s2902_s27  ;;  %s2924_s27 = sld [smem:[#allocation3 + $0x81]] }
 0x10b   : > { %5001 = sst [smem:[#allocation151_spill]] %s2904_s26  ;;  %s2926_s26 = sld [smem:[#allocation3 + $0x82]] }
 0x10c   : > { %5002 = sst [smem:[#allocation152_spill]] %s2906_s5  ;;  %s2928_s5 = sld [smem:[#allocation3 + $0x83]] }
 0x10d   : > { %5003 = sst [smem:[#allocation153_spill]] %s2908_s15  ;;  %s2930_s15 = sld [smem:[#allocation3 + $0x84]] }
 0x10e   : > { %5004 = sst [smem:[#allocation154_spill]] %s2910_s30  ;;  %s2932_s30 = sld [smem:[#allocation3 + $0x85]] }
 0x10f   : > { %5005 = sst [smem:[#allocation155_spill]] %s2912_s18  ;;  %s2934_s18 = sld [smem:[#allocation3 + $0x86]] }
 0x110   : > { %5006 = sst [smem:[#allocation156_spill]] %s2914_s9  ;;  %s2936_s9 = sld [smem:[#allocation3 + $0x87]] }
 0x111   : > { %5007 = sst [smem:[#allocation157_spill]] %s2916_s14  ;;  %s2938_s14 = sld [smem:[#allocation3 + $0x88]] }
 0x112   : > { %5008 = sst [smem:[#allocation158_spill]] %s2918_s13  ;;  %s2940_s13 = sld [smem:[#allocation3 + $0x89]] }
 0x113   : > { %5009 = sst [smem:[#allocation159_spill]] %s2920_s6  ;;  %s2942_s6 = sld [smem:[#allocation3 + $0x8a]] }
 0x114   : > { %5010 = sst [smem:[#allocation160_spill]] %s2922_s7  ;;  %s2944_s7 = sld [smem:[#allocation3 + $0x8b]] }
 0x115   : > { %5011 = sst [smem:[#allocation161_spill]] %s2924_s27  ;;  %s2946_s27 = sld [smem:[#allocation3 + $0x8c]] }
 0x116   : > { %5012 = sst [smem:[#allocation162_spill]] %s2926_s26  ;;  %s2948_s26 = sld [smem:[#allocation3 + $0x8d]] }
 0x117   : > { %5013 = sst [smem:[#allocation163_spill]] %s2928_s5  ;;  %s2950_s5 = sld [smem:[#allocation3 + $0x8e]] }
 0x118   : > { %5014 = sst [smem:[#allocation164_spill]] %s2930_s15  ;;  %s2952_s15 = sld [smem:[#allocation3 + $0x8f]] }
 0x119   : > { %5015 = sst [smem:[#allocation165_spill]] %s2932_s30  ;;  %s2954_s30 = sld [smem:[#allocation8]] }
 0x11a   : > { %5016 = sst [smem:[#allocation166_spill]] %s2934_s18  ;;  %s2956_s18 = sld [smem:[#allocation8 + $0x1]] }
 0x11b   : > { %5017 = sst [smem:[#allocation167_spill]] %s2936_s9  ;;  %s2958_s9 = sld [smem:[#allocation8 + $0x2]] }
 0x11c   : > { %5018 = sst [smem:[#allocation168_spill]] %s2938_s14  ;;  %s2960_s14 = sld [smem:[#allocation8 + $0x3]] }
 0x11d   : > { %5019 = sst [smem:[#allocation169_spill]] %s2940_s13  ;;  %s2962_s13 = sld [smem:[#allocation8 + $0x4]] }
 0x11e   : > { %5020 = sst [smem:[#allocation170_spill]] %s2942_s6  ;;  %s2964_s6 = sld [smem:[#allocation8 + $0x5]] }
 0x11f   : > { %5021 = sst [smem:[#allocation171_spill]] %s2944_s7  ;;  %s2966_s7 = sld [smem:[#allocation8 + $0x6]] }
 0x120   : > { %5022 = sst [smem:[#allocation172_spill]] %s2946_s27  ;;  %s2968_s27 = sld [smem:[#allocation8 + $0x7]] }
 0x121   : > { %5023 = sst [smem:[#allocation173_spill]] %s2948_s26  ;;  %s2970_s26 = sld [smem:[#allocation8 + $0x8]] }
 0x122   : > { %5024 = sst [smem:[#allocation174_spill]] %s2950_s5  ;;  %s2972_s5 = sld [smem:[#allocation8 + $0x9]] }
 0x123   : > { %5025 = sst [smem:[#allocation175_spill]] %s2952_s15  ;;  %s2974_s15 = sld [smem:[#allocation8 + $0xa]] }
 0x124   : > { %5026 = sst [smem:[#allocation176_spill]] %s2954_s30  ;;  %s2976_s30 = sld [smem:[#allocation8 + $0xb]] }
 0x125   : > { %5027 = sst [smem:[#allocation177_spill]] %s2956_s18  ;;  %s2978_s18 = sld [smem:[#allocation8 + $0xc]] }
 0x126   : > { %5028 = sst [smem:[#allocation178_spill]] %s2958_s9  ;;  %s2980_s9 = sld [smem:[#allocation8 + $0xd]] }
 0x127   : > { %5029 = sst [smem:[#allocation179_spill]] %s2960_s14  ;;  %s2982_s14 = sld [smem:[#allocation8 + $0xe]] }
 0x128   : > { %5030 = sst [smem:[#allocation180_spill]] %s2962_s13  ;;  %s2984_s13 = sld [smem:[#allocation8 + $0xf]] }
 0x129   : > { %5031 = sst [smem:[#allocation181_spill]] %s2964_s6  ;;  %s2986_s6 = sld [smem:[#allocation9]] }
 0x12a   : > { %5032 = sst [smem:[#allocation182_spill]] %s2966_s7  ;;  %s2990_s7 = sld [smem:[#allocation9 + $0x2]] }
 0x12b   : > { %5033 = sst [smem:[#allocation183_spill]] %s2968_s27 }
 0x12c   : > { %5034 = sst [smem:[#allocation184_spill]] %s2970_s26  ;;  %s2988_s27 = sld [smem:[#allocation9 + $0x1]] }
 0x12d   : > { %5035 = sst [smem:[#allocation185_spill]] %s2972_s5  ;;  %s5049_s5 = sshll.u32 %s2623_s29, 6 }
 0x12e   : > { %5036 = sst [smem:[#allocation186_spill]] %s2974_s15  ;;  %s2992_s15 = sld [smem:[#allocation9 + $0x3]] }
 0x12f   : > { %5037 = sst [smem:[#allocation187_spill]] %s2976_s30  ;;  %s2994_s30 = sld [smem:[#allocation11]] }
 0x130   : > { %5038 = sst [smem:[#allocation188_spill]] %s2978_s18  ;;  %s3012_s18 = scalar_lea.vmem [#allocation13], %s5049_s5 }
 0x131   : > { %5039 = sst [smem:[#allocation189_spill]] %s2980_s9  ;;  %s2996_s9 = sld [smem:[#allocation11 + $0x1]] }
 0x132   : > { %5040 = sst [smem:[#allocation190_spill]] %s2982_s14  ;;  %s3000_s14 = sld [smem:[#allocation11 + $0x3]] }
 0x133   : > { %5041 = sst [smem:[#allocation191_spill]] %s2984_s13  ;;  %s2998_s13 = sld [smem:[#allocation11 + $0x2]] }
 0x134   : > { %5042 = sst [smem:[#allocation192_spill]] %s2986_s6  ;;  %s3014_s26 = smov 0  }
 0x135   : > { %5043 = sst [smem:[#allocation193_spill]] %s2988_s27 }
 0x136   : > { %5044 = sst [smem:[#allocation194_spill]] %s2990_s7 }
 0x137   : > { %5045 = sst [smem:[#allocation195_spill]] %s2992_s15 }
 0x138   : > { %5046 = sst [smem:[#allocation196_spill]] %s2996_s9 }
 0x139   : > { %5047 = sst [smem:[#allocation197_spill]] %s2998_s13 }
 0x13a   : > { %5048 = sst [smem:[#allocation198_spill]] %s3000_s14 }
 0x13b   : > { %5050 = sst [smem:[#allocation199_spill]] %s3012_s18 }
 0x13c LB: >> { %s5051_s24 = sld [smem:[#allocation32_spill]]  ;;  %s5052_s11 = sld [smem:[#allocation34_spill]]  ;;  %v3019_v23 = vld [vmem:[#allocation2] sm:$0xff]  ;;  %v3025_v24 = vld [vmem:[#allocation2 + $0x8] sm:$0xff]  ;;  %v3039_v25 = vld [vmem:[#allocation2 + $0x18] sm:$0xff]  ;;  %vm577_vm5 = vcmask 1040384   ;;  %s2392_s26 = sphi %s3014_s26, %s514_s26  }
 0x13d   : >> { %s5056_s16 = sld [smem:[#allocation71_spill]]  ;;  %s5058_s12 = sld [smem:[#allocation107_spill]]  ;;  %v3041_v26 = vld [vmem:[#allocation2 + $0x10] sm:$0xff]  ;;  %v3059_v27 = vld [vmem:[#allocation2 + $0x28] sm:$0xff]  ;;  %v3061_v28 = vld [vmem:[#allocation2 + $0x20] sm:$0xff]  ;;  %vm583_vm6 = vcmask 1046528  }
 0x13e   : >> { %s5057_s4 = sld [smem:[#allocation143_spill]]  ;;  %5059 = sst [smem:[#allocation200_spill]] %s2392_s26  ;;  %v3079_v29 = vld [vmem:[#allocation2 + $0x38] sm:$0xff]  ;;  %v3081_v30 = vld [vmem:[#allocation2 + $0x30] sm:$0xff]  ;;  %v655_v40 = vrot.slane %v3025_v24, 7  ;;  %v663_v41 = vrot.slane %v3025_v24, 1 }
 0x13f   : >> { %s2401_s6 = smov 1   ;;  %s2402_s15 = smov 113   ;;  %v657_v42 = vrot.slane %v3019_v23, 7  ;;  %v662_v43 = vrot.slane %v3019_v23, 1  ;;  %vm551_vm7 = vcmask 7168   ;;  %vm566_vm8 = vcmask 121856  }
 0x140   : >> { %545 = vrot.lane.b32.xlu1 %v3019_v23, %s2401_s6  ;;  %539 = vrot.lane.b32.xlu0 %v3019_v23, %s2402_s15  ;;  %s2403_s5 = smov 127   ;;  %s2404_s29 = smov 15  }
 0x141   : >> { %s5069_s23 = sld [smem:[#allocation33_spill]]  ;;  %s5070_s22 = sld [smem:[#allocation72_spill]]  ;;  %v661_v58 = vsel %vm577_vm5, %v655_v40, %v657_v42  ;;  %v664_v59 = vsel %vm583_vm6, %v662_v43, %v663_v41  ;;  %v658_v5 = vsel %vm577_vm5, %v657_v42, %v655_v40  ;;  %v668_v7 = vsel %vm583_vm6, %v663_v41, %v662_v43 }
 0x142   : >> { %s5071_s28 = sld [smem:[#allocation108_spill]]  ;;  %s5078_s18 = sld [smem:[#allocation141_spill]]  ;;  %v669_v8 = vsel %vm488_vm1, %v664_v59, %v661_v58  ;;  %v672_v18 = vsel %vm491_vm4, %v658_v5, %v668_v7 }
 0x143   : >> { %s5079_s26 = sld [smem:[#allocation36_spill]]  ;;  %s5080_s19 = sld [smem:[#allocation75_spill]] }
 0x144   : >> { %547 = vrot.lane.b32.xlu1 %v3025_v24, %s2401_s6  ;;  %541 = vrot.lane.b32.xlu0 %v3025_v24, %s2402_s15  ;;  %s5081_s7 = sld [smem:[#allocation111_spill]]  ;;  %s5082_s27 = sld [smem:[#allocation147_spill]] }
 0x145   : >> { %s5104_s25 = sld [smem:[#allocation114_spill]]  ;;  %s5105_s10 = sld [smem:[#allocation150_spill]] }
 0x146   : >> { %s5148_s2 = sld [smem:[#allocation53_spill]]  ;;  %s5171_s20 = sld [smem:[#allocation54_spill]] }
 0x147   : >> { %v693_v49 = vstv %s5069_s23  ;;  %v698_v50 = vstv %s5070_s22  ;;  %s5101_s22 = sld [smem:[#allocation40_spill]]  ;;  %s5102_s23 = sld [smem:[#allocation78_spill]] }
 0x148   : >> { %556 = vrot.lane.b32.xlu1 %v3025_v24, %s2403_s5  ;;  %554 = vrot.lane.b32.xlu0 %v3019_v23, %s2403_s5  ;;  %v703_v51 = vstv %s5071_s28  ;;  %v688_v60 = vstv %s5078_s18  ;;  %v3130_v61 = vmul.f32 %v693_v49, %v3025_v24  ;;  %v3133_v62 = vmul.f32 %v698_v50, %v3025_v24  ;;  %s5114_s28 = sld [smem:[#allocation153_spill]]  ;;  %s5163_s18 = sld [smem:[#allocation87_spill]] }
 0x149   : >> { %v3136_v63 = vmul.f32 %v703_v51, %v3025_v24  ;;  %v713_v1 = vstv %s5079_s26  ;;  %v718_v2 = vstv %s5080_s19  ;;  %v3171_v58 = vmul.f32 %v688_v60, %v669_v8  ;;  %s5111_s26 = sld [smem:[#allocation45_spill]]  ;;  %s5172_s3 = sld [smem:[#allocation90_spill]] }
 0x14a   : >> { %v723_v3 = vstv %s5081_s7  ;;  %v728_v4 = vstv %s5082_s27  ;;  %v3173_v52 = vmul.f32 %v688_v60, %v658_v5  ;;  %v3176_v47 = vmul.f32 %v693_v49, %v3019_v23  ;;  %s5115_s27 = sld [smem:[#allocation48_spill]]  ;;  %s5174_s17 = sld [smem:[#allocation162_spill]] }
 0x14b   : >> { %v3179_v7 = vmul.f32 %v698_v50, %v3019_v23  ;;  %v3189_v60 = vmul.f32 %v713_v1, %v672_v18  ;;  %v3191_v49 = vmul.f32 %v718_v2, %v664_v59  ;;  %v950_v50 = vrot.slane %v3039_v25, 7  ;;  %s5176_s19 = sld [smem:[#allocation93_spill]]  ;;  %s5210_s8 = sld [smem:[#allocation170_spill]] }
 0x14c   : >> { %562 = vrot.lane.b32.xlu1 %v3025_v24, %s2404_s29  ;;  %560 = vrot.lane.b32.xlu0 %v3019_v23, %s2404_s29  ;;  %v3203_v48 = vmul.f32 %v728_v4, %v664_v59  ;;  %v3205_v53 = vmul.f32 %v728_v4, %v672_v18  ;;  %v978_v16 = vstv %s5104_s25  ;;  %s5119_s25 = sld [smem:[#allocation120_spill]]  ;;  %s5213_s0 = sld [smem:[#allocation100_spill]] }
 0x14d   : >> { %v968_v11 = vstv %s5101_s22  ;;  %v973_v45 = vstv %s5102_s23  ;;  %s5117_s22 = sld [smem:[#allocation84_spill]]  ;;  %s5162_s23 = sld [smem:[#allocation51_spill]] }
 0x14e   : >> { %v1003_v35 = vstv %s5114_s28  ;;  %s5166_s28 = sld [smem:[#allocation123_spill]]  ;;  %s5214_s7 = sld [smem:[#allocation136_spill]] }
 0x14f   : >> { %v988_v44 = vstv %s5111_s26  ;;  %v3281_v31 = vmul.f32 %v1003_v35, %v3039_v25  ;;  %s5221_s21 = sld [smem:[#allocation188_spill]]  ;;  %s5227_s13 = sld [smem:[#allocation197_spill]] }
 0x150   : >> { %840 = vrot.lane.b32.xlu1 %v3039_v25, %s2402_s15  ;;  %838 = vrot.lane.b32.xlu0 %v3041_v26, %s2402_s15  ;;  %v1008_v34 = vstv %s5115_s27  ;;  %s5206_s27 = sld [smem:[#allocation98_spill]]  ;;  %s5222_s1 = sld [smem:[#allocation172_spill]] }
 0x151   : >> { %5137 = vst [vmem:[#allocation216_spill] sm:$0xff] %v3281_v31  ;;  %s5226_s9 = sld [smem:[#allocation196_spill]]  ;;  %s5228_s14 = sld [smem:[#allocation198_spill]] }
 0x152   : >> { %v1018_v32 = vstv %s5119_s25  ;;  %s5144_s25 = sld [smem:[#allocation121_spill]]  ;;  %s5229_s26 = sld [smem:[#allocation189_spill]] }
 0x153   : >> { %v1013_v33 = vstv %s5117_s22  ;;  %s5220_s22 = sld [smem:[#allocation184_spill]] }
 0x154   : >> { %846 = vrot.lane.b32.xlu1 %v3039_v25, %s2401_s6  ;;  %844 = vrot.lane.b32.xlu0 %v3041_v26, %s2401_s6 }
 0x158   : >> { %854 = vrot.lane.b32.xlu1 %v3039_v25, %s2403_s5  ;;  %852 = vrot.lane.b32.xlu0 %v3041_v26, %s2403_s5 }
 0x15c   : >> { %860 = vrot.lane.b32.xlu1 %v3039_v25, %s2404_s29  ;;  %858 = vrot.lane.b32.xlu0 %v3041_v26, %s2404_s29 }
 0x160   : >> { %1135 = vrot.lane.b32.xlu1 %v3059_v27, %s2402_s15  ;;  %1133 = vrot.lane.b32.xlu0 %v3061_v28, %s2402_s15 }
 0x164   : >> { %1141 = vrot.lane.b32.xlu1 %v3059_v27, %s2401_s6  ;;  %1139 = vrot.lane.b32.xlu0 %v3061_v28, %s2401_s6 }
 0x168   : >> { %1149 = vrot.lane.b32.xlu1 %v3059_v27, %s2403_s5  ;;  %1147 = vrot.lane.b32.xlu0 %v3061_v28, %s2403_s5 }
 0x16c   : >> { %1155 = vrot.lane.b32.xlu1 %v3059_v27, %s2404_s29  ;;  %1153 = vrot.lane.b32.xlu0 %v3061_v28, %s2404_s29 }
 0x170   : >> { %1430 = vrot.lane.b32.xlu1 %v3079_v29, %s2402_s15  ;;  %1428 = vrot.lane.b32.xlu0 %v3081_v30, %s2402_s15  ;;  %s5074_s15 = sld [smem:[#allocation30_spill]] }
 0x174   : >> { %1436 = vrot.lane.b32.xlu1 %v3079_v29, %s2401_s6  ;;  %1434 = vrot.lane.b32.xlu0 %v3081_v30, %s2401_s6  ;;  %s5075_s6 = sld [smem:[#allocation144_spill]] }
 0x176   : >> { %v673_v54 = vstv %s5074_s15  ;;  %s5113_s15 = sld [smem:[#allocation117_spill]] }
 0x177   : >> { %v3159_v17 = vmul.f32 %v673_v54, %v669_v8  ;;  %v3161_v46 = vmul.f32 %v673_v54, %v658_v5  ;;  %v3182_v54 = vmul.f32 %v703_v51, %v3019_v23  ;;  %v952_v51 = vrot.slane %v3041_v26, 7 }
 0x178   : >> { %1444 = vrot.lane.b32.xlu1 %v3079_v29, %s2403_s5  ;;  %1442 = vrot.lane.b32.xlu0 %v3081_v30, %s2403_s5  ;;  %s5076_s5 = sld [smem:[#allocation69_spill]] }
 0x179   : >> { %v953_v14 = vsel %vm577_vm5, %v952_v51, %v950_v50 }
 0x17a   : >> { %v708_v55 = vstv %s5075_s6  ;;  %v3235_v10 = vmul.f32 %v973_v45, %v953_v14  ;;  %s5175_s6 = sld [smem:[#allocation57_spill]] }
 0x17b   : >> { %v3139_v0 = vmul.f32 %v708_v55, %v3025_v24 }
 0x17c   : >> { %1450 = vrot.lane.b32.xlu1 %v3079_v29, %s2404_s29  ;;  %1448 = vrot.lane.b32.xlu0 %v3081_v30, %s2404_s29  ;;  %s5077_s29 = sld [smem:[#allocation105_spill]]  ;;  %5118 = vst [vmem:[#allocation202_spill] sm:$0xff] %v3235_v10  ;;  %v998_v38 = vstv %s5113_s15  ;;  %s5208_s15 = sld [smem:[#allocation134_spill]] }
 0x17e   : >> { %v678_v56 = vstv %s5076_s5  ;;  %s5219_s5 = sld [smem:[#allocation180_spill]] }
 0x17f   : >> { %v3163_v40 = vmul.f32 %v678_v56, %v669_v8  ;;  %v3165_v41 = vmul.f32 %v678_v56, %v658_v5  ;;  %v3185_v56 = vmul.f32 %v708_v55, %v3019_v23  ;;  %v958_v23 = vrot.slane %v3039_v25, 1 }
 0x180   : >> { %v3197_v55 = vmul.f32 %v718_v2, %v672_v18 }
 0x182   : >> { %v683_v57 = vstv %s5077_s29  ;;  %s5112_s29 = sld [smem:[#allocation81_spill]] }
 0x183   : >> { %v3167_v42 = vmul.f32 %v683_v57, %v669_v8  ;;  %v3169_v43 = vmul.f32 %v683_v57, %v658_v5  ;;  %v3187_v57 = vmul.f32 %v713_v1, %v664_v59  ;;  %v957_v5 = vrot.slane %v3041_v26, 1 }
 0x184   : >> { %v3199_v8 = vmul.f32 %v723_v3, %v664_v59  ;;  %v3201_v1 = vmul.f32 %v723_v3, %v672_v18  ;;  %v956_v18 = vsel %vm577_vm5, %v950_v50, %v952_v51  ;;  %v983_v3 = vstv %s5105_s10  ;;  %s5122_s10 = sld [smem:[#allocation156_spill]] }
 0x185   : >> { %v959_v4 = vsel %vm583_vm6, %v957_v5, %v958_v23  ;;  %v963_v2 = vsel %vm583_vm6, %v958_v23, %v957_v5  ;;  %v3233_v51 = vmul.f32 %v968_v11, %v953_v14  ;;  %v3239_v23 = vmul.f32 %v978_v16, %v953_v14 }
 0x186   : >> { %v964_v39 = vsel %vm488_vm1, %v959_v4, %v956_v18  ;;  %v967_v5 = vsel %vm491_vm4, %v953_v14, %v963_v2  ;;  %v3241_v59 = vmul.f32 %v983_v3, %v953_v14  ;;  %v3257_v2 = vmul.f32 %v988_v44, %v3041_v26 }
 0x187   : >> { %5116 = vst [vmem:[#allocation201_spill] sm:$0xff] %v3233_v51  ;;  %5120 = vst [vmem:[#allocation203_spill] sm:$0xff] %v3239_v23  ;;  %v3244_v15 = vmul.f32 %v968_v11, %v964_v39  ;;  %v3246_v18 = vmul.f32 %v973_v45, %v964_v39  ;;  %v3250_v37 = vmul.f32 %v978_v16, %v964_v39 }
 0x188   : >> { %5121 = vst [vmem:[#allocation204_spill] sm:$0xff] %v3241_v59  ;;  %v993_v50 = vstv %s5112_s29  ;;  %v3252_v36 = vmul.f32 %v983_v3, %v964_v39  ;;  %5127 = vst [vmem:[#allocation209_spill] sm:$0xff] %v3257_v2  ;;  %v3260_v14 = vmul.f32 %v988_v44, %v3039_v25  ;;  %v3271_v16 = vmul.f32 %v998_v38, %v3041_v26  ;;  %s5173_s29 = sld [smem:[#allocation126_spill]] }
 0x189   : >> { %5123 = vst [vmem:[#allocation205_spill] sm:$0xff] %v3244_v15  ;;  %5124 = vst [vmem:[#allocation206_spill] sm:$0xff] %v3246_v18  ;;  %v3265_v45 = vmul.f32 %v993_v50, %v3041_v26  ;;  %v3268_v11 = vmul.f32 %v993_v50, %v3039_v25  ;;  %v3275_v3 = vmul.f32 %v998_v38, %v3039_v25 }
 0x18a   : >> { %5125 = vst [vmem:[#allocation207_spill] sm:$0xff] %v3250_v37  ;;  %5126 = vst [vmem:[#allocation208_spill] sm:$0xff] %v3252_v36  ;;  %v1023_v39 = vstv %s5122_s10  ;;  %v3278_v44 = vmul.f32 %v1003_v35, %v3041_v26  ;;  %v3283_v22 = vmul.f32 %v1008_v34, %v959_v4  ;;  %v3285_v50 = vmul.f32 %v1008_v34, %v967_v5  ;;  %s5170_s10 = sld [smem:[#allocation159_spill]] }
 0x18b   : >> { %5128 = vst [vmem:[#allocation210_spill] sm:$0xff] %v3260_v14  ;;  %5130 = vst [vmem:[#allocation211_spill] sm:$0xff] %v3265_v45  ;;  %v3287_v21 = vmul.f32 %v1013_v33, %v959_v4  ;;  %v3289_v38 = vmul.f32 %v1013_v33, %v967_v5  ;;  %v3291_v20 = vmul.f32 %v1018_v32, %v959_v4  ;;  %v1247_v33 = vrot.slane %v3061_v28, 7 }
 0x18c   : >> { %5131 = vst [vmem:[#allocation212_spill] sm:$0xff] %v3268_v11  ;;  %5132 = vst [vmem:[#allocation213_spill] sm:$0xff] %v3271_v16  ;;  %v3293_v19 = vmul.f32 %v1018_v32, %v967_v5  ;;  %v3295_v35 = vmul.f32 %v1023_v39, %v959_v4  ;;  %v1253_v32 = vrot.slane %v3059_v27, 1  ;;  %v1273_v11 = vstv %s5166_s28  ;;  %s5223_s28 = sld [smem:[#allocation177_spill]] }
 0x18d   : >> { %5133 = vst [vmem:[#allocation214_spill] sm:$0xff] %v3275_v3  ;;  %5135 = vst [vmem:[#allocation215_spill] sm:$0xff] %v3278_v44  ;;  %v1263_v44 = vstv %s5162_s23  ;;  %s5184_s23 = sld [smem:[#allocation165_spill]] }
 0x18e   : >> { %5139 = vst [vmem:[#allocation217_spill] sm:$0xff] %v3283_v22  ;;  %5141 = vst [vmem:[#allocation218_spill] sm:$0xff] %v3285_v50  ;;  %v3297_v22 = vmul.f32 %v1023_v39, %v967_v5  ;;  %v1293_v45 = vstv %s5173_s29  ;;  %s5200_s29 = sld [smem:[#allocation130_spill]] }
 0x18f   : >> { %5143 = vst [vmem:[#allocation219_spill] sm:$0xff] %v3287_v21  ;;  %5145 = vst [vmem:[#allocation220_spill] sm:$0xff] %v3289_v38  ;;  %v1245_v21 = vrot.slane %v3059_v27, 7  ;;  %v1288_v38 = vstv %s5172_s3  ;;  %s5224_s3 = sld [smem:[#allocation181_spill]] }
 0x190   : >> { %5147 = vst [vmem:[#allocation221_spill] sm:$0xff] %v3291_v20  ;;  %5149 = vst [vmem:[#allocation222_spill] sm:$0xff] %v3293_v19  ;;  %v1252_v20 = vrot.slane %v3061_v28, 1  ;;  %v1268_v19 = vstv %s5163_s18  ;;  %v1278_v50 = vstv %s5170_s10  ;;  %s5180_s18 = sld [smem:[#allocation129_spill]]  ;;  %s5202_s10 = sld [smem:[#allocation166_spill]] }
 0x191   : >> { %5151 = vst [vmem:[#allocation223_spill] sm:$0xff] %v3295_v35  ;;  %5153 = vst [vmem:[#allocation224_spill] sm:$0xff] %v3297_v22  ;;  %v1251_v5 = vsel %vm577_vm5, %v1245_v21, %v1247_v33  ;;  %v1248_v31 = vsel %vm577_vm5, %v1247_v33, %v1245_v21 }
 0x192   : >> { %v1254_v34 = vsel %vm583_vm6, %v1252_v20, %v1253_v32  ;;  %v1258_v3 = vsel %vm583_vm6, %v1253_v32, %v1252_v20  ;;  %v3339_v21 = vmul.f32 %v1263_v44, %v1248_v31  ;;  %v3341_v33 = vmul.f32 %v1268_v19, %v1248_v31 }
 0x193   : >> { %v1259_v16 = vsel %vm488_vm1, %v1254_v34, %v1251_v5  ;;  %v1262_v20 = vsel %vm491_vm4, %v1248_v31, %v1258_v3  ;;  %v1283_v32 = vstv %s5171_s20  ;;  %v3351_v39 = vmul.f32 %v1273_v11, %v1248_v31  ;;  %s5188_s20 = sld [smem:[#allocation52_spill]] }
 0x194   : >> { %5177 = vst [vmem:[#allocation225_spill] sm:$0xff] %v3339_v21  ;;  %5178 = vst [vmem:[#allocation226_spill] sm:$0xff] %v3341_v33  ;;  %v3344_v35 = vmul.f32 %v1263_v44, %v1259_v16  ;;  %v3346_v5 = vmul.f32 %v1268_v19, %v1259_v16  ;;  %v3348_v4 = vmul.f32 %v1273_v11, %v1259_v16  ;;  %v1298_v3 = vstv %s5174_s17  ;;  %s5225_s17 = sld [smem:[#allocation185_spill]] }
 0x195   : >> { %5183 = vst [vmem:[#allocation230_spill] sm:$0xff] %v3351_v39  ;;  %v3353_v22 = vmul.f32 %v1278_v50, %v1259_v16  ;;  %v3357_v14 = vmul.f32 %v1278_v50, %v1248_v31  ;;  %v3360_v33 = vmul.f32 %v1283_v32, %v3061_v28  ;;  %v1303_v44 = vstv %s5175_s6  ;;  %s5197_s6 = sld [smem:[#allocation58_spill]] }
 0x196   : >> { %5179 = vst [vmem:[#allocation227_spill] sm:$0xff] %v3344_v35  ;;  %5181 = vst [vmem:[#allocation228_spill] sm:$0xff] %v3346_v5  ;;  %v1308_v21 = vstv %s5176_s19  ;;  %v3365_v19 = vmul.f32 %v1283_v32, %v3059_v27  ;;  %v3368_v11 = vmul.f32 %v1288_v38, %v3061_v28  ;;  %v3371_v16 = vmul.f32 %v1288_v38, %v3059_v27  ;;  %s5199_s19 = sld [smem:[#allocation94_spill]] }
 0x197   : >> { %5182 = vst [vmem:[#allocation229_spill] sm:$0xff] %v3348_v4  ;;  %5185 = vst [vmem:[#allocation231_spill] sm:$0xff] %v3353_v22  ;;  %v1313_v22 = vstv %s5180_s18  ;;  %v3375_v31 = vmul.f32 %v1293_v45, %v3061_v28  ;;  %v3378_v50 = vmul.f32 %v1293_v45, %v3059_v27  ;;  %v1318_v32 = vstv %s5184_s23  ;;  %s5212_s23 = sld [smem:[#allocation64_spill]] }
 0x198   : >> { %5186 = vst [vmem:[#allocation232_spill] sm:$0xff] %v3357_v14  ;;  %5187 = vst [vmem:[#allocation233_spill] sm:$0xff] %v3360_v33  ;;  %v3381_v33 = vmul.f32 %v1298_v3, %v3061_v28  ;;  %v3387_v38 = vmul.f32 %v1303_v44, %v1254_v34  ;;  %v3393_v45 = vmul.f32 %v1308_v21, %v1262_v20  ;;  %s5218_s18 = sld [smem:[#allocation176_spill]]  ;;  %v5231_v39 = vstv %s5226_s9  ;;  %s5276_s9 = sld [smem:[#allocation193_spill]] }
 0x199   : >> { %5190 = vst [vmem:[#allocation234_spill] sm:$0xff] %v3365_v19  ;;  %5191 = vst [vmem:[#allocation235_spill] sm:$0xff] %v3368_v11  ;;  %v3385_v11 = vmul.f32 %v1298_v3, %v3059_v27  ;;  %v4754_v3 = vstv %s5221_s21  ;;  %v5232_v4 = vstv %s5227_s13  ;;  %v5235_v35 = vstv %s5228_s14  ;;  %s5272_s14 = sld [smem:[#allocation104_spill]]  ;;  %s5277_s21 = sld [smem:[#allocation140_spill]] }
 0x19a   : >> { %5192 = vst [vmem:[#allocation236_spill] sm:$0xff] %v3371_v16  ;;  %5194 = vst [vmem:[#allocation237_spill] sm:$0xff] %v3375_v31  ;;  %v3389_v16 = vmul.f32 %v1303_v44, %v1262_v20  ;;  %v3391_v31 = vmul.f32 %v1308_v21, %v1254_v34  ;;  %v3403_v44 = vmul.f32 %v1318_v32, %v1262_v20  ;;  %s5275_s13 = sld [smem:[#allocation192_spill]] }
 0x19b   : >> { %5196 = vst [vmem:[#allocation238_spill] sm:$0xff] %v3378_v50  ;;  %5198 = vst [vmem:[#allocation239_spill] sm:$0xff] %v3381_v33  ;;  %v3395_v33 = vmul.f32 %v1313_v22, %v1254_v34  ;;  %v4750_v50 = vstv %s5219_s5  ;;  %s5233_s5 = sld [smem:[#allocation178_spill]] }
 0x19c   : >> { %5201 = vst [vmem:[#allocation240_spill] sm:$0xff] %v3385_v11  ;;  %5203 = vst [vmem:[#allocation241_spill] sm:$0xff] %v3387_v38  ;;  %v3399_v11 = vmul.f32 %v1313_v22, %v1262_v20  ;;  %v3401_v38 = vmul.f32 %v1318_v32, %v1254_v34  ;;  %v524_v32 = vmul.f32 %v4750_v50, %v3025_v24  ;;  %v816_v34 = vstv %s5223_s28  ;;  %s5239_s28 = sld [smem:[#allocation190_spill]] }
 0x19d   : >> { %5205 = vst [vmem:[#allocation242_spill] sm:$0xff] %v3389_v16  ;;  %5207 = vst [vmem:[#allocation243_spill] sm:$0xff] %v3391_v31  ;;  %v534_v16 = vmul.f32 %v4754_v3, %v3025_v24  ;;  %v5230_v22 = vstv %s2994_s30  ;;  %v818_v3 = vmul.f32 %v816_v34, %v3039_v25 }
 0x19e   : >> { %5209 = vst [vmem:[#allocation244_spill] sm:$0xff] %v3393_v45  ;;  %5211 = vst [vmem:[#allocation245_spill] sm:$0xff] %v3395_v33  ;;  %v4748_v33 = vstv %s5218_s18  ;;  %s5236_s18 = sld [smem:[#allocation186_spill]] }
 0x19f   : >> { %5215 = vst [vmem:[#allocation246_spill] sm:$0xff] %v3399_v11  ;;  %5216 = vst [vmem:[#allocation247_spill] sm:$0xff] %v3401_v38  ;;  %v4752_v38 = vstv %s5220_s22  ;;  %v519_v20 = vmul.f32 %v4748_v33, %v3025_v24  ;;  %v826_v11 = vstv %s5225_s17  ;;  %v526_v33 = vadd.f32 %v524_v32, %v5231_v39  ;;  %s5234_s22 = sld [smem:[#allocation182_spill]]  ;;  %s5245_s17 = sld [smem:[#allocation183_spill]] }
 0x1a0   : >> { %5217 = vst [vmem:[#allocation248_spill] sm:$0xff] %v3403_v44  ;;  %v529_v31 = vmul.f32 %v4752_v38, %v3025_v24  ;;  %v821_v44 = vstv %s5224_s3  ;;  %v536_v2 = vadd.f32 %v534_v16, %v5235_v35  ;;  %v3448_v24 = vmul.f32 %v816_v34, %v3041_v26  ;;  %s5241_s3 = sld [smem:[#allocation179_spill]] }
 0x1a1   : >> { %v521_v14 = vadd.f32 %v519_v20, %v5230_v22  ;;  %v3454_v39 = vmul.f32 %v821_v44, %v3041_v26  ;;  %v3459_v35 = vmul.f32 %v826_v11, %v3041_v26  ;;  %v1111_v34 = vstv %s5233_s5  ;;  %s5246_s5 = sld [smem:[#allocation187_spill]] }
 0x1a2   : >> { %v531_v5 = vadd.f32 %v529_v31, %v5232_v4  ;;  %5237 = vst [vmem:[#allocation249_spill] sm:$0xff] %v3448_v24  ;;  %v828_v4 = vmul.f32 %v826_v11, %v3039_v25  ;;  %v831_v31 = vstv %s5229_s26  ;;  %s5256_s26 = sld [smem:[#allocation109_spill]]  ;;  %v5284_v36 = vstv %s5272_s14  ;;  %s5296_s14 = sld [smem:[#allocation110_spill]] }
 0x1a3   : >> { %5238 = vst [vmem:[#allocation250_spill] sm:$0xff] %v3454_v39  ;;  %v820_v22 = vadd.f32 %v818_v3, %v521_v14  ;;  %5240 = vst [vmem:[#allocation251_spill] sm:$0xff] %v3459_v35  ;;  %v833_v16 = vmul.f32 %v831_v31, %v3039_v25  ;;  %v3469_v14 = vmul.f32 %v1111_v34, %v3061_v28  ;;  %v1126_v3 = vstv %s5239_s28  ;;  %s5267_s28 = sld [smem:[#allocation29_spill]] }
 0x1a4   : >> { %v830_v32 = vadd.f32 %v828_v4, %v531_v5  ;;  %v1121_v59 = vstv %s5236_s18  ;;  %s5255_s18 = sld [smem:[#allocation73_spill]]  ;;  %v5286_v37 = vstv %s5275_s13  ;;  %v5288_v51 = vstv %s5277_s21  ;;  %s5299_s21 = sld [smem:[#allocation146_spill]] }
 0x1a5   : >> { %v1116_v24 = vstv %s5234_s22  ;;  %v835_v39 = vadd.f32 %v833_v16, %v536_v2  ;;  %5243 = vst [vmem:[#allocation253_spill] sm:$0xff] %v3469_v14  ;;  %v1123_v5 = vmul.f32 %v1121_v59, %v3059_v27  ;;  %s5248_s22 = sld [smem:[#allocation191_spill]]  ;;  %v1128_v2 = vmul.f32 %v1126_v3, %v3059_v27  ;;  %s5357_s13 = sld [smem:[#allocation118_spill]] }
 0x1a6   : >> { %v3473_v11 = vmul.f32 %v1116_v24, %v3061_v28  ;;  %v1406_v4 = vstv %s5241_s3  ;;  %s5269_s3 = sld [smem:[#allocation68_spill]] }
 0x1a7   : >> { %v3485_v16 = vadd.f32 %v1123_v5, %v830_v32 }
 0x1a8   : >> { %5244 = vst [vmem:[#allocation254_spill] sm:$0xff] %v3473_v11 }
 0x1a9   : >> { %5250 = vst [vmem:[#allocation257_spill] sm:$0xff] %v3485_v16 }
 0x1b2   : >> { %v546_v21 = vpop.permute.xlu1 %545  ;;  %v540_v45 = vpop.permute.xlu0 %539 }
 0x1b3   : >> { %v552_v19 = vsel %vm551_vm7, %v540_v45, %v546_v21  ;;  %v823_v45 = vmul.f32 %v821_v44, %v3039_v25  ;;  %v3466_v44 = vmul.f32 %v831_v31, %v3041_v26  ;;  %v1118_v25 = vmul.f32 %v1116_v24, %v3059_v27 }
 0x1b4   : >> { %v3479_v26 = vmul.f32 %v1121_v59, %v3061_v28  ;;  %v1408_v24 = vmul.f32 %v1406_v4, %v3079_v29  ;;  %v3494_v59 = vmul.f32 %v1406_v4, %v3081_v30  ;;  %v5261_v29 = vstv %s5057_s4 }
 0x1b5   : >> { %v825_v20 = vadd.f32 %v823_v45, %v526_v33  ;;  %5242 = vst [vmem:[#allocation252_spill] sm:$0xff] %v3466_v44  ;;  %v1113_v33 = vmul.f32 %v1111_v34, %v3059_v27  ;;  %v3488_v34 = vmul.f32 %v1126_v3, %v3061_v28  ;;  %v4755_v27 = vstv %s5245_s17 }
 0x1b6   : >> { %v548_v50 = vpop.permute.xlu1 %547  ;;  %v542_v38 = vpop.permute.xlu0 %541  ;;  %5247 = vst [vmem:[#allocation255_spill] sm:$0xff] %v3479_v26  ;;  %5253 = vst [vmem:[#allocation260_spill] sm:$0xff] %v3494_v59  ;;  %v5280_v44 = vstv %s5267_s28  ;;  %s5293_s28 = sld [smem:[#allocation74_spill]] }
 0x1b7   : >> { %v553_v21 = vsel %vm551_vm7, %v542_v38, %v548_v50  ;;  %v1115_v45 = vadd.f32 %v1113_v33, %v820_v22  ;;  %v3483_v31 = vadd.f32 %v1118_v25, %v825_v20  ;;  %5251 = vst [vmem:[#allocation258_spill] sm:$0xff] %v3488_v34  ;;  %v3491_v33 = vadd.f32 %v1128_v2, %v835_v39 }
 0x1b9   : >> { %5249 = vst [vmem:[#allocation256_spill] sm:$0xff] %v3483_v31  ;;  %5252 = vst [vmem:[#allocation259_spill] sm:$0xff] %v3491_v33  ;;  %v3500_v25 = vadd.f32 %v1408_v24, %v1115_v45  ;;  %v5258_v45 = vstv %s5051_s24 }
 0x1ba   : >> { %v557_v50 = vpop.permute.xlu1 %556  ;;  %v555_v38 = vpop.permute.xlu0 %554 }
 0x1bb   : >> { %5254 = vst [vmem:[#allocation261_spill] sm:$0xff] %v3500_v25  ;;  %v5281_v25 = vstv %s5269_s3  ;;  %s5310_s3 = sld [smem:[#allocation31_spill]] }
 0x1bc   : >> { %v5283_v16 = vmov %v5281_v25 }
 0x1be   : >> { %v563_v11 = vpop.permute.xlu1 %562  ;;  %v561_v22 = vpop.permute.xlu0 %560 }
 0x1bf   : >> { %v568_v32 = vsel %vm566_vm8, %v557_v50, %v563_v11  ;;  %v567_v28 = vsel %vm566_vm8, %v555_v38, %v561_v22  ;;  %v3514_v50 = vmul.f32 %v4755_v27, %v3081_v30  ;;  %v5260_v22 = vstv %s5058_s12 }
 0x1c0   : >> { %v570_v39 = vsel %vm2680_vm2, %v568_v32, %v553_v21  ;;  %v3507_v5 = vsel %vm2684_vm3, %v553_v21, %v568_v32  ;;  %v569_v3 = vsel %vm2680_vm2, %v567_v28, %v552_v19  ;;  %v3520_v4 = vsel %vm2684_vm3, %v552_v19, %v567_v28 }
 0x1c1   : >> { %5257 = vst [vmem:[#allocation262_spill] sm:$0xff] %v3514_v50  ;;  %v574_v38 = vrot.slane %v570_v39, 7  ;;  %v585_v11 = vrot.slane %v570_v39, 1  ;;  %v617_v2 = vmul.f32 %v5258_v45, %v570_v39  ;;  %v5259_v21 = vstv %s5056_s16 }
 0x1c2   : >> { %v622_v24 = vmul.f32 %v5259_v21, %v570_v39  ;;  %v627_v32 = vmul.f32 %v5260_v22, %v570_v39  ;;  %v632_v20 = vmul.f32 %v5261_v29, %v570_v39  ;;  %v5262_v50 = vstv %s5052_s11 }
 0x1c3   : >> { %v3533_v59 = vmul.f32 %v5262_v50, %v3507_v5  ;;  %v5264_v45 = vstv %s5255_s18  ;;  %v5266_v19 = vstv %s5256_s26  ;;  %v578_v21 = vrot.slane %v569_v3, 7 }
 0x1c4   : >> { %v3538_v34 = vmul.f32 %v5264_v45, %v3507_v5  ;;  %v3543_v28 = vmul.f32 %v5266_v19, %v3507_v5  ;;  %v584_v29 = vrot.slane %v569_v3, 1  ;;  %v5270_v39 = vstv %s5051_s24  ;;  %s5375_s24 = sld [smem:[#allocation149_spill]] }
 0x1c5   : >> { %5263 = vst [vmem:[#allocation263_spill] sm:$0xff] %v3533_v59  ;;  %v616_v22 = vmul.f32 %v5270_v39, %v569_v3  ;;  %v5271_v27 = vstv %s5056_s16  ;;  %v5273_v30 = vstv %s5058_s12  ;;  %v5274_v45 = vstv %s5057_s4  ;;  %s5278_s12 = sld [smem:[#allocation194_spill]]  ;;  %s5279_s4 = sld [smem:[#allocation195_spill]] }
 0x1c6   : >> { %5265 = vst [vmem:[#allocation264_spill] sm:$0xff] %v3538_v34  ;;  %5268 = vst [vmem:[#allocation265_spill] sm:$0xff] %v3543_v28  ;;  %v621_v50 = vmul.f32 %v5271_v27, %v569_v3  ;;  %v626_v26 = vmul.f32 %v5273_v30, %v569_v3  ;;  %v631_v14 = vmul.f32 %v5274_v45, %v569_v3  ;;  %s5290_s16 = sld [smem:[#allocation35_spill]] }
 0x1c7   : >> { %v579_v35 = vsel %vm577_vm5, %v578_v21, %v574_v38  ;;  %v582_v39 = vsel %vm577_vm5, %v574_v38, %v578_v21  ;;  %v586_v27 = vsel %vm583_vm6, %v584_v29, %v585_v11  ;;  %v590_v30 = vsel %vm583_vm6, %v585_v11, %v584_v29 }
 0x1c8   : >> { %v591_v3 = vsel %vm488_vm1, %v586_v27, %v582_v39  ;;  %v594_v45 = vsel %vm491_vm4, %v579_v35, %v590_v30  ;;  %v597_v19 = vmul.f32 %v5280_v44, %v579_v35  ;;  %v602_v33 = vmul.f32 %v5281_v25, %v579_v35 }
 0x1c9   : >> { %v5282_v38 = vmov %v5280_v44  ;;  %v601_v31 = vmul.f32 %v5283_v16, %v591_v3  ;;  %v606_v23 = vmul.f32 %v5284_v36, %v591_v3  ;;  %v5285_v11 = vmov %v5284_v36 }
 0x1ca   : >> { %v596_v21 = vmul.f32 %v5282_v38, %v591_v3  ;;  %v607_v29 = vmul.f32 %v5285_v11, %v579_v35  ;;  %v599_v10 = vadd.f32 %v597_v19, %v5286_v37  ;;  %v5287_v39 = vstv %s5276_s9  ;;  %s5336_s9 = sld [smem:[#allocation112_spill]] }
 0x1cb   : >> { %v604_v18 = vadd.f32 %v602_v33, %v5287_v39  ;;  %v611_v15 = vmul.f32 %v5288_v51, %v591_v3  ;;  %v5289_v30 = vmov %v5288_v51  ;;  %v5291_v44 = vmov %v5286_v37 }
 0x1cc   : >> { %v612_v13 = vmul.f32 %v5289_v30, %v579_v35  ;;  %v598_v25 = vadd.f32 %v596_v21, %v5291_v44  ;;  %v5292_v12 = vmov %v5287_v39  ;;  %v5294_v16 = vstv %s5278_s12  ;;  %s5356_s12 = sld [smem:[#allocation82_spill]] }
 0x1cd   : >> { %v603_v38 = vadd.f32 %v601_v31, %v5292_v12  ;;  %v608_v36 = vadd.f32 %v606_v23, %v5294_v16  ;;  %v5295_v28 = vmov %v5294_v16  ;;  %v5297_v37 = vstv %s5279_s4  ;;  %s5331_s4 = sld [smem:[#allocation37_spill]] }
 0x1ce   : >> { %v609_v11 = vadd.f32 %v607_v29, %v5295_v28  ;;  %v613_v33 = vadd.f32 %v611_v15, %v5297_v37  ;;  %v5298_v19 = vmov %v5297_v37  ;;  %v619_v3 = vadd.f32 %v617_v2, %v599_v10 }
 0x1cf   : >> { %v614_v51 = vadd.f32 %v612_v13, %v5298_v19  ;;  %v624_v35 = vadd.f32 %v622_v24, %v604_v18  ;;  %v618_v39 = vadd.f32 %v616_v22, %v598_v25  ;;  %v623_v21 = vadd.f32 %v621_v50, %v603_v38 }
 0x1d0   : >> { %v628_v30 = vadd.f32 %v626_v26, %v608_v36  ;;  %v629_v44 = vadd.f32 %v627_v32, %v609_v11  ;;  %v633_v12 = vadd.f32 %v631_v14, %v613_v33  ;;  %v5300_v34 = vstv %s5290_s16  ;;  %v3611_v14 = vpop.permute.xlu1 %840  ;;  %s5308_s16 = sld [smem:[#allocation145_spill]] }
 0x1d1   : >> { %v634_v31 = vadd.f32 %v632_v20, %v614_v51  ;;  %v636_v23 = vmul.f32 %v5300_v34, %v586_v27  ;;  %v5301_v16 = vmov %v5300_v34  ;;  %v5302_v28 = vstv %s5293_s28  ;;  %v3613_v20 = vpop.permute.xlu0 %838  ;;  %s5311_s28 = sld [smem:[#allocation70_spill]] }
 0x1d2   : >> { %v637_v59 = vmul.f32 %v5301_v16, %v594_v45  ;;  %v641_v29 = vmul.f32 %v5302_v28, %v586_v27  ;;  %v5303_v9 = vmov %v5302_v28  ;;  %v5304_v37 = vstv %s5296_s14  ;;  %s5312_s14 = sld [smem:[#allocation106_spill]] }
 0x1d3   : >> { %v642_v15 = vmul.f32 %v5303_v9, %v594_v45  ;;  %v646_v13 = vmul.f32 %v5304_v37, %v586_v27  ;;  %v5305_v10 = vmov %v5304_v37  ;;  %v638_v18 = vadd.f32 %v636_v23, %v618_v39 }
 0x1d4   : >> { %v647_v2 = vmul.f32 %v5305_v10, %v594_v45  ;;  %v639_v24 = vadd.f32 %v637_v59, %v619_v3  ;;  %v5306_v22 = vstv %s5299_s21  ;;  %v643_v34 = vadd.f32 %v641_v29, %v623_v21  ;;  %s5313_s21 = sld [smem:[#allocation142_spill]] }
 0x1d5   : >> { %v651_v50 = vmul.f32 %v5306_v22, %v586_v27  ;;  %v5307_v26 = vmov %v5306_v22  ;;  %v644_v25 = vadd.f32 %v642_v15, %v624_v35  ;;  %v648_v38 = vadd.f32 %v646_v13, %v628_v30 }
 0x1d6   : >> { %v652_v32 = vmul.f32 %v5307_v26, %v594_v45  ;;  %v649_v36 = vadd.f32 %v647_v2, %v629_v44  ;;  %v676_v33 = vadd.f32 %v3159_v17, %v638_v18  ;;  %v677_v19 = vadd.f32 %v3161_v46, %v639_v24 }
 0x1d7   : >> { %v653_v11 = vadd.f32 %v651_v50, %v633_v12  ;;  %v681_v59 = vadd.f32 %v3163_v40, %v643_v34  ;;  %v682_v27 = vadd.f32 %v3165_v41, %v644_v25  ;;  %v686_v45 = vadd.f32 %v3167_v42, %v648_v38 }
 0x1d8   : >> { %v654_v9 = vadd.f32 %v652_v32, %v634_v31  ;;  %v687_v51 = vadd.f32 %v3169_v43, %v649_v36  ;;  %v696_v39 = vadd.f32 %v3176_v47, %v676_v33  ;;  %v697_v21 = vadd.f32 %v3130_v61, %v677_v19  ;;  %v847_v61 = vpop.permute.xlu1 %846 }
 0x1d9   : >> { %v691_v3 = vadd.f32 %v3171_v58, %v653_v11  ;;  %v701_v17 = vadd.f32 %v3179_v7, %v681_v59  ;;  %v702_v46 = vadd.f32 %v3133_v62, %v682_v27  ;;  %v706_v40 = vadd.f32 %v3182_v54, %v686_v45  ;;  %v3635_v58 = vpop.permute.xlu0 %844 }
 0x1da   : >> { %v692_v35 = vadd.f32 %v3173_v52, %v654_v9  ;;  %v707_v41 = vadd.f32 %v3136_v63, %v687_v51  ;;  %v5309_v42 = vstv %s5308_s16  ;;  %v716_v47 = vadd.f32 %v3187_v57, %v696_v39 }
 0x1db   : >> { %v790_v30 = vmul.f32 %v5309_v42, %v3507_v5  ;;  %v711_v43 = vadd.f32 %v3185_v56, %v691_v3  ;;  %v717_v62 = vadd.f32 %v3189_v60, %v697_v21  ;;  %v721_v63 = vadd.f32 %v3191_v49, %v701_v17 }
 0x1dc   : >> { %v712_v52 = vadd.f32 %v3139_v0, %v692_v35  ;;  %v722_v7 = vadd.f32 %v3197_v55, %v702_v46  ;;  %v726_v54 = vadd.f32 %v3199_v8, %v706_v40  ;;  %v727_v56 = vadd.f32 %v3201_v1, %v707_v41  ;;  %v855_v59 = vpop.permute.xlu1 %854  ;;  %v5334_v46 = vld [vmem:[#allocation263_spill] sm:$0xff] }
 0x1dd   : >> { %v5314_v57 = vrot.slane %v3507_v5, 7  ;;  %v5315_v44 = vrot.slane %v3520_v4, 7  ;;  %v5318_v31 = vrot.slane %v3507_v5, 1  ;;  %v5319_v8 = vrot.slane %v3520_v4, 1  ;;  %v853_v27 = vpop.permute.xlu0 %852 }
 0x1de   : >> { %v732_v0 = vadd.f32 %v3205_v53, %v712_v52  ;;  %v5322_v28 = vstv %s5310_s3  ;;  %v5323_v15 = vstv %s5311_s28  ;;  %v731_v13 = vadd.f32 %v3203_v48, %v711_v43  ;;  %s5333_s3 = sld [smem:[#allocation76_spill]]  ;;  %v5337_v52 = vld [vmem:[#allocation264_spill] sm:$0xff]  ;;  %s5611_s28 = sld [smem:[#allocation198_spill]] }
 0x1df   : >> { %v738_v12 = vsel %vm577_vm5, %v5315_v44, %v5314_v57  ;;  %v5316_v60 = vmov %v5315_v44  ;;  %v5317_v49 = vmov %v5314_v57  ;;  %v744_v53 = vsel %vm583_vm6, %v5319_v8, %v5318_v31  ;;  %v5340_v57 = vld [vmem:[#allocation265_spill] sm:$0xff] }
 0x1e0   : >> { %v741_v55 = vsel %vm577_vm5, %v5317_v49, %v5316_v60  ;;  %v5320_v1 = vmov %v5319_v8  ;;  %v5321_v23 = vmov %v5318_v31  ;;  %v755_v29 = vmul.f32 %v5322_v28, %v738_v12 }
 0x1e1   : >> { %v748_v16 = vsel %vm583_vm6, %v5321_v23, %v5320_v1  ;;  %v760_v37 = vmul.f32 %v5323_v15, %v738_v12  ;;  %v749_v10 = vsel %vm488_vm1, %v744_v53, %v741_v55  ;;  %v5324_v2 = vstv %s5312_s14  ;;  %s5369_s14 = sld [smem:[#allocation77_spill]] }
 0x1e2   : >> { %v765_v18 = vmul.f32 %v5324_v2, %v738_v12  ;;  %v5325_v24 = vstv %s5313_s21  ;;  %v5326_v50 = vmov %v5322_v28  ;;  %v757_v32 = vadd.f32 %v755_v29, %v717_v62  ;;  %s5372_s21 = sld [smem:[#allocation113_spill]] }
 0x1e3   : >> { %v770_v22 = vmul.f32 %v5325_v24, %v738_v12  ;;  %v754_v26 = vmul.f32 %v5326_v50, %v749_v10  ;;  %v5327_v5 = vmov %v5323_v15  ;;  %v762_v25 = vadd.f32 %v760_v37, %v722_v7 }
 0x1e4   : >> { %v759_v34 = vmul.f32 %v5327_v5, %v749_v10  ;;  %v752_v36 = vsel %vm491_vm4, %v738_v12, %v748_v16  ;;  %v5329_v11 = vmov %v5324_v2  ;;  %v767_v9 = vadd.f32 %v765_v18, %v727_v56  ;;  %v859_v2 = vpop.permute.xlu0 %858 }
 0x1e5   : >> { %v764_v48 = vmul.f32 %v5329_v11, %v749_v10  ;;  %v5330_v33 = vmov %v5325_v24  ;;  %v756_v45 = vadd.f32 %v754_v26, %v716_v47  ;;  %v772_v3 = vadd.f32 %v770_v22, %v732_v0 }
 0x1e6   : >> { %v769_v19 = vmul.f32 %v5330_v33, %v749_v10  ;;  %v761_v51 = vadd.f32 %v759_v34, %v721_v63  ;;  %v5332_v35 = vstv %s5052_s11  ;;  %v777_v40 = vadd.f32 %v5334_v46, %v757_v32  ;;  %s5342_s11 = sld [smem:[#allocation148_spill]]  ;;  %v861_v10 = vpop.permute.xlu1 %860 }
 0x1e7   : >> { %v774_v39 = vmul.f32 %v5332_v35, %v3520_v4  ;;  %v766_v21 = vadd.f32 %v764_v48, %v726_v54  ;;  %v5335_v41 = vstv %s5255_s18  ;;  %v782_v62 = vadd.f32 %v5337_v52, %v762_v25  ;;  %s5349_s18 = sld [smem:[#allocation42_spill]] }
 0x1e8   : >> { %v771_v17 = vadd.f32 %v769_v19, %v731_v13  ;;  %v779_v42 = vmul.f32 %v5335_v41, %v3520_v4  ;;  %v5338_v47 = vstv %s5256_s26  ;;  %v5339_v7 = vstv %s5308_s16  ;;  %s5350_s26 = sld [smem:[#allocation80_spill]]  ;;  %s5421_s16 = sld [smem:[#allocation151_spill]] }
 0x1e9   : >> { %v776_v43 = vadd.f32 %v774_v39, %v756_v45  ;;  %v784_v63 = vmul.f32 %v5338_v47, %v3520_v4  ;;  %v789_v56 = vmul.f32 %v5339_v7, %v3520_v4  ;;  %v787_v54 = vadd.f32 %v5340_v57, %v767_v9 }
 0x1ea   : >> { %v781_v0 = vadd.f32 %v779_v42, %v761_v51  ;;  %v5341_v44 = vstv %s5331_s4  ;;  %v5344_v8 = vstv %s5333_s3  ;;  %v792_v28 = vadd.f32 %v790_v30, %v772_v3  ;;  %s5353_s3 = sld [smem:[#allocation116_spill]]  ;;  %s5354_s4 = sld [smem:[#allocation152_spill]] }
 0x1eb   : >> { %v794_v12 = vmul.f32 %v5341_v44, %v744_v53  ;;  %v5343_v60 = vmov %v5341_v44  ;;  %v786_v55 = vadd.f32 %v784_v63, %v766_v21  ;;  %v791_v31 = vadd.f32 %v789_v56, %v771_v17 }
 0x1ec   : >> { %v795_v49 = vmul.f32 %v5343_v60, %v752_v36  ;;  %v799_v1 = vmul.f32 %v5344_v8, %v744_v53  ;;  %v5345_v23 = vmov %v5344_v8  ;;  %v5346_v15 = vstv %s5336_s9  ;;  %s5355_s9 = sld [smem:[#allocation46_spill]] }
 0x1ed   : >> { %v800_v16 = vmul.f32 %v5345_v23, %v752_v36  ;;  %v796_v29 = vadd.f32 %v794_v12, %v776_v43  ;;  %v804_v37 = vmul.f32 %v5346_v15, %v744_v53  ;;  %v5347_v4 = vmov %v5346_v15 }
 0x1ee   : >> { %v805_v13 = vmul.f32 %v5347_v4, %v752_v36  ;;  %v797_v18 = vadd.f32 %v795_v49, %v777_v40  ;;  %v801_v24 = vadd.f32 %v799_v1, %v781_v0  ;;  %v5348_v50 = vstv %s5342_s11  ;;  %s5387_s11 = sld [smem:[#allocation119_spill]] }
 0x1ef   : >> { %v802_v22 = vadd.f32 %v800_v16, %v782_v62  ;;  %v809_v26 = vmul.f32 %v5348_v50, %v744_v53  ;;  %v806_v32 = vadd.f32 %v804_v37, %v786_v55  ;;  %v5352_v34 = vmov %v5348_v50 }
 0x1f0   : >> { %v807_v5 = vadd.f32 %v805_v13, %v787_v54  ;;  %v810_v25 = vmul.f32 %v5352_v34, %v752_v36  ;;  %v851_v30 = vsel %vm551_vm7, %v3611_v14, %v847_v61  ;;  %v850_v48 = vsel %vm551_vm7, %v3613_v20, %v3635_v58 }
 0x1f1   : >> { %v811_v11 = vadd.f32 %v809_v26, %v791_v31  ;;  %v865_v9 = vsel %vm566_vm8, %v855_v59, %v861_v10  ;;  %v864_v53 = vsel %vm566_vm8, %v853_v27, %v859_v2  ;;  %v5360_v58 = vstv %s5349_s18  ;;  %s5471_s18 = sld [smem:[#allocation122_spill]] }
 0x1f2   : >> { %v812_v33 = vadd.f32 %v810_v25, %v792_v28  ;;  %v867_v36 = vsel %vm2680_vm2, %v865_v9, %v851_v30  ;;  %v3726_v51 = vsel %vm2684_vm3, %v851_v30, %v865_v9  ;;  %v866_v14 = vsel %vm2680_vm2, %v864_v53, %v850_v48 }
 0x1f3   : >> { %v871_v20 = vrot.slane %v867_v36, 7  ;;  %v880_v61 = vrot.slane %v867_v36, 1  ;;  %v912_v59 = vmul.f32 %v5360_v58, %v867_v36  ;;  %v3734_v27 = vsel %vm2684_vm3, %v850_v48, %v864_v53 }
 0x1f4   : >> { %v5361_v3 = vstv %s5350_s26  ;;  %v5362_v39 = vstv %s5353_s3  ;;  %v5363_v17 = vstv %s5354_s4  ;;  %v1029_v40 = vrot.slane %v3726_v51, 7  ;;  %s5367_s26 = sld [smem:[#allocation39_spill]]  ;;  %s5384_s3 = sld [smem:[#allocation47_spill]] }
 0x1f5   : >> { %v917_v35 = vmul.f32 %v5361_v3, %v867_v36  ;;  %v922_v21 = vmul.f32 %v5362_v39, %v867_v36  ;;  %v927_v46 = vmul.f32 %v5363_v17, %v867_v36  ;;  %v1038_v41 = vrot.slane %v3726_v51, 1  ;;  %s5415_s4 = sld [smem:[#allocation41_spill]] }
 0x1f6   : >> { %v5364_v42 = vstv %s5355_s9  ;;  %v5365_v52 = vstv %s5356_s12  ;;  %v5366_v47 = vstv %s5357_s13  ;;  %v874_v7 = vrot.slane %v866_v14, 7 }
 0x1f7   : >> { %v3747_v43 = vmul.f32 %v5364_v42, %v3726_v51  ;;  %v3752_v62 = vmul.f32 %v5365_v52, %v3726_v51  ;;  %v3757_v63 = vmul.f32 %v5366_v47, %v3726_v51  ;;  %v879_v56 = vrot.slane %v866_v14, 1 }
 0x1f8   : >> { %v5370_v0 = vmov %v5360_v58  ;;  %v5371_v54 = vmov %v5361_v3  ;;  %v5373_v12 = vmov %v5362_v39  ;;  %v5374_v49 = vmov %v5363_v17 }
 0x1f9   : >> { %v911_v57 = vmul.f32 %v5370_v0, %v866_v14  ;;  %v916_v44 = vmul.f32 %v5371_v54, %v866_v14  ;;  %v921_v60 = vmul.f32 %v5373_v12, %v866_v14  ;;  %v926_v55 = vmul.f32 %v5374_v49, %v866_v14 }
 0x1fa   : >> { %v1032_v31 = vrot.slane %v3734_v27, 7  ;;  %v1037_v8 = vrot.slane %v3734_v27, 1  ;;  %v875_v1 = vsel %vm577_vm5, %v874_v7, %v871_v20  ;;  %v878_v23 = vsel %vm577_vm5, %v871_v20, %v874_v7 }
 0x1fb   : >> { %v881_v16 = vsel %vm583_vm6, %v879_v56, %v880_v61  ;;  %v885_v28 = vsel %vm583_vm6, %v880_v61, %v879_v56  ;;  %v5376_v4 = vstv %s5367_s26  ;;  %v5377_v10 = vstv %s5369_s14  ;;  %s5385_s26 = sld [smem:[#allocation83_spill]] }
 0x1fc   : >> { %v886_v15 = vsel %vm488_vm1, %v881_v16, %v878_v23  ;;  %v889_v37 = vsel %vm491_vm4, %v875_v1, %v885_v28  ;;  %v892_v13 = vmul.f32 %v5376_v4, %v875_v1  ;;  %v897_v2 = vmul.f32 %v5377_v10, %v875_v1  ;;  %s5388_s14 = sld [smem:[#allocation155_spill]] }
 0x1fd   : >> { %v5378_v50 = vmov %v5376_v4  ;;  %v5379_v34 = vmov %v5377_v10  ;;  %v5380_v30 = vstv %s5372_s21  ;;  %v5382_v20 = vstv %s5375_s24  ;;  %s5474_s21 = sld [smem:[#allocation158_spill]] }
 0x1fe   : >> { %v891_v26 = vmul.f32 %v5378_v50, %v886_v15  ;;  %v896_v25 = vmul.f32 %v5379_v34, %v886_v15  ;;  %v901_v48 = vmul.f32 %v5380_v30, %v886_v15  ;;  %v5381_v9 = vmov %v5380_v30 }
 0x1ff   : >> { %v902_v53 = vmul.f32 %v5381_v9, %v875_v1  ;;  %v894_v36 = vadd.f32 %v892_v13, %v797_v18  ;;  %v899_v14 = vadd.f32 %v897_v2, %v802_v22  ;;  %v906_v61 = vmul.f32 %v5382_v20, %v886_v15 }
 0x200   : >> { %v5383_v58 = vmov %v5382_v20  ;;  %v893_v39 = vadd.f32 %v891_v26, %v796_v29  ;;  %v898_v17 = vadd.f32 %v896_v25, %v801_v24  ;;  %v903_v42 = vadd.f32 %v901_v48, %v806_v32  ;;  %v5399_v48 = vld [vmem:[#allocation205_spill] sm:$0xff] }
 0x201   : >> { %v907_v3 = vmul.f32 %v5383_v58, %v875_v1  ;;  %v904_v52 = vadd.f32 %v902_v53, %v807_v5  ;;  %v908_v47 = vadd.f32 %v906_v61, %v811_v11  ;;  %v914_v56 = vadd.f32 %v912_v59, %v894_v36  ;;  %v5400_v53 = vld [vmem:[#allocation201_spill] sm:$0xff] }
 0x202   : >> { %v919_v18 = vadd.f32 %v917_v35, %v899_v14  ;;  %v913_v22 = vadd.f32 %v911_v57, %v893_v39  ;;  %v918_v0 = vadd.f32 %v916_v44, %v898_v17  ;;  %v923_v54 = vadd.f32 %v921_v60, %v903_v42  ;;  %v5401_v14 = vld [vmem:[#allocation206_spill] sm:$0xff]  ;;  %v5405_v17 = vld [vmem:[#allocation208_spill] sm:$0xff] }
 0x203   : >> { %v909_v7 = vadd.f32 %v907_v3, %v812_v33  ;;  %v924_v12 = vadd.f32 %v922_v21, %v904_v52  ;;  %v928_v49 = vadd.f32 %v926_v55, %v908_v47  ;;  %v5389_v29 = vstv %s5384_s3  ;;  %v3809_v55 = vpop.permute.xlu1 %1135  ;;  %v5404_v3 = vld [vmem:[#allocation203_spill] sm:$0xff]  ;;  %v5406_v52 = vld [vmem:[#allocation204_spill] sm:$0xff] }
 0x204   : >> { %v931_v23 = vmul.f32 %v5389_v29, %v881_v16  ;;  %v5390_v24 = vmov %v5389_v29  ;;  %v5391_v32 = vstv %s5385_s26  ;;  %v5393_v11 = vstv %s5387_s11  ;;  %s5397_s26 = sld [smem:[#allocation154_spill]]  ;;  %s5417_s11 = sld [smem:[#allocation79_spill]] }
 0x205   : >> { %v929_v1 = vadd.f32 %v927_v46, %v909_v7  ;;  %v932_v28 = vmul.f32 %v5390_v24, %v889_v37  ;;  %v936_v15 = vmul.f32 %v5391_v32, %v881_v16  ;;  %v5392_v5 = vmov %v5391_v32  ;;  %v3811_v46 = vpop.permute.xlu0 %1133  ;;  %v5407_v7 = vld [vmem:[#allocation209_spill] sm:$0xff] }
 0x206   : >> { %v937_v4 = vmul.f32 %v5392_v5, %v889_v37  ;;  %v941_v33 = vmul.f32 %v5393_v11, %v881_v16  ;;  %v5394_v59 = vmov %v5393_v11  ;;  %v933_v35 = vadd.f32 %v931_v23, %v913_v22  ;;  %v5412_v23 = vld [vmem:[#allocation214_spill] sm:$0xff] }
 0x207   : >> { %v942_v13 = vmul.f32 %v5394_v59, %v889_v37  ;;  %v934_v10 = vadd.f32 %v932_v28, %v914_v56  ;;  %v5395_v57 = vstv %s5388_s14  ;;  %v938_v2 = vadd.f32 %v936_v15, %v918_v0  ;;  %v5409_v0 = vld [vmem:[#allocation211_spill] sm:$0xff]  ;;  %s5419_s14 = sld [smem:[#allocation115_spill]] }
 0x208   : >> { %v946_v44 = vmul.f32 %v5395_v57, %v881_v16  ;;  %v5396_v60 = vmov %v5395_v57  ;;  %v939_v50 = vadd.f32 %v937_v4, %v919_v18  ;;  %v943_v26 = vadd.f32 %v941_v33, %v923_v54  ;;  %v5402_v16 = vld [vmem:[#allocation202_spill] sm:$0xff]  ;;  %v5414_v15 = vld [vmem:[#allocation215_spill] sm:$0xff]  ;;  %v5416_v4 = vld [vmem:[#allocation216_spill] sm:$0xff] }
 0x209   : >> { %v947_v21 = vmul.f32 %v5396_v60, %v889_v37  ;;  %v944_v34 = vadd.f32 %v942_v13, %v924_v12  ;;  %v971_v9 = vadd.f32 %v5399_v48, %v933_v35  ;;  %v972_v36 = vadd.f32 %v5400_v53, %v934_v10  ;;  %v5403_v37 = vld [vmem:[#allocation207_spill] sm:$0xff]  ;;  %v5408_v18 = vld [vmem:[#allocation210_spill] sm:$0xff]  ;;  %v5410_v12 = vld [vmem:[#allocation212_spill] sm:$0xff]  ;;  %v1142_v13 = vpop.permute.xlu1 %1141  ;;  %v3833_v35 = vpop.permute.xlu0 %1139 }
 0x20a   : >> { %v948_v25 = vadd.f32 %v946_v44, %v928_v49  ;;  %s5398_s3 = smov %s5397_s26  ;;  %v976_v20 = vadd.f32 %v5401_v14, %v938_v2  ;;  %v977_v61 = vadd.f32 %v5402_v16, %v939_v50  ;;  %v981_v58 = vadd.f32 %v5403_v37, %v943_v26  ;;  %v5418_v33 = vld [vmem:[#allocation217_spill] sm:$0xff]  ;;  %v5420_v10 = vld [vmem:[#allocation218_spill] sm:$0xff]  ;;  %v5422_v44 = vld [vmem:[#allocation219_spill] sm:$0xff] }
 0x20b   : >> { %v949_v30 = vadd.f32 %v947_v21, %v929_v1  ;;  %v982_v39 = vadd.f32 %v5404_v3, %v944_v34  ;;  %v991_v56 = vadd.f32 %v5407_v7, %v971_v9  ;;  %v992_v22 = vadd.f32 %v5408_v18, %v972_v36  ;;  %v5411_v1 = vld [vmem:[#allocation213_spill] sm:$0xff]  ;;  %v5423_v21 = vld [vmem:[#allocation220_spill] sm:$0xff]  ;;  %v5425_v34 = vld [vmem:[#allocation222_spill] sm:$0xff] }
 0x20c   : >> { %v986_v42 = vadd.f32 %v5405_v17, %v948_v25  ;;  %v996_v54 = vadd.f32 %v5409_v0, %v976_v20  ;;  %v997_v49 = vadd.f32 %v5410_v12, %v977_v61  ;;  %v1001_v29 = vadd.f32 %v5411_v1, %v981_v58  ;;  %v5424_v50 = vld [vmem:[#allocation221_spill] sm:$0xff]  ;;  %v5429_v58 = vld [vmem:[#allocation223_spill] sm:$0xff] }
 0x20d   : >> { %v987_v47 = vadd.f32 %v5406_v52, %v949_v30  ;;  %v1002_v24 = vadd.f32 %v5412_v23, %v982_v39  ;;  %v5413_v28 = vstv %s5397_s26  ;;  %v1011_v59 = vadd.f32 %v5418_v33, %v991_v56  ;;  %v5426_v30 = vld [vmem:[#allocation224_spill] sm:$0xff]  ;;  %s5436_s26 = sld [smem:[#allocation49_spill]]  ;;  %v1148_v1 = vpop.permute.xlu0 %1147 }
 0x20e   : >> { %v1085_v32 = vmul.f32 %v5413_v28, %v3726_v51  ;;  %v1006_v5 = vadd.f32 %v5414_v15, %v986_v42  ;;  %v1012_v57 = vadd.f32 %v5420_v10, %v992_v22  ;;  %v1016_v60 = vadd.f32 %v5422_v44, %v996_v54 }
 0x20f   : >> { %v1007_v11 = vadd.f32 %v5416_v4, %v987_v47  ;;  %v1017_v2 = vadd.f32 %v5423_v21, %v997_v49  ;;  %v1021_v26 = vadd.f32 %v5424_v50, %v1001_v29  ;;  %v1022_v25 = vadd.f32 %v5425_v34, %v1002_v24  ;;  %v1150_v49 = vpop.permute.xlu1 %1149 }
 0x210   : >> { %v1033_v9 = vsel %vm577_vm5, %v1032_v31, %v1029_v40  ;;  %v1036_v53 = vsel %vm577_vm5, %v1029_v40, %v1032_v31  ;;  %v1039_v36 = vsel %vm583_vm6, %v1037_v8, %v1038_v41  ;;  %v1043_v14 = vsel %vm583_vm6, %v1038_v41, %v1037_v8 }
 0x211   : >> { %v1027_v48 = vadd.f32 %v5426_v30, %v1007_v11  ;;  %v5427_v20 = vstv %s5415_s4  ;;  %v5428_v61 = vstv %s5417_s11  ;;  %v1026_v3 = vadd.f32 %v5429_v58, %v1006_v5  ;;  %s5439_s4 = sld [smem:[#allocation85_spill]]  ;;  %s5455_s11 = sld [smem:[#allocation161_spill]] }
 0x212   : >> { %v1050_v16 = vmul.f32 %v5427_v20, %v1033_v9  ;;  %v1055_v37 = vmul.f32 %v5428_v61, %v1033_v9  ;;  %v1044_v40 = vsel %vm488_vm1, %v1039_v36, %v1036_v53  ;;  %v5430_v31 = vstv %s5419_s14  ;;  %s5458_s14 = sld [smem:[#allocation127_spill]] }
 0x213   : >> { %v1060_v39 = vmul.f32 %v5430_v31, %v1033_v9  ;;  %v5431_v17 = vstv %s5421_s16  ;;  %v5432_v52 = vmov %v5427_v20  ;;  %v5433_v51 = vmov %v5428_v61  ;;  %s5468_s16 = sld [smem:[#allocation86_spill]] }
 0x214   : >> { %v1065_v42 = vmul.f32 %v5431_v17, %v1033_v9  ;;  %v1049_v47 = vmul.f32 %v5432_v52, %v1044_v40  ;;  %v1052_v7 = vadd.f32 %v1050_v16, %v1012_v57  ;;  %v1054_v41 = vmul.f32 %v5433_v51, %v1044_v40 }
 0x215   : >> { %v1057_v8 = vadd.f32 %v1055_v37, %v1017_v2  ;;  %v1047_v56 = vsel %vm491_vm4, %v1033_v9, %v1043_v14  ;;  %v5434_v18 = vmov %v5430_v31  ;;  %v1062_v0 = vadd.f32 %v1060_v39, %v1022_v25 }
 0x216   : >> { %v1059_v22 = vmul.f32 %v5434_v18, %v1044_v40  ;;  %v5435_v54 = vmov %v5431_v17  ;;  %v1051_v29 = vadd.f32 %v1049_v47, %v1011_v59  ;;  %v1056_v23 = vadd.f32 %v1054_v41, %v1016_v60 }
 0x217   : >> { %v1064_v12 = vmul.f32 %v5435_v54, %v1044_v40  ;;  %v1067_v24 = vadd.f32 %v1065_v42, %v1027_v48  ;;  %v5438_v28 = vstv %s5355_s9  ;;  %v1072_v11 = vadd.f32 %v3747_v43, %v1052_v7  ;;  %s5444_s9 = sld [smem:[#allocation157_spill]]  ;;  %v1156_v40 = vpop.permute.xlu1 %1155 }
 0x218   : >> { %v1069_v15 = vmul.f32 %v5438_v28, %v3734_v27  ;;  %v1061_v5 = vadd.f32 %v1059_v22, %v1021_v26  ;;  %v5440_v33 = vstv %s5356_s12  ;;  %v1077_v44 = vadd.f32 %v3752_v62, %v1057_v8  ;;  %s5456_s12 = sld [smem:[#allocation55_spill]] }
 0x219   : >> { %v1066_v4 = vadd.f32 %v1064_v12, %v1026_v3  ;;  %v1074_v10 = vmul.f32 %v5440_v33, %v3734_v27  ;;  %v5441_v59 = vstv %s5357_s13  ;;  %v5442_v21 = vstv %s5398_s3  ;;  %s5457_s13 = sld [smem:[#allocation91_spill]]  ;;  %s5514_s3 = sld [smem:[#allocation88_spill]] }
 0x21a   : >> { %v1071_v57 = vadd.f32 %v1069_v15, %v1051_v29  ;;  %v1079_v60 = vmul.f32 %v5441_v59, %v3734_v27  ;;  %v1084_v2 = vmul.f32 %v5442_v21, %v3734_v27  ;;  %v1082_v26 = vadd.f32 %v3757_v63, %v1062_v0  ;;  %v1154_v63 = vpop.permute.xlu0 %1153 }
 0x21b   : >> { %v1076_v50 = vadd.f32 %v1074_v10, %v1056_v23  ;;  %v5443_v34 = vstv %s5436_s26  ;;  %v5446_v53 = vstv %s5439_s4  ;;  %v1087_v16 = vadd.f32 %v1085_v32, %v1067_v24  ;;  %s5451_s26 = sld [smem:[#allocation89_spill]]  ;;  %s5454_s4 = sld [smem:[#allocation125_spill]] }
 0x21c   : >> { %v1089_v43 = vmul.f32 %v5443_v34, %v1039_v36  ;;  %v5445_v25 = vmov %v5443_v34  ;;  %v1081_v48 = vadd.f32 %v1079_v60, %v1061_v5  ;;  %v1086_v9 = vadd.f32 %v1084_v2, %v1066_v4 }
 0x21d   : >> { %v1090_v30 = vmul.f32 %v5445_v25, %v1047_v56  ;;  %v1094_v14 = vmul.f32 %v5446_v53, %v1039_v36  ;;  %v5447_v62 = vmov %v5446_v53  ;;  %v5448_v37 = vstv %s5144_s25  ;;  %s5596_s25 = sld [smem:[#allocation103_spill]] }
 0x21e   : >> { %v1095_v20 = vmul.f32 %v5447_v62, %v1047_v56  ;;  %v1091_v61 = vadd.f32 %v1089_v43, %v1071_v57  ;;  %v1099_v58 = vmul.f32 %v5448_v37, %v1039_v36  ;;  %v5449_v27 = vmov %v5448_v37 }
 0x21f   : >> { %v1100_v3 = vmul.f32 %v5449_v27, %v1047_v56  ;;  %v1092_v31 = vadd.f32 %v1090_v30, %v1072_v11  ;;  %v1096_v39 = vadd.f32 %v1094_v14, %v1076_v50  ;;  %v5450_v42 = vstv %s5444_s9  ;;  %s5487_s9 = sld [smem:[#allocation164_spill]] }
 0x220   : >> { %v1097_v17 = vadd.f32 %v1095_v20, %v1077_v44  ;;  %v1104_v52 = vmul.f32 %v5450_v42, %v1039_v36  ;;  %v1101_v47 = vadd.f32 %v1099_v58, %v1081_v48  ;;  %v5453_v51 = vmov %v5450_v42 }
 0x221   : >> { %v1102_v7 = vadd.f32 %v1100_v3, %v1082_v26  ;;  %v1105_v41 = vmul.f32 %v5453_v51, %v1047_v56  ;;  %v1146_v32 = vsel %vm551_vm7, %v3809_v55, %v1142_v13  ;;  %v1145_v18 = vsel %vm551_vm7, %v3811_v46, %v3833_v35 }
 0x222   : >> { %v1106_v8 = vadd.f32 %v1104_v52, %v1086_v9  ;;  %v1160_v22 = vsel %vm566_vm8, %v1150_v49, %v1156_v40  ;;  %v1159_v36 = vsel %vm566_vm8, %v1148_v1, %v1154_v63  ;;  %v5459_v35 = vstv %s5148_s2  ;;  %s5483_s2 = sld [smem:[#allocation56_spill]] }
 0x223   : >> { %v1107_v0 = vadd.f32 %v1105_v41, %v1087_v16  ;;  %v1162_v56 = vsel %vm2680_vm2, %v1160_v22, %v1146_v32  ;;  %v3924_v54 = vsel %vm2684_vm3, %v1146_v32, %v1160_v22  ;;  %v1161_v55 = vsel %vm2680_vm2, %v1159_v36, %v1145_v18 }
 0x224   : >> { %v1166_v46 = vrot.slane %v1162_v56, 7  ;;  %v1175_v13 = vrot.slane %v1162_v56, 1  ;;  %v1207_v12 = vmul.f32 %v5459_v35, %v1162_v56  ;;  %v3932_v49 = vsel %vm2684_vm3, %v1145_v18, %v1159_v36 }
 0x225   : >> { %v5460_v1 = vstv %s5451_s26  ;;  %v5461_v23 = vstv %s5454_s4  ;;  %v5462_v28 = vstv %s5455_s11  ;;  %v1324_v5 = vrot.slane %v3924_v54, 7  ;;  %s5466_s26 = sld [smem:[#allocation50_spill]]  ;;  %s5486_s4 = sld [smem:[#allocation128_spill]] }
 0x226   : >> { %v1212_v29 = vmul.f32 %v5460_v1, %v1162_v56  ;;  %v1217_v24 = vmul.f32 %v5461_v23, %v1162_v56  ;;  %v1222_v15 = vmul.f32 %v5462_v28, %v1162_v56  ;;  %v1333_v4 = vrot.slane %v3924_v54, 1  ;;  %s5564_s11 = sld [smem:[#allocation137_spill]] }
 0x227   : >> { %v5463_v11 = vstv %s5456_s12  ;;  %v5464_v10 = vstv %s5457_s13  ;;  %v5465_v44 = vstv %s5458_s14  ;;  %v1169_v60 = vrot.slane %v1161_v55, 7 }
 0x228   : >> { %v3945_v33 = vmul.f32 %v5463_v11, %v3924_v54  ;;  %v3950_v57 = vmul.f32 %v5464_v10, %v3924_v54  ;;  %v3955_v59 = vmul.f32 %v5465_v44, %v3924_v54  ;;  %v1174_v21 = vrot.slane %v1161_v55, 1 }
 0x229   : >> { %v5469_v2 = vmov %v5459_v35  ;;  %v5470_v26 = vmov %v5460_v1  ;;  %v5472_v43 = vmov %v5461_v23  ;;  %v5473_v30 = vmov %v5462_v28 }
 0x22a   : >> { %v1206_v50 = vmul.f32 %v5469_v2, %v1161_v55  ;;  %v1211_v34 = vmul.f32 %v5470_v26, %v1161_v55  ;;  %v1216_v25 = vmul.f32 %v5472_v43, %v1161_v55  ;;  %v1221_v48 = vmul.f32 %v5473_v30, %v1161_v55 }
 0x22b   : >> { %v1327_v9 = vrot.slane %v3932_v49, 7  ;;  %v1332_v53 = vrot.slane %v3932_v49, 1  ;;  %v1170_v14 = vsel %vm577_vm5, %v1169_v60, %v1166_v46  ;;  %v1173_v62 = vsel %vm577_vm5, %v1166_v46, %v1169_v60 }
 0x22c   : >> { %v1176_v20 = vsel %vm583_vm6, %v1174_v21, %v1175_v13  ;;  %v1180_v16 = vsel %vm583_vm6, %v1175_v13, %v1174_v21  ;;  %v5475_v27 = vstv %s5466_s26  ;;  %v5476_v40 = vstv %s5468_s16  ;;  %s5484_s26 = sld [smem:[#allocation92_spill]]  ;;  %s5579_s16 = sld [smem:[#allocation173_spill]] }
 0x22d   : >> { %v1181_v37 = vsel %vm488_vm1, %v1176_v20, %v1173_v62  ;;  %v1184_v58 = vsel %vm491_vm4, %v1170_v14, %v1180_v16  ;;  %v1187_v3 = vmul.f32 %v5475_v27, %v1170_v14  ;;  %v1192_v63 = vmul.f32 %v5476_v40, %v1170_v14 }
 0x22e   : >> { %v5477_v42 = vmov %v5475_v27  ;;  %v5478_v51 = vmov %v5476_v40  ;;  %v5479_v32 = vstv %s5471_s18  ;;  %v5481_v46 = vstv %s5474_s21  ;;  %s5582_s18 = sld [smem:[#allocation63_spill]]  ;;  %s5591_s21 = sld [smem:[#allocation97_spill]] }
 0x22f   : >> { %v1186_v52 = vmul.f32 %v5477_v42, %v1181_v37  ;;  %v1191_v41 = vmul.f32 %v5478_v51, %v1181_v37  ;;  %v1196_v18 = vmul.f32 %v5479_v32, %v1181_v37  ;;  %v5480_v22 = vmov %v5479_v32  ;;  %v5498_v32 = vld [vmem:[#allocation227_spill] sm:$0xff] }
 0x230   : >> { %v1197_v36 = vmul.f32 %v5480_v22, %v1170_v14  ;;  %v1189_v56 = vadd.f32 %v1187_v3, %v1092_v31  ;;  %v1194_v55 = vadd.f32 %v1192_v63, %v1097_v17  ;;  %v1201_v13 = vmul.f32 %v5481_v46, %v1181_v37  ;;  %v5499_v22 = vld [vmem:[#allocation225_spill] sm:$0xff] }
 0x231   : >> { %v5482_v35 = vmov %v5481_v46  ;;  %v1188_v23 = vadd.f32 %v1186_v52, %v1091_v61  ;;  %v1193_v28 = vadd.f32 %v1191_v41, %v1096_v39  ;;  %v1198_v11 = vadd.f32 %v1196_v18, %v1101_v47  ;;  %v5501_v46 = vld [vmem:[#allocation226_spill] sm:$0xff] }
 0x232   : >> { %v1202_v1 = vmul.f32 %v5482_v35, %v1170_v14  ;;  %v1199_v10 = vadd.f32 %v1197_v36, %v1102_v7  ;;  %v1203_v44 = vadd.f32 %v1201_v13, %v1106_v8  ;;  %v1209_v21 = vadd.f32 %v1207_v12, %v1189_v56  ;;  %v5500_v56 = vld [vmem:[#allocation228_spill] sm:$0xff] }
 0x233   : >> { %v1214_v31 = vadd.f32 %v1212_v29, %v1194_v55  ;;  %v1208_v17 = vadd.f32 %v1206_v50, %v1188_v23  ;;  %v1213_v2 = vadd.f32 %v1211_v34, %v1193_v28  ;;  %v1218_v26 = vadd.f32 %v1216_v25, %v1198_v11  ;;  %v5504_v23 = vld [vmem:[#allocation231_spill] sm:$0xff]  ;;  %v5505_v11 = vld [vmem:[#allocation232_spill] sm:$0xff] }
 0x234   : >> { %v1204_v60 = vadd.f32 %v1202_v1, %v1107_v0  ;;  %v1219_v43 = vadd.f32 %v1217_v24, %v1199_v10  ;;  %v1223_v30 = vadd.f32 %v1221_v48, %v1203_v44  ;;  %v5488_v61 = vstv %s5483_s2  ;;  %v4007_v48 = vpop.permute.xlu1 %1430  ;;  %v5506_v44 = vld [vmem:[#allocation233_spill] sm:$0xff] }
 0x235   : >> { %v1226_v62 = vmul.f32 %v5488_v61, %v1176_v20  ;;  %v5489_v39 = vmov %v5488_v61  ;;  %v5490_v47 = vstv %s5484_s26  ;;  %v5492_v8 = vstv %s5486_s4  ;;  %s5496_s26 = sld [smem:[#allocation163_spill]]  ;;  %v5511_v61 = vld [vmem:[#allocation238_spill] sm:$0xff]  ;;  %s5517_s4 = sld [smem:[#allocation124_spill]] }
 0x236   : >> { %v1224_v14 = vadd.f32 %v1222_v15, %v1204_v60  ;;  %v1227_v16 = vmul.f32 %v5489_v39, %v1184_v58  ;;  %v1231_v37 = vmul.f32 %v5490_v47, %v1176_v20  ;;  %v5491_v7 = vmov %v5490_v47  ;;  %v5513_v47 = vld [vmem:[#allocation239_spill] sm:$0xff] }
 0x237   : >> { %v1232_v27 = vmul.f32 %v5491_v7, %v1184_v58  ;;  %v1236_v0 = vmul.f32 %v5492_v8, %v1176_v20  ;;  %v5493_v12 = vmov %v5492_v8  ;;  %v1228_v29 = vadd.f32 %v1226_v62, %v1208_v17  ;;  %v5508_v17 = vld [vmem:[#allocation235_spill] sm:$0xff]  ;;  %v5515_v7 = vld [vmem:[#allocation240_spill] sm:$0xff]  ;;  %v5516_v8 = vld [vmem:[#allocation241_spill] sm:$0xff] }
 0x238   : >> { %v1237_v3 = vmul.f32 %v5493_v12, %v1184_v58  ;;  %v1229_v40 = vadd.f32 %v1227_v16, %v1209_v21  ;;  %v5494_v50 = vstv %s5487_s9  ;;  %v1233_v15 = vadd.f32 %v1231_v37, %v1213_v2  ;;  %v5507_v21 = vld [vmem:[#allocation234_spill] sm:$0xff]  ;;  %v1437_v12 = vpop.permute.xlu1 %1436  ;;  %s5519_s9 = sld [smem:[#allocation160_spill]] }
 0x239   : >> { %v1241_v34 = vmul.f32 %v5494_v50, %v1176_v20  ;;  %v5495_v25 = vmov %v5494_v50  ;;  %v1234_v63 = vadd.f32 %v1232_v27, %v1214_v31  ;;  %v1238_v42 = vadd.f32 %v1236_v0, %v1218_v26  ;;  %v5502_v20 = vld [vmem:[#allocation229_spill] sm:$0xff]  ;;  %v5509_v26 = vld [vmem:[#allocation236_spill] sm:$0xff] }
 0x23a   : >> { %v1242_v24 = vmul.f32 %v5495_v25, %v1184_v58  ;;  %v1239_v52 = vadd.f32 %v1237_v3, %v1219_v43  ;;  %v1266_v18 = vadd.f32 %v5498_v32, %v1228_v29  ;;  %v1267_v36 = vadd.f32 %v5499_v22, %v1229_v40  ;;  %v5503_v58 = vld [vmem:[#allocation230_spill] sm:$0xff]  ;;  %v5520_v40 = vld [vmem:[#allocation243_spill] sm:$0xff] }
 0x23b   : >> { %v1243_v51 = vadd.f32 %v1241_v34, %v1223_v30  ;;  %s5497_s2 = smov %s5496_s26  ;;  %v1271_v55 = vadd.f32 %v5500_v56, %v1233_v15  ;;  %v1272_v13 = vadd.f32 %v5501_v46, %v1234_v63  ;;  %v1276_v35 = vadd.f32 %v5502_v20, %v1238_v42  ;;  %v5510_v30 = vld [vmem:[#allocation237_spill] sm:$0xff]  ;;  %v5518_v3 = vld [vmem:[#allocation242_spill] sm:$0xff]  ;;  %v5521_v34 = vld [vmem:[#allocation244_spill] sm:$0xff] }
 0x23c   : >> { %v1244_v41 = vadd.f32 %v1242_v24, %v1224_v14  ;;  %v1277_v1 = vadd.f32 %v5503_v58, %v1239_v52  ;;  %v1286_v60 = vadd.f32 %v5506_v44, %v1266_v18  ;;  %v1287_v31 = vadd.f32 %v5507_v21, %v1267_v36  ;;  %v5522_v24 = vld [vmem:[#allocation245_spill] sm:$0xff]  ;;  %v5523_v63 = vld [vmem:[#allocation246_spill] sm:$0xff]  ;;  %v5524_v52 = vld [vmem:[#allocation248_spill] sm:$0xff] }
 0x23d   : >> { %v1281_v28 = vadd.f32 %v5504_v23, %v1243_v51  ;;  %v1291_v2 = vadd.f32 %v5508_v17, %v1271_v55  ;;  %v1292_v43 = vadd.f32 %v5509_v26, %v1272_v13  ;;  %v1296_v14 = vadd.f32 %v5510_v30, %v1276_v35  ;;  %v5525_v18 = vld [vmem:[#allocation247_spill] sm:$0xff] }
 0x23e   : >> { %v1282_v10 = vadd.f32 %v5505_v11, %v1244_v41  ;;  %v1297_v62 = vadd.f32 %v5511_v61, %v1277_v1  ;;  %v5512_v39 = vstv %s5496_s26  ;;  %v1306_v0 = vadd.f32 %v5516_v8, %v1286_v60  ;;  %s5546_s26 = sld [smem:[#allocation62_spill]] }
 0x23f   : >> { %v1380_v16 = vmul.f32 %v5512_v39, %v3924_v54  ;;  %v1301_v37 = vadd.f32 %v5513_v47, %v1281_v28  ;;  %v1307_v29 = vadd.f32 %v5518_v3, %v1287_v31  ;;  %v1311_v50 = vadd.f32 %v5520_v40, %v1291_v2  ;;  %v1445_v2 = vpop.permute.xlu1 %1444 }
 0x240   : >> { %v1302_v27 = vadd.f32 %v5515_v7, %v1282_v10  ;;  %v1312_v25 = vadd.f32 %v5521_v34, %v1292_v43  ;;  %v1316_v15 = vadd.f32 %v5522_v24, %v1296_v14  ;;  %v1317_v42 = vadd.f32 %v5523_v63, %v1297_v62 }
 0x241   : >> { %v1328_v41 = vsel %vm577_vm5, %v1327_v9, %v1324_v5  ;;  %v1331_v32 = vsel %vm577_vm5, %v1324_v5, %v1327_v9  ;;  %v1321_v22 = vadd.f32 %v5525_v18, %v1301_v37  ;;  %v1334_v36 = vsel %vm583_vm6, %v1332_v53, %v1333_v4 }
 0x242   : >> { %v1322_v51 = vadd.f32 %v5524_v52, %v1302_v27  ;;  %v5526_v56 = vstv %s5188_s20  ;;  %v5527_v46 = vstv %s5514_s3  ;;  %v1338_v20 = vsel %vm583_vm6, %v1333_v4, %v1332_v53  ;;  %v1429_v27 = vpop.permute.xlu0 %1428  ;;  %s5552_s3 = sld [smem:[#allocation59_spill]]  ;;  %s5590_s20 = sld [smem:[#allocation61_spill]] }
 0x243   : >> { %v1345_v55 = vmul.f32 %v5526_v56, %v1328_v41  ;;  %v1350_v13 = vmul.f32 %v5527_v46, %v1328_v41  ;;  %v1339_v5 = vsel %vm488_vm1, %v1334_v36, %v1331_v32  ;;  %v5528_v9 = vstv %s5517_s4  ;;  %s5554_s4 = sld [smem:[#allocation95_spill]] }
 0x244   : >> { %v1355_v35 = vmul.f32 %v5528_v9, %v1328_v41  ;;  %v5529_v58 = vstv %s5519_s9  ;;  %v5530_v23 = vmov %v5526_v56  ;;  %v5531_v10 = vmov %v5527_v46 }
 0x245   : >> { %v1360_v1 = vmul.f32 %v5529_v58, %v1328_v41  ;;  %v1344_v28 = vmul.f32 %v5530_v23, %v1339_v5  ;;  %v1347_v11 = vadd.f32 %v1345_v55, %v1307_v29  ;;  %v1349_v44 = vmul.f32 %v5531_v10, %v1339_v5 }
 0x246   : >> { %v1352_v60 = vadd.f32 %v1350_v13, %v1312_v25  ;;  %v5532_v21 = vmov %v5528_v9  ;;  %v1357_v54 = vadd.f32 %v1355_v35, %v1317_v42  ;;  %v5533_v4 = vmov %v5529_v58  ;;  %v1451_v13 = vpop.permute.xlu1 %1450 }
 0x247   : >> { %v1354_v31 = vmul.f32 %v5532_v21, %v1339_v5  ;;  %v1359_v53 = vmul.f32 %v5533_v4, %v1339_v5  ;;  %v1362_v17 = vadd.f32 %v1360_v1, %v1322_v51  ;;  %v1342_v26 = vsel %vm491_vm4, %v1328_v41, %v1338_v20 }
 0x248   : >> { %v1346_v43 = vadd.f32 %v1344_v28, %v1306_v0  ;;  %v1351_v30 = vadd.f32 %v1349_v44, %v1311_v50  ;;  %v5534_v14 = vstv %s5456_s12  ;;  %v1367_v47 = vadd.f32 %v3945_v33, %v1347_v11  ;;  %v1435_v11 = vpop.permute.xlu0 %1434  ;;  %s5574_s12 = sld [smem:[#allocation60_spill]] }
 0x249   : >> { %v1364_v61 = vmul.f32 %v5534_v14, %v3932_v49  ;;  %v1356_v62 = vadd.f32 %v1354_v31, %v1316_v15  ;;  %v1361_v39 = vadd.f32 %v1359_v53, %v1321_v22  ;;  %v5535_v37 = vstv %s5457_s13  ;;  %s5576_s13 = sld [smem:[#allocation96_spill]] }
 0x24a   : >> { %v1369_v7 = vmul.f32 %v5535_v37, %v3932_v49  ;;  %v1372_v0 = vadd.f32 %v3950_v57, %v1352_v60  ;;  %v5536_v3 = vstv %s5458_s14  ;;  %v5537_v40 = vstv %s5497_s2  ;;  %s5547_s2 = smov %s5546_s26  ;;  %s5578_s14 = sld [smem:[#allocation132_spill]] }
 0x24b   : >> { %v1366_v8 = vadd.f32 %v1364_v61, %v1346_v43  ;;  %v1374_v29 = vmul.f32 %v5536_v3, %v3932_v49  ;;  %v1379_v50 = vmul.f32 %v5537_v40, %v3932_v49  ;;  %v1377_v33 = vadd.f32 %v3955_v59, %v1357_v54 }
 0x24c   : >> { %v1371_v34 = vadd.f32 %v1369_v7, %v1351_v30  ;;  %v1382_v25 = vadd.f32 %v1380_v16, %v1362_v17  ;;  %v5538_v24 = vstv %s5197_s6  ;;  %v5540_v41 = vstv %s5199_s19  ;;  %v2216_v30 = vld [vmem:[#allocation2 + $0x30] sm:$0xff]  ;;  %s5556_s6 = sld [smem:[#allocation131_spill]]  ;;  %v2217_v17 = vld [vmem:[#allocation2] sm:$0xff] }
 0x24d   : >> { %v1384_v15 = vmul.f32 %v5538_v24, %v1334_v36  ;;  %v1376_v63 = vadd.f32 %v1374_v29, %v1356_v62  ;;  %v1381_v42 = vadd.f32 %v1379_v50, %v1361_v39  ;;  %v5539_v52 = vmov %v5538_v24  ;;  %s5583_s19 = sld [smem:[#allocation99_spill]] }
 0x24e   : >> { %v1385_v51 = vmul.f32 %v5539_v52, %v1342_v26  ;;  %v1389_v57 = vmul.f32 %v5540_v41, %v1334_v36  ;;  %v5541_v18 = vmov %v5540_v41  ;;  %v5542_v56 = vstv %s5200_s29  ;;  %s5609_s29 = sld [smem:[#allocation196_spill]] }
 0x24f   : >> { %v4097_v32 = vadd.f32 %v1384_v15, %v1366_v8  ;;  %v1390_v22 = vmul.f32 %v5541_v18, %v1342_v26  ;;  %v1394_v49 = vmul.f32 %v5542_v56, %v1334_v36  ;;  %v5543_v55 = vmov %v5542_v56  ;;  %v5572_v15 = vld [vmem:[#allocation256_spill] sm:$0xff] }
 0x250   : >> { %v1395_v46 = vmul.f32 %v5543_v55, %v1342_v26  ;;  %v4105_v20 = vadd.f32 %v1385_v51, %v1367_v47  ;;  %v4107_v59 = vadd.f32 %v1389_v57, %v1371_v34  ;;  %v5544_v16 = vstv %s5202_s10  ;;  %s5561_s10 = sld [smem:[#allocation65_spill]]  ;;  %v5580_v55 = vld [vmem:[#allocation259_spill] sm:$0xff] }
 0x251   : >> { %v1399_v5 = vmul.f32 %v5544_v16, %v1334_v36  ;;  %v5545_v9 = vmov %v5544_v16  ;;  %v4113_v58 = vadd.f32 %v1390_v22, %v1372_v0  ;;  %v4115_v1 = vadd.f32 %v1394_v49, %v1376_v63  ;;  %v1443_v0 = vpop.permute.xlu0 %1442 }
 0x252   : >> { %v1400_v35 = vmul.f32 %v5545_v9, %v1342_v26  ;;  %v4117_v23 = vadd.f32 %v1395_v46, %v1377_v33  ;;  %v1441_v28 = vsel %vm551_vm7, %v4007_v48, %v1437_v12  ;;  %v4126_v44 = vsel %vm551_vm7, %v1429_v27, %v1435_v11  ;;  %v4137_v12 = vld [vmem:[#allocation2 + $0x38] sm:$0xff] }
 0x253   : >> { %v4121_v10 = vadd.f32 %v1399_v5, %v1381_v42  ;;  %v1455_v60 = vsel %vm566_vm8, %v1445_v2, %v1451_v13  ;;  %v5549_v31 = vstv %s5245_s17  ;;  %v5550_v4 = vstv %s5246_s5  ;;  %s5562_s5 = sld [smem:[#allocation101_spill]]  ;;  %v5573_v42 = vld [vmem:[#allocation257_spill] sm:$0xff]  ;;  %s5581_s17 = sld [smem:[#allocation168_spill]] }
 0x254   : >> { %v4123_v36 = vadd.f32 %v1400_v35, %v1382_v25  ;;  %v4131_v21 = vsel %vm2680_vm2, %v1455_v60, %v1441_v28  ;;  %v4135_v48 = vsel %vm2684_vm3, %v1441_v28, %v1455_v60  ;;  %v1413_v54 = vmul.f32 %v4137_v12, %v5549_v31 }
 0x255   : >> { %5548 = vst [vmem:[#allocation263_spill] sm:$0xff] %v4135_v48  ;;  %v1418_v53 = vmul.f32 %v4137_v12, %v5550_v4  ;;  %v5551_v26 = vstv %s5546_s26  ;;  %v5553_v14 = vmov %v5550_v4  ;;  %v5555_v62 = vstv %s5206_s27  ;;  %s5559_s26 = sld [smem:[#allocation167_spill]] }
 0x256   : >> { %v4150_v43 = vmul.f32 %v5551_v26, %v4131_v21  ;;  %v4154_v61 = vmul.f32 %v2216_v30, %v5553_v14  ;;  %v4159_v39 = vmul.f32 %v5555_v62, %v4131_v21  ;;  %v5557_v47 = vstv %s5208_s15 }
 0x257   : >> { %v4164_v37 = vmul.f32 %v5557_v47, %v4131_v21  ;;  %v5558_v7 = vstv %s5210_s8  ;;  %v5563_v3 = vstv %s5212_s23  ;;  %v5566_v40 = vstv %s5213_s0 }
 0x258   : >> { %v4169_v27 = vmul.f32 %v5558_v7, %v4131_v21  ;;  %v4176_v29 = vmul.f32 %v5563_v3, %v4135_v48  ;;  %v4181_v50 = vmul.f32 %v5566_v40, %v4135_v48  ;;  %v5568_v34 = vstv %s5214_s7 }
 0x259   : >> { %v4186_v33 = vmul.f32 %v5568_v34, %v4135_v48  ;;  %v5570_v25 = vstv %s5222_s1  ;;  %v4194_v63 = vadd.f32 %v1413_v54, %v5572_v15  ;;  %v4197_v52 = vadd.f32 %v1418_v53, %v5573_v42 }
 0x25a   : >> { %5565 = vst [vmem:[#allocation264_spill] sm:$0xff] %v4176_v29  ;;  %5567 = vst [vmem:[#allocation265_spill] sm:$0xff] %v4181_v50  ;;  %v4191_v24 = vmul.f32 %v5570_v25, %v4135_v48  ;;  %v5575_v51 = vstv %s5248_s22  ;;  %v1540_v35 = vrot.slane %v4137_v12, 7  ;;  %v1542_v28 = vrot.slane %v2216_v30, 7  ;;  %s5592_s22 = sld [smem:[#allocation133_spill]] }
 0x25b   : >> { %s5560_s9 = smov %s5559_s26  ;;  %5569 = vst [vmem:[#allocation205_spill] sm:$0xff] %v4186_v33  ;;  %v1423_v41 = vmul.f32 %v4137_v12, %v5575_v51  ;;  %v5577_v57 = vmov %v5575_v51  ;;  %v1547_v11 = vrot.slane %v2216_v30, 1  ;;  %v1548_v60 = vrot.slane %v4137_v12, 1  ;;  %s5584_s26 = sld [smem:[#allocation135_spill]] }
 0x25c   : >> { %5571 = vst [vmem:[#allocation201_spill] sm:$0xff] %v4191_v24  ;;  %v4204_v18 = vmul.f32 %v2216_v30, %v5577_v57  ;;  %v1558_v31 = vstv %s5574_s12  ;;  %v1563_v54 = vstv %s5576_s13  ;;  %v1568_v4 = vstv %s5578_s14  ;;  %s5585_s12 = sld [smem:[#allocation171_spill]]  ;;  %s5586_s13 = sld [smem:[#allocation66_spill]]  ;;  %v5607_v24 = vld [vmem:[#allocation261_spill] sm:$0xff] }
 0x25d   : >> { %v4210_v46 = vadd.f32 %v1423_v41, %v5580_v55  ;;  %v1543_v26 = vsel %vm577_vm5, %v1542_v28, %v1540_v35  ;;  %v1546_v14 = vsel %vm577_vm5, %v1540_v35, %v1542_v28  ;;  %v1573_v62 = vstv %s5581_s17  ;;  %s5587_s14 = sld [smem:[#allocation102_spill]]  ;;  %s5588_s17 = sld [smem:[#allocation138_spill]] }
 0x25e   : >> { %v1549_v47 = vsel %vm583_vm6, %v1547_v11, %v1548_v60  ;;  %v1553_v7 = vsel %vm583_vm6, %v1548_v60, %v1547_v11  ;;  %v4227_v3 = vmul.f32 %v1558_v31, %v1543_v26  ;;  %v1578_v40 = vstv %s5582_s18  ;;  %s5589_s18 = sld [smem:[#allocation174_spill]] }
 0x25f   : >> { %v1554_v34 = vsel %vm488_vm1, %v1549_v47, %v1546_v14  ;;  %v1557_v25 = vsel %vm491_vm4, %v1543_v26, %v1553_v7  ;;  %v4234_v15 = vmul.f32 %v1563_v54, %v1543_v26  ;;  %v4236_v42 = vmul.f32 %v1568_v4, %v1543_v26 }
 0x260   : >> { %v4238_v51 = vmul.f32 %v1558_v31, %v1554_v34  ;;  %v4240_v41 = vmul.f32 %v1563_v54, %v1554_v34  ;;  %v4242_v57 = vmul.f32 %v1568_v4, %v1554_v34  ;;  %v4244_v55 = vmul.f32 %v1573_v62, %v1543_v26 }
 0x261   : >> { %v4246_v35 = vmul.f32 %v1573_v62, %v1554_v34  ;;  %v4248_v28 = vmul.f32 %v2216_v30, %v1578_v40  ;;  %v1583_v11 = vstv %s5583_s19  ;;  %v1588_v60 = vstv %s5584_s26  ;;  %s5593_s19 = sld [smem:[#allocation169_spill]]  ;;  %s5594_s26 = sld [smem:[#allocation67_spill]] }
 0x262   : >> { %v4253_v14 = vmul.f32 %v4137_v12, %v1578_v40  ;;  %v4255_v7 = vmul.f32 %v2216_v30, %v1583_v11  ;;  %v4258_v31 = vmul.f32 %v4137_v12, %v1583_v11  ;;  %v4260_v54 = vmul.f32 %v2216_v30, %v1588_v60 }
 0x263   : >> { %v1593_v4 = vstv %s5585_s12  ;;  %v1598_v26 = vstv %s5586_s13  ;;  %v1603_v62 = vstv %s5587_s14  ;;  %v1608_v34 = vstv %s5588_s17  ;;  %s5603_s12 = sld [smem:[#allocation176_spill]]  ;;  %s5604_s13 = sld [smem:[#allocation175_spill]] }
 0x264   : >> { %v4267_v40 = vmul.f32 %v4137_v12, %v1588_v60  ;;  %v4269_v8 = vmul.f32 %v2216_v30, %v1593_v4  ;;  %v4272_v11 = vmul.f32 %v4137_v12, %v1593_v4  ;;  %v4274_v53 = vmul.f32 %v1598_v26, %v1549_v47  ;;  %s5605_s14 = sld [smem:[#allocation180_spill]]  ;;  %s5606_s17 = sld [smem:[#allocation184_spill]] }
 0x265   : >> { %v4276_v9 = vmul.f32 %v1598_v26, %v1557_v25  ;;  %v4278_v5 = vmul.f32 %v1603_v62, %v1549_v47  ;;  %v4280_v16 = vmul.f32 %v1603_v62, %v1557_v25  ;;  %v4282_v13 = vmul.f32 %v1608_v34, %v1549_v47  ;;  %v1449_v62 = vpop.permute.xlu0 %1448 }
 0x266   : >> { %v4284_v60 = vmul.f32 %v1608_v34, %v1557_v25  ;;  %v1613_v49 = vstv %s5589_s18  ;;  %vm1705_vm9 = vcmp.gt.f32.partialorder %v5607_v24, 0.0  ;;  %v1707_v34 = vmul.f32 0.01, %v5607_v24  ;;  %s5608_s18 = sld [smem:[#allocation188_spill]] }
 0x267   : >> { %s5595_s24 = smov %s5594_s26  ;;  %5598 = vst [vmem:[#allocation206_spill] sm:$0xff] %v4280_v16  ;;  %5599 = vst [vmem:[#allocation202_spill] sm:$0xff] %v4282_v13  ;;  %v4289_v22 = vmul.f32 %v1613_v49, %v1549_v47  ;;  %v4291_v12 = vmul.f32 %v1613_v49, %v1557_v25  ;;  %vm1719_vm10 = vcmp.gt.f32.partialorder %v4194_v63, 0.0  ;;  %v1721_v49 = vmul.f32 0.01, %v4194_v63  ;;  %s5610_s26 = sld [smem:[#allocation197_spill]] }
 0x268   : >> { %5600 = vst [vmem:[#allocation207_spill] sm:$0xff] %v4284_v60  ;;  %vm1733_vm11 = vcmp.gt.f32.partialorder %v4197_v52, 0.0  ;;  %v1735_v47 = vmul.f32 0.01, %v4197_v52  ;;  %vm1747_vm12 = vcmp.gt.f32.partialorder %v4210_v46, 0.0  ;;  %v4310_v56 = vsel %vm1705_vm9, %v5607_v24, %v1707_v34 }
 0x269   : >> { %5601 = vst [vmem:[#allocation203_spill] sm:$0xff] %v4289_v22  ;;  %5602 = vst [vmem:[#allocation208_spill] sm:$0xff] %v4291_v12  ;;  %v1749_v25 = vmul.f32 0.01, %v4210_v46  ;;  %v5612_v2 = vstv %s5603_s12  ;;  %v4317_v48 = vsel %vm1719_vm10, %v4194_v63, %v1721_v49  ;;  %v5616_v22 = vstv %s2994_s30 }
 0x26a   : >> { %v518_v26 = vmul.f32 %v2217_v17, %v5612_v2  ;;  %v5613_v30 = vstv %s5605_s14  ;;  %v5614_v50 = vstv %s5606_s17  ;;  %5615 = vst [vmem:[#allocation204_spill] sm:$0xff] %v4317_v48  ;;  %v4320_v12 = vsel %vm1733_vm11, %v4197_v52, %v1735_v47  ;;  %v5622_v48 = vld [vmem:[#allocation249_spill] sm:$0xff] }
 0x26b   : >> { %v523_v33 = vmul.f32 %v2217_v17, %v5613_v30  ;;  %v528_v29 = vmul.f32 %v2217_v17, %v5614_v50  ;;  %v4327_v2 = vsel %vm1747_vm12, %v4210_v46, %v1749_v25  ;;  %v5619_v24 = vstv %s5609_s29  ;;  %v5623_v46 = vld [vmem:[#allocation250_spill] sm:$0xff]  ;;  %s5677_s29 = sld [smem:[#allocation139_spill]] }
 0x26c   : >> { %v520_v60 = vadd.f32 %v518_v26, %v5616_v22  ;;  %v5617_v13 = vstv %s5608_s18  ;;  %5618 = vst [vmem:[#allocation209_spill] sm:$0xff] %v4327_v2  ;;  %v1454_v50 = vsel %vm566_vm8, %v1443_v0, %v1449_v62  ;;  %v5621_v63 = vstv %s5611_s28  ;;  %v5625_v0 = vld [vmem:[#allocation252_spill] sm:$0xff]  ;;  %s5693_s28 = sld [smem:[#allocation200_spill]] }
 0x26d   : >> { %v533_v16 = vmul.f32 %v2217_v17, %v5617_v13  ;;  %v525_v34 = vadd.f32 %v523_v33, %v5619_v24  ;;  %v5620_v30 = vstv %s5610_s26  ;;  %v1456_v22 = vsel %vm2680_vm2, %v1454_v50, %v4126_v44  ;;  %v5624_v33 = vld [vmem:[#allocation251_spill] sm:$0xff] }
 0x26e   : >> { %v530_v4 = vadd.f32 %v528_v29, %v5620_v30  ;;  %v819_v52 = vadd.f32 %v5622_v48, %v520_v60  ;;  %v4343_v17 = vsel %vm2684_vm3, %v4126_v44, %v1454_v50  ;;  %v1464_v29 = vrot.slane %v1456_v22, 7  ;;  %v5629_v30 = vld [vmem:[#allocation254_spill] sm:$0xff]  ;;  %v5630_v44 = vld [vmem:[#allocation255_spill] sm:$0xff] }
 0x26f   : >> { %v535_v49 = vadd.f32 %v533_v16, %v5621_v63  ;;  %v824_v13 = vadd.f32 %v5623_v46, %v525_v34  ;;  %v1469_v47 = vrot.slane %v1456_v22, 1  ;;  %v5626_v16 = vld [vmem:[#allocation253_spill] sm:$0xff]  ;;  %v5627_v48 = vstv %s5547_s2 }
 0x270   : >> { %v829_v26 = vadd.f32 %v5624_v33, %v530_v4  ;;  %v1114_v25 = vadd.f32 %v5626_v16, %v819_v52  ;;  %v1501_v60 = vmul.f32 %v5627_v48, %v1456_v22  ;;  %v5628_v19 = vstv %s5206_s27  ;;  %v5633_v52 = vld [vmem:[#allocation258_spill] sm:$0xff]  ;;  %v5634_v33 = vld [vmem:[#allocation260_spill] sm:$0xff] }
 0x271   : >> { %v834_v62 = vadd.f32 %v5625_v0, %v535_v49  ;;  %v1506_v24 = vmul.f32 %v5628_v19, %v1456_v22  ;;  %v1119_v45 = vadd.f32 %v5629_v30, %v824_v13  ;;  %v5631_v4 = vrot.slane %v4131_v21, 7  ;;  %v5637_v19 = vld [vmem:[#allocation262_spill] sm:$0xff] }
 0x272   : >> { %v1124_v34 = vadd.f32 %v5630_v44, %v829_v26  ;;  %v4363_v0 = vadd.f32 %v5634_v33, %v1114_v25  ;;  %v5635_v13 = vrot.slane %v4131_v21, 1  ;;  %p2097_p3 = scmp.ne.s32.totalorder %s5693_s28, 2 }
 0x273   : >> { %v1465_v50 = vsel %vm577_vm5, %v1464_v29, %v5631_v4  ;;  %v5632_v63 = vmov %v5631_v4  ;;  %v1129_v46 = vadd.f32 %v5633_v52, %v834_v62  ;;  %v4372_v30 = vadd.f32 %v5637_v19, %v1119_v45  ;;  %s5694_s12 = sld [smem:[#allocation199_spill]] (!%p2097_p3) }
 0x274   : >> { %v1468_v49 = vsel %vm577_vm5, %v5632_v63, %v1464_v29  ;;  %v1471_v26 = vsel %vm583_vm6, %v1469_v47, %v5635_v13  ;;  %v5636_v16 = vmov %v5635_v13  ;;  %v4375_v29 = vadd.f32 %v4154_v61, %v1124_v34 }
 0x275   : >> { %v1475_v48 = vsel %vm583_vm6, %v5636_v16, %v1469_v47  ;;  %v1476_v62 = vsel %vm488_vm1, %v1471_v26, %v1468_v49  ;;  %v4382_v44 = vadd.f32 %v4204_v18, %v1129_v46  ;;  %v5638_v4 = vstv %s5552_s3 }
 0x276   : >> { %v1479_v25 = vsel %vm491_vm4, %v1465_v50, %v1475_v48  ;;  %v1481_v21 = vmul.f32 %v5638_v4, %v1476_v62  ;;  %v5639_v63 = vmov %v5638_v4  ;;  %v5640_v52 = vstv %s5554_s4 }
 0x277   : >> { %v1482_v47 = vmul.f32 %v5639_v63, %v1465_v50  ;;  %v1486_v33 = vmul.f32 %v5640_v52, %v1476_v62  ;;  %v5641_v45 = vmov %v5640_v52  ;;  %v5642_v16 = vstv %s5556_s6 }
 0x278   : >> { %v1487_v13 = vmul.f32 %v5641_v45, %v1465_v50  ;;  %v1491_v61 = vmul.f32 %v5642_v16, %v1476_v62  ;;  %v5643_v34 = vmov %v5642_v16  ;;  %v5644_v49 = vstv %s5560_s9 }
 0x279   : >> { %v1492_v19 = vmul.f32 %v5643_v34, %v1465_v50  ;;  %v1496_v2 = vmul.f32 %v5644_v49, %v1476_v62  ;;  %v1483_v48 = vadd.f32 %v1481_v21, %v4097_v32  ;;  %v1484_v18 = vadd.f32 %v1482_v47, %v4105_v20 }
 0x27a   : >> { %v1488_v46 = vadd.f32 %v1486_v33, %v4107_v59  ;;  %v5645_v4 = vmov %v5644_v49  ;;  %v1489_v52 = vadd.f32 %v1487_v13, %v4113_v58  ;;  %v1493_v45 = vadd.f32 %v1491_v61, %v4115_v1 }
 0x27b   : >> { %v1497_v63 = vmul.f32 %v5645_v4, %v1465_v50  ;;  %v1494_v16 = vadd.f32 %v1492_v19, %v4117_v23  ;;  %v1498_v62 = vadd.f32 %v1496_v2, %v4121_v10  ;;  %v1503_v20 = vadd.f32 %v1501_v60, %v1483_v48 }
 0x27c   : >> { %v1504_v21 = vadd.f32 %v4150_v43, %v1484_v18  ;;  %v1508_v59 = vadd.f32 %v1506_v24, %v1488_v46  ;;  %v1509_v50 = vadd.f32 %v4159_v39, %v1489_v52  ;;  %v5646_v47 = vstv %s5208_s15 }
 0x27d   : >> { %v1499_v32 = vadd.f32 %v1497_v63, %v4123_v36  ;;  %v1511_v33 = vmul.f32 %v5646_v47, %v1456_v22  ;;  %v1514_v58 = vadd.f32 %v4164_v37, %v1494_v16  ;;  %v5647_v1 = vstv %s5210_s8 }
 0x27e   : >> { %v1516_v23 = vmul.f32 %v5647_v1, %v1456_v22  ;;  %v5648_v2 = vstv %s5561_s10  ;;  %v5650_v61 = vstv %s5562_s5  ;;  %v5652_v49 = vstv %s5564_s11 }
 0x27f   : >> { %v1519_v10 = vadd.f32 %v4169_v27, %v1499_v32  ;;  %v1521_v13 = vmul.f32 %v5648_v2, %v1471_v26  ;;  %v5649_v36 = vmov %v5648_v2  ;;  %v1526_v43 = vmul.f32 %v5650_v61, %v1471_v26 }
 0x280   : >> { %v1522_v60 = vmul.f32 %v5649_v36, %v1479_v25  ;;  %v1513_v24 = vadd.f32 %v1511_v33, %v1493_v45  ;;  %v1518_v34 = vadd.f32 %v1516_v23, %v1498_v62  ;;  %v5651_v19 = vmov %v5650_v61  ;;  %v5661_v36 = vld [vmem:[#allocation208_spill] sm:$0xff] }
 0x281   : >> { %v1527_v39 = vmul.f32 %v5651_v19, %v1479_v25  ;;  %v1531_v48 = vmul.f32 %v5652_v49, %v1471_v26  ;;  %v1523_v18 = vadd.f32 %v1521_v13, %v1503_v20  ;;  %v1528_v46 = vadd.f32 %v1526_v43, %v1508_v59  ;;  %v5658_v13 = vld [vmem:[#allocation207_spill] sm:$0xff] }
 0x282   : >> { %v1524_v37 = vadd.f32 %v1522_v60, %v1504_v21  ;;  %v5653_v4 = vmov %v5652_v49  ;;  %v5654_v27 = vstv %s5579_s16  ;;  %v5662_v61 = vstv %s5213_s0  ;;  %v5664_v19 = vld [vmem:[#allocation263_spill] sm:$0xff] }
 0x283   : >> { %v1532_v22 = vmul.f32 %v5653_v4, %v1479_v25  ;;  %v1529_v63 = vadd.f32 %v1527_v39, %v1509_v50  ;;  %v1533_v52 = vadd.f32 %v1531_v48, %v1513_v24  ;;  %v1536_v16 = vmul.f32 %v5654_v27, %v1471_v26 }
 0x284   : >> { %v5655_v32 = vmov %v5654_v27  ;;  %v1561_v2 = vadd.f32 %v4238_v51, %v1523_v18  ;;  %v1562_v45 = vadd.f32 %v4227_v3, %v1524_v37  ;;  %v1566_v62 = vadd.f32 %v4240_v41, %v1528_v46 }
 0x285   : >> { %v1537_v47 = vmul.f32 %v5655_v32, %v1479_v25  ;;  %v1534_v1 = vadd.f32 %v1532_v22, %v1514_v58  ;;  %v1538_v33 = vadd.f32 %v1536_v16, %v1518_v34  ;;  %v1567_v20 = vadd.f32 %v4234_v15, %v1529_v63  ;;  %v5656_v58 = vld [vmem:[#allocation206_spill] sm:$0xff] }
 0x286   : >> { %v1571_v21 = vadd.f32 %v4242_v57, %v1533_v52  ;;  %v1581_v50 = vadd.f32 %v4248_v28, %v1561_v2  ;;  %v1582_v26 = vadd.f32 %v4253_v14, %v1562_v45  ;;  %v1586_v25 = vadd.f32 %v4255_v7, %v1566_v62 }
 0x287   : >> { %v1539_v23 = vadd.f32 %v1537_v47, %v1519_v10  ;;  %v1572_v59 = vadd.f32 %v4236_v42, %v1534_v1  ;;  %v1576_v51 = vadd.f32 %v4246_v35, %v1538_v33  ;;  %v1587_v41 = vadd.f32 %v4258_v31, %v1567_v20  ;;  %v5657_v10 = vld [vmem:[#allocation202_spill] sm:$0xff] }
 0x288   : >> { %v1591_v15 = vadd.f32 %v4260_v54, %v1571_v21  ;;  %v1601_v42 = vadd.f32 %v4274_v53, %v1581_v50  ;;  %v1602_v28 = vadd.f32 %v4276_v9, %v1582_v26  ;;  %v1606_v14 = vadd.f32 %v4278_v5, %v1586_v25  ;;  %v5660_v53 = vld [vmem:[#allocation203_spill] sm:$0xff] }
 0x289   : >> { %v1577_v3 = vadd.f32 %v4244_v55, %v1539_v23  ;;  %v1592_v57 = vadd.f32 %v4267_v40, %v1572_v59  ;;  %v1596_v7 = vadd.f32 %v4269_v8, %v1576_v51  ;;  %v1607_v55 = vadd.f32 %v5656_v58, %v1587_v41  ;;  %v5678_v58 = vld [vmem:[#allocation264_spill] sm:$0xff] }
 0x28a   : >> { %v1611_v31 = vadd.f32 %v5657_v10, %v1591_v15  ;;  %v1622_v40 = vrot.slane %v4343_v17, 7  ;;  %v1627_v9 = vrot.slane %v4343_v17, 1  ;;  %v5659_v5 = vstv %s5212_s23  ;;  %v5679_v10 = vld [vmem:[#allocation265_spill] sm:$0xff] }
 0x28b   : >> { %v1597_v35 = vadd.f32 %v4272_v11, %v1577_v3  ;;  %v1612_v54 = vadd.f32 %v5658_v13, %v1592_v57  ;;  %v1659_v8 = vmul.f32 %v5659_v5, %v4343_v17  ;;  %v1616_v11 = vadd.f32 %v5660_v53, %v1596_v7  ;;  %v5680_v5 = vld [vmem:[#allocation205_spill] sm:$0xff] }
 0x28c   : >> { %v1664_v43 = vmul.f32 %v5662_v61, %v4343_v17  ;;  %v5663_v24 = vstv %s5214_s7  ;;  %v5665_v39 = vrot.slane %v5664_v19, 7  ;;  %v5667_v37 = vrot.slane %v5664_v19, 1 }
 0x28d   : >> { %v1617_v60 = vadd.f32 %v5661_v36, %v1597_v35  ;;  %v1669_v34 = vmul.f32 %v5663_v24, %v4343_v17  ;;  %v5669_v27 = vstv %s5590_s20  ;;  %v5670_v32 = vstv %s5591_s21  ;;  %v5682_v36 = vld [vmem:[#allocation201_spill] sm:$0xff] }
 0x28e   : >> { %v1623_v49 = vsel %vm577_vm5, %v1622_v40, %v5665_v39  ;;  %v5666_v48 = vmov %v5665_v39  ;;  %v1629_v46 = vsel %vm583_vm6, %v1627_v9, %v5667_v37  ;;  %v5668_v4 = vmov %v5667_v37 }
 0x28f   : >> { %v1626_v18 = vsel %vm577_vm5, %v5666_v48, %v1622_v40  ;;  %v1633_v22 = vsel %vm583_vm6, %v5668_v4, %v1627_v9  ;;  %v1640_v16 = vmul.f32 %v5669_v27, %v1623_v49  ;;  %v1645_v47 = vmul.f32 %v5670_v32, %v1623_v49 }
 0x290   : >> { %v1634_v63 = vsel %vm488_vm1, %v1629_v46, %v1626_v18  ;;  %v1637_v52 = vsel %vm491_vm4, %v1623_v49, %v1633_v22  ;;  %v5671_v1 = vmov %v5669_v27  ;;  %v5672_v45 = vmov %v5670_v32 }
 0x291   : >> { %v1639_v2 = vmul.f32 %v5671_v1, %v1634_v63  ;;  %v1644_v62 = vmul.f32 %v5672_v45, %v1634_v63  ;;  %v5673_v33 = vstv %s5592_s22  ;;  %v1642_v59 = vadd.f32 %v1640_v16, %v1602_v28 }
 0x292   : >> { %v1649_v23 = vmul.f32 %v5673_v33, %v1634_v63  ;;  %v5674_v20 = vmov %v5673_v33  ;;  %v1647_v50 = vadd.f32 %v1645_v47, %v1607_v55  ;;  %v5675_v26 = vstv %s5593_s19 }
 0x293   : >> { %v1650_v21 = vmul.f32 %v5674_v20, %v1623_v49  ;;  %v1654_v25 = vmul.f32 %v5675_v26, %v1634_v63  ;;  %v5676_v51 = vmov %v5675_v26  ;;  %v1641_v3 = vadd.f32 %v1639_v2, %v1601_v42 }
 0x294   : >> { %v1655_v38 = vmul.f32 %v5676_v51, %v1623_v49  ;;  %v1646_v41 = vadd.f32 %v1644_v62, %v1606_v14  ;;  %v1651_v15 = vadd.f32 %v1649_v23, %v1611_v31  ;;  %v1662_v28 = vadd.f32 %v5678_v58, %v1642_v59 }
 0x295   : >> { %v1652_v57 = vadd.f32 %v1650_v21, %v1612_v54  ;;  %v1656_v7 = vadd.f32 %v1654_v25, %v1616_v11  ;;  %v1667_v55 = vadd.f32 %v5679_v10, %v1647_v50  ;;  %v1661_v13 = vadd.f32 %v1659_v8, %v1641_v3 }
 0x296   : >> { %v1657_v35 = vadd.f32 %v1655_v38, %v1617_v60  ;;  %v1666_v40 = vadd.f32 %v1664_v43, %v1646_v41  ;;  %v1671_v9 = vadd.f32 %v1669_v34, %v1651_v15  ;;  %v5681_v42 = vstv %s5222_s1  ;;  %v5691_v41 = vld [vmem:[#allocation204_spill] sm:$0xff] }
 0x297   : >> { %v1672_v53 = vadd.f32 %v5680_v5, %v1652_v57  ;;  %v1674_v14 = vmul.f32 %v5681_v42, %v4343_v17  ;;  %v5683_v54 = vstv %s5595_s24  ;;  %v5685_v24 = vstv %s5596_s25  ;;  %v5692_v42 = vld [vmem:[#allocation209_spill] sm:$0xff] }
 0x298   : >> { %v1677_v31 = vadd.f32 %v5682_v36, %v1657_v35  ;;  %v1679_v61 = vmul.f32 %v5683_v54, %v1629_v46  ;;  %v5684_v11 = vmov %v5683_v54  ;;  %v1684_v19 = vmul.f32 %v5685_v24, %v1629_v46 }
 0x299   : >> { %v1680_v60 = vmul.f32 %v5684_v11, %v1637_v52  ;;  %v5686_v39 = vmov %v5685_v24  ;;  %v5687_v48 = vstv %s5677_s29  ;;  %v1676_v18 = vadd.f32 %v1674_v14, %v1656_v7 }
 0x29a   : >> { %v1685_v49 = vmul.f32 %v5686_v39, %v1637_v52  ;;  %v1689_v8 = vmul.f32 %v5687_v48, %v1629_v46  ;;  %v5688_v43 = vmov %v5687_v48  ;;  %v1681_v37 = vadd.f32 %v1679_v61, %v1661_v13 }
 0x29b   : >> { %v1690_v34 = vmul.f32 %v5688_v43, %v1637_v52  ;;  %v1682_v4 = vadd.f32 %v1680_v60, %v1662_v28  ;;  %v5689_v22 = vstv %s5604_s13  ;;  %v1686_v63 = vadd.f32 %v1684_v19, %v1666_v40 }
 0x29c   : >> { %v1694_v17 = vmul.f32 %v5689_v22, %v1629_v46  ;;  %v1687_v27 = vadd.f32 %v1685_v49, %v1667_v55  ;;  %v1691_v16 = vadd.f32 %v1689_v8, %v1671_v9  ;;  %v5690_v47 = vmov %v5689_v22 }
 0x29d   : >> { %v1692_v32 = vadd.f32 %v1690_v34, %v1672_v53  ;;  %v1695_v1 = vmul.f32 %v5690_v47, %v1637_v52  ;;  %vm1698_vm13 = vcmp.gt.f32.partialorder %v1681_v37, 0.0  ;;  %vm1699_vm14 = vcmp.gt.f32.partialorder %v1682_v4, 0.0 }
 0x29e   : >> { %v1696_v2 = vadd.f32 %v1694_v17, %v1676_v18  ;;  %v1700_v45 = vmul.f32 0.01, %v1681_v37  ;;  %v1701_v62 = vmul.f32 0.01, %v1682_v4  ;;  %vm1704_vm15 = vcmp.gt.f32.partialorder %v4363_v0, 0.0 }
 0x29f   : >> { %vm1712_vm5 = vcmp.gt.f32.partialorder %v1686_v63, 0.0  ;;  %v1697_v33 = vadd.f32 %v1695_v1, %v1677_v31  ;;  %v1706_v23 = vmul.f32 0.01, %v4363_v0  ;;  %vm1713_vm6 = vcmp.gt.f32.partialorder %v1687_v27, 0.0 }
 0x2a0   : >> { %v1714_v20 = vmul.f32 0.01, %v1686_v63  ;;  %v1702_v46 = vsel %vm1698_vm13, %v1681_v37, %v1700_v45  ;;  %v1703_v21 = vsel %vm1699_vm14, %v1682_v4, %v1701_v62  ;;  %v1715_v59 = vmul.f32 0.01, %v1687_v27 }
 0x2a1   : >> { %vm1718_vm7 = vcmp.gt.f32.partialorder %v4372_v30, 0.0  ;;  %v1708_v52 = vsel %vm1704_vm15, %v4363_v0, %v1706_v23  ;;  %v1711_v50 = vadd.f32 %v4310_v56, %v1703_v21  ;;  %v1720_v25 = vmul.f32 0.01, %v4372_v30 }
 0x2a2   : >> { %v1716_v26 = vsel %vm1712_vm5, %v1686_v63, %v1714_v20  ;;  %v1710_v51 = vadd.f32 %v1708_v52, %v1702_v46  ;;  %v1717_v38 = vsel %vm1713_vm6, %v1687_v27, %v1715_v59  ;;  %vm1726_vm8 = vcmp.gt.f32.partialorder %v1691_v16, 0.0 }
 0x2a3   : >> { %vm1727_vm9 = vcmp.gt.f32.partialorder %v1692_v32, 0.0  ;;  %v1722_v3 = vsel %vm1718_vm7, %v4372_v30, %v1720_v25  ;;  %v1725_v15 = vadd.f32 %v5691_v41, %v1717_v38  ;;  %v1728_v57 = vmul.f32 0.01, %v1691_v16  ;;  %1759 = vst.msk [vmem:[%s5694_s12 + $0x8] sm:$0xff] (!%p2097_p3), %vm500_vm0, %v1711_v50 }
 0x2a4   : >> { %v1729_v7 = vmul.f32 0.01, %v1692_v32  ;;  %v1724_v35 = vadd.f32 %v1722_v3, %v1716_v26  ;;  %vm1732_vm10 = vcmp.gt.f32.partialorder %v4375_v29, 0.0  ;;  %v1734_v0 = vmul.f32 0.01, %v4375_v29  ;;  %1757 = sbr.rel (%p2097_p3) target bundleno = 685 (0x2ad), region = 71 }
 0x2a5   : >> { %vm1740_vm11 = vcmp.gt.f32.partialorder %v1696_v2, 0.0  ;;  %v1730_v56 = vsel %vm1726_vm8, %v1691_v16, %v1728_v57  ;;  %vm1741_vm12 = vcmp.gt.f32.partialorder %v1697_v33, 0.0  ;;  %v1742_v28 = vmul.f32 0.01, %v1696_v2  ;;  %1758 = vst.msk [vmem:[%s5694_s12] sm:$0xff] (!%p2097_p3), %vm500_vm0, %v1710_v51  ;;  %2099 = vst.msk [vmem:[%s5694_s12 + $0x18] sm:$0xff] (!%p2097_p3), %vm500_vm0, %v1725_v15 }
 0x2a6   : >> { %v1731_v58 = vsel %vm1727_vm9, %v1692_v32, %v1729_v7  ;;  %v1736_v10 = vsel %vm1732_vm10, %v4375_v29, %v1734_v0  ;;  %v1743_v13 = vmul.f32 0.01, %v1697_v33  ;;  %vm1746_vm13 = vcmp.gt.f32.partialorder %v4382_v44, 0.0  ;;  %2098 = vst.msk [vmem:[%s5694_s12 + $0x10] sm:$0xff] (!%p2097_p3), %vm500_vm0, %v1724_v35 }
 0x2a7   : >> { %v1739_v55 = vadd.f32 %v4320_v12, %v1731_v58  ;;  %v1738_v30 = vadd.f32 %v1736_v10, %v1730_v56  ;;  %v1744_v40 = vsel %vm1740_vm11, %v1696_v2, %v1742_v28  ;;  %v1748_v9 = vmul.f32 0.01, %v4382_v44 }
 0x2a8   : >> { %v1745_v5 = vsel %vm1741_vm12, %v1697_v33, %v1743_v13 }
 0x2a9   : >> { %v1750_v53 = vsel %vm1746_vm13, %v4382_v44, %v1748_v9  ;;  %v1753_v14 = vadd.f32 %v5692_v42, %v1745_v5  ;;  %2100 = vst.msk [vmem:[%s5694_s12 + $0x20] sm:$0xff] (!%p2097_p3), %vm500_vm0, %v1738_v30  ;;  %2101 = vst.msk [vmem:[%s5694_s12 + $0x28] sm:$0xff] (!%p2097_p3), %vm500_vm0, %v1739_v55 }
 0x2aa   : >> { %v1752_v36 = vadd.f32 %v1750_v53, %v1744_v40 }
 0x2ab   : >> { %2103 = vst.msk [vmem:[%s5694_s12 + $0x38] sm:$0xff] %vm500_vm0, %v1753_v14 }
 0x2ac   : >> { %2102 = vst.msk [vmem:[%s5694_s12 + $0x30] sm:$0xff] %vm500_vm0, %v1752_v36 }
 0x2ad PF: >> { %s5695_s14 = sld [smem:[#allocation200_spill]] }
 0x2b3   : >> { %p2104_p5 = scmp.ge.s32.totalorder %s5695_s14, 2 }
 0x2b4   : >> { %1773 = vst.msk [vmem:[#allocation2] sm:$0xff] (!%p2104_p5), %vm500_vm0, %v1710_v51  ;;  %1774 = vst.msk [vmem:[#allocation2 + $0x8] sm:$0xff] (!%p2104_p5), %vm500_vm0, %v1711_v50 }
 0x2b5   : >> { %1772 = sbr.rel (%p2104_p5) target bundleno = 700 (0x2bc), region = 75  ;;  %1775 = vst.msk [vmem:[#allocation2 + $0x10] sm:$0xff] (!%p2104_p5), %vm500_vm0, %v1724_v35  ;;  %1776 = vst.msk [vmem:[#allocation2 + $0x18] sm:$0xff] (!%p2104_p5), %vm500_vm0, %v1725_v15 }
 0x2b6   : >> { %1777 = vst.msk [vmem:[#allocation2 + $0x20] sm:$0xff] (!%p2104_p5), %vm500_vm0, %v1738_v30  ;;  %1778 = vst.msk [vmem:[#allocation2 + $0x28] sm:$0xff] (!%p2104_p5), %vm500_vm0, %v1739_v55 }
 0x2b7   : >> { %1779 = vst.msk [vmem:[#allocation2 + $0x30] sm:$0xff] (!%p2104_p5), %vm500_vm0, %v1752_v36  ;;  %1780 = vst.msk [vmem:[#allocation2 + $0x38] sm:$0xff] (!%p2104_p5), %vm500_vm0, %v1753_v14 }
 0x2bc PF: >> { %s5696_s17 = sld [smem:[#allocation200_spill]] }
 0x2c2   : >> { %s514_s26 = sadd.s32 1, %s5696_s17  }
 0x2c3   : >> { %p511_p10 = scmp.ge.s32.totalorder %s514_s26, 3  }
 0x2c4   : > { %s5697_s18 = sld [smem:[#allocation23_spill]] (%p511_p10)  ;;  %s5698_s28 = sld [smem:[#allocation199_spill]] (%p511_p10) }
 0x2c5   : > { %513 = sbr.rel (!%p511_p10) target bundleno = 316 (0x13c), region = 124  ;;  %s5699_s12 = sld [smem:[#allocation28_spill]] (%p511_p10) }
 0x2c6   : > { %s5700_s14 = sld [smem:[#allocation27_spill]] (%p511_p10)  ;;  %s5701_s1 = sld [smem:[#allocation271_spill]] (%p511_p10) }
 0x2c7   : > { %s2405_s8 = smov (%p511_p10), [#allocation13]  }
 0x2c8   : > { %s2310_s30 = sshll.u32 (%p511_p10), %s2405_s8, 4  ;;  %s2311_s30 = int_to_ptr.vmem [resolvable:$false] %s2310_s30 }
 0x2c9   : > { %s2312_s24 = scalar_lea.vmem (%p511_p10), %s2311_s30, 2048 }
 0x2ca   : > { %s2111_s17 = sshll.u32 (%p511_p10), %s5697_s18, 10  ;;  %s1795_s3 = sshll.u32 (%p511_p10), %s5698_s28, 4  ;;  %s4574_s3 = int_to_ptr.vmem [resolvable:$true] %s1795_s3 }
 0x2cb   : > { %s1782_s4 = scalar_lea.sflag (%p511_p10), [#allocation5], %s5699_s12  ;;  %s2306_s5 = scalar_lea.vmem (%p511_p10), %s4574_s3, 1024 }
 0x2cc   : > { %s4571_s2 = scalar_lea.hbm %s5701_s1, %s2111_s17  ;;  %p2307_p12 = scmp.ne.s32.totalorder %s4574_s3, %s2306_s5 }
 0x2cd   : > { %p5702_p13 = scmp.ne.s32.totalorder %s5700_s14, 0  ;;  %p2313_p6 = scmp.lt.s32.totalorder %s4574_s3, %s2311_s30 }
 0x2ce   : > { %p2314_p7 = scmp.lt.s32.totalorder %s2312_s24, %s2306_s5 }
 0x2cf   : > { %p2308_p0 = pnand %p2307_p12, %p5702_p13 }
 0x2d0   : > { %p2315_p4 = por %p2314_p7, %p2313_p6 }
 0x2d1   : > { %p2309_p9 = pneg %p2308_p0 }
 0x2d3   : > { %p2316_p1 = pnand %p2315_p4, %p2309_p9 }
 0x2d5   : > { %2319 = shalt.err (!%p2316_p1)
}
 0x2d6   : > { %s2320_s11 = scalar_lea.hbm %s4571_s2, 1024  ;;  %s2324_s15 = scalar_lea.hbm %s5701_s1, 2048 }
 0x2d7   : > { %p2321_p2 = scmp.ne.s32.totalorder %s4571_s2, %s2320_s11  ;;  %p2325_p3 = scmp.lt.u32.totalorder %s4571_s2, %s5701_s1 }
 0x2d8   : > { %p2326_p5 = scmp.lt.u32.totalorder %s2324_s15, %s2320_s11  ;;  %p2328_p12 = scmp.lt.u32.totalorder %s2320_s11, %s4571_s2 }
 0x2d9   : > { %p2322_p11 = pnand %p2321_p2, %p5702_p13 }
 0x2da   : > { %p2327_p10 = por %p2326_p5, %p2325_p3 }
 0x2db   : > { %p2323_p8 = pneg %p2322_p11 }
 0x2dc   : > { %p2329_p0 = por %p2328_p12, %p2327_p10 }
 0x2de   : > { %p2330_p9 = pnand %p2329_p0, %p2323_p8 }
 0x2e0   : > { %2333 = shalt.err (!%p2330_p9)
}
 0x2e1   : > { %s2406_s20 = smov 128   ;;  %s2407_s6 = smov 8  }
 0x2e2   : > { %2130 = dma.vmem_to_hbm [thread:$0]  (%p5702_p13), %s4574_s3, 1024, %s4571_s2, %s1782_s4, %s2406_s20, %s2406_s20, %s2407_s6  }
 0x2e3 PF: > { %s5703_s10 = sld [smem:[#allocation19_spill]]  ;;  %s5704_s23 = sld [smem:[#allocation24_spill]] }
 0x2e4   : > { %s5705_s22 = sld [smem:[#allocation22_spill]] }
 0x2e9   : > { %s1810_s21 = sand.u32 1, %s5703_s10   ;;  %p5706_p6 = scmp.ne.s32.totalorder %s5704_s23, 0 }
 0x2ea   : > { %p5707_p7 = scmp.ge.s32.totalorder %s5705_s22, 2  ;;  %s1811_s16 = scalar_lea.sflag [#allocation5], %s1810_s21 }
 0x2ec   : > { %p2150_p4 = pnand %p5707_p7, %p5706_p6 }
 0x2ee   : > { %2371 = dma.done.wait (!%p2150_p4), %s1811_s16, 1024  }
 0x2ef   : > { %2373 = vsyncadd (!%p2150_p4), %s1811_s16, 4294966272  ;;  %s5708_s21 = sld [smem:[#allocation25_spill]]  ;;  %s5709_s18 = sld [smem:[#allocation20_spill]] }
 0x2f0   : > { %s5710_s19 = sld [smem:[#allocation21_spill]]  ;;  %s5711_s20 = sld [smem:[#allocation26_spill]] }
 0x2f5   : > { %p21_p1 = scmp.ge.s32.totalorder %s5708_s21, 4  }
 0x2f7   :  { %23 = sbr.rel (!%p21_p1) target bundleno = 15 (0xf), region = 135 }
 0x2fe   :  { %1816 = vsyncpa [#allocation4], 1 }
 0x2ff   :  { %1818 = vsyncpa [#allocation4 + $0x1], 1 }
 0x300   :  { %1819 = vsyncpa [#allocation5], 1 }
 0x301   :  { %1821 = vsyncpa [#allocation5 + $0x1], 1 }
 0x302   :  { %1822 = vsyncpa [#allocation6], 1 }
 0x303   :  { %1824 = vsyncpa [#allocation6 + $0x1], 1 }
 0x304   :  { %1825 = vsyncpa [#allocation7], 1 }
 0x305   :  { %1827 = vsyncpa [#allocation7 + $0x1], 1 }
 0x306   :  { %1828 = vsyncpa [#allocation10], 1 }

</bundles_post_ra>
